<compile_context>
chip_gen: v7x
topology: tpu7x:2x2x1
jax: 0.10.0
libtpu: 0.0.40
codegen_flags: <defaults>
</compile_context>

<pallas_src>
import jax
import jax.numpy as jnp
from jax.experimental import pallas as pl
from jax.experimental.pallas import tpu as pltpu

# TODO(synk): src.models.x_size and src.utils.init_weights are not given; X_SIZE=32 and a
# scaled-normal init are assumed.
X_SIZE = 32
LAYER_DIMS = [X_SIZE, 512, 128, 32, 8, 1]          # logical (torch) dims
TILE_B = 256                                        # MXU height on v6e/v7x (use 128 on v5e)

_SELU_ALPHA = 1.6732632423543772848170429916717
_SELU_SCALE = 1.0507009873554804934193349852946


def _round_up(n, m):
    return ((n + m - 1) // m) * m


PAD = [_round_up(d, 128) for d in LAYER_DIMS]       # [128, 512, 128, 128, 128, 128]


def _selu(x):
    # exp only on the clamped (non-positive) branch -> no inf in the unselected branch.
    neg = _SELU_ALPHA * (jnp.exp(jnp.minimum(x, 0.0)) - 1.0)
    return _SELU_SCALE * jnp.where(x > 0, x, neg)


# ---------------------------------------------------------------------------
# Kernel: 4x (Linear + SELU) then Linear(8,1), all on padded 128-lane tiles.
# ---------------------------------------------------------------------------
def _fdgan_kernel(x_ref,
                  w1_ref, b1_ref,
                  w2_ref, b2_ref,
                  w3_ref, b3_ref,
                  w4_ref, b4_ref,
                  w5_ref, b5_ref,
                  hid_ref, out_ref):
    def linear(h_bf16, w_ref, b_ref):
        # bf16 x bf16 -> f32 accumulate on the MXU; bias add in f32.
        return jnp.dot(h_bf16, w_ref[...],
                       preferred_element_type=jnp.float32) + b_ref[...]

    h = x_ref[...]                                           # (TILE_B, 128) bf16
    h = _selu(linear(h, w1_ref, b1_ref))                     # f32 (TILE_B, 512)
    h = _selu(linear(h.astype(jnp.bfloat16), w2_ref, b2_ref))
    h = _selu(linear(h.astype(jnp.bfloat16), w3_ref, b3_ref))
    h = _selu(linear(h.astype(jnp.bfloat16), w4_ref, b4_ref))  # (TILE_B, 128); lanes 8.. = 0
    hid_ref[...] = h                                          # lane-dense padded hidden
    out_ref[...] = linear(h.astype(jnp.bfloat16), w5_ref, b5_ref)  # logit in lane 0


# ---------------------------------------------------------------------------
# Parameter preprocessing (one-time, wrapper-side).
# ---------------------------------------------------------------------------
def _spectral_normalize(w, n_iter=30):
    """Divide by a power-iteration estimate of the largest singular value."""
    u = jnp.full((w.shape[1],), 1.0 / jnp.sqrt(w.shape[1]), w.dtype)
    v = w @ u
    for _ in range(n_iter):                     # one-time init cost; unrolled trace is fine
        v = w @ u
        v = v / (jnp.linalg.norm(v) + 1e-12)
        u = w.T @ v
        u = u / (jnp.linalg.norm(u) + 1e-12)
    sigma = v @ (w @ u)
    return w / sigma


def _pad2(a, rows, cols, dtype):
    out = jnp.zeros((rows, cols), dtype)
    return out.at[:a.shape[0], :a.shape[1]].set(a.astype(dtype))


def init_params(key):
    """Returns (raw f32 params for reference, padded bf16/f32 params for the kernel)."""
    raw, padded = [], []
    for i in range(len(LAYER_DIMS) - 1):
        fan_in, fan_out = LAYER_DIMS[i], LAYER_DIMS[i + 1]
        key, wk, bk = jax.random.split(key, 3)
        w = jax.random.normal(wk, (fan_in, fan_out), jnp.float32) * (1.0 / jnp.sqrt(fan_in))
        w = _spectral_normalize(w)
        b = jax.random.normal(bk, (1, fan_out), jnp.float32) * 0.01
        raw.append((w, b))
        padded.append((_pad2(w, PAD[i], PAD[i + 1], jnp.bfloat16),   # bf16 MXU inputs
                       _pad2(b, 1, PAD[i + 1], jnp.float32)))        # f32 bias
    return raw, padded


# ---------------------------------------------------------------------------
# Forward wrapper.
# ---------------------------------------------------------------------------
def fdgan_sd_forward(x, padded_params):
    """Returns (output [B,1], hidden_output [B,8]) matching the torch forward."""
    B, F = x.shape
    pB = _round_up(max(B, 1), TILE_B)

    # Pad batch to a multiple of TILE_B and features to 128 lanes; cast to bf16.
    x_p = jnp.zeros((pB, PAD[0]), jnp.bfloat16).at[:B, :F].set(x.astype(jnp.bfloat16))

    flat, in_specs = [], [pl.BlockSpec((TILE_B, PAD[0]), lambda i: (i, 0))]
    for w, b in padded_params:
        flat.extend([w, b])
        in_specs.append(pl.BlockSpec(w.shape, lambda i: (0, 0)))   # weight resident in VMEM
        in_specs.append(pl.BlockSpec(b.shape, lambda i: (0, 0)))   # bias resident in VMEM

    cost = pl.CostEstimate(
        flops=2 * pB * sum(PAD[i] * PAD[i + 1] for i in range(5)),
        transcendentals=pB * sum(PAD[1:5]),
        bytes_accessed=(x_p.size * 2
                        + sum(w.size * 2 + b.size * 4 for w, b in padded_params)
                        + pB * (PAD[4] + PAD[5]) * 4),
    )

    hid_p, out_p = pl.pallas_call(
        _fdgan_kernel,
        grid=(pB // TILE_B,),
        out_shape=(jax.ShapeDtypeStruct((pB, PAD[4]), jnp.float32),   # padded hidden
                   jax.ShapeDtypeStruct((pB, PAD[5]), jnp.float32)),  # padded logit slab
        in_specs=in_specs,
        out_specs=(pl.BlockSpec((TILE_B, PAD[4]), lambda i: (i, 0)),
                   pl.BlockSpec((TILE_B, PAD[5]), lambda i: (i, 0))),
        compiler_params=pltpu.CompilerParams(dimension_semantics=("parallel",)),
        cost_estimate=cost,
    )(x_p, *flat)

    hidden = hid_p[:B, :LAYER_DIMS[4]]   # (B, 8)
    output = out_p[:B, :LAYER_DIMS[5]]   # (B, 1)
    return output, hidden


# ---------------------------------------------------------------------------
# Pure-JAX reference (same bf16 matmul inputs / f32 accumulation as the kernel).
# ---------------------------------------------------------------------------
def _reference_forward(x, raw_params):
    h = x.astype(jnp.float32)
    for w, b in raw_params[:4]:
        y = jnp.dot(h.astype(jnp.bfloat16), w.astype(jnp.bfloat16),
                    preferred_element_type=jnp.float32) + b
        h = _selu(y)
    w5, b5 = raw_params[4]
    out = jnp.dot(h.astype(jnp.bfloat16), w5.astype(jnp.bfloat16),
                  preferred_element_type=jnp.float32) + b5
    return out, h


if __name__ == "__main__":
    key = jax.random.PRNGKey(0)
    pkey, xkey = jax.random.split(key)
    raw_params, padded_params = init_params(pkey)

    B = 8
    x = jax.random.normal(xkey, (B, X_SIZE), jnp.float32)

    output, hidden = fdgan_sd_forward(x, padded_params)
    jax.block_until_ready((output, hidden))

    assert output.shape == (B, 1)
    assert hidden.shape == (B, 8)

    ref_out, ref_hid = _reference_forward(x, raw_params)
    assert bool(jnp.all(jnp.isfinite(output))) and bool(jnp.all(jnp.isfinite(hidden)))
    assert bool(jnp.allclose(output, ref_out, atol=5e-2, rtol=5e-2))
    assert bool(jnp.allclose(hidden, ref_hid, atol=5e-2, rtol=5e-2))

    print("KERNEL_OK")
</pallas_src>

<mosaic_0001>
module attributes {stable_mosaic.version = 11 : i64} {
  func.func @_fdgan_kernel(%arg0: i32, %arg1: memref<256x128xbf16, #tpu.memory_space<vmem>>, %arg2: memref<128x512xbf16, #tpu.memory_space<vmem>>, %arg3: memref<1x512xf32, #tpu.memory_space<vmem>>, %arg4: memref<512x128xbf16, #tpu.memory_space<vmem>>, %arg5: memref<1x128xf32, #tpu.memory_space<vmem>>, %arg6: memref<128x128xbf16, #tpu.memory_space<vmem>>, %arg7: memref<1x128xf32, #tpu.memory_space<vmem>>, %arg8: memref<128x128xbf16, #tpu.memory_space<vmem>>, %arg9: memref<1x128xf32, #tpu.memory_space<vmem>>, %arg10: memref<128x128xbf16, #tpu.memory_space<vmem>>, %arg11: memref<1x128xf32, #tpu.memory_space<vmem>>, %arg12: memref<256x128xf32, #tpu.memory_space<vmem>>, %arg13: memref<256x128xf32, #tpu.memory_space<vmem>>) attributes {dimension_semantics = [#tpu.dimension_semantics<parallel>], iteration_bounds = array<i64: 1>, scalar_prefetch = 0 : i64, scratch_operands = 0 : i64, tpu.core_type = #tpu.core_type<tc>, window_params = [{transform_indices = @transform_0, window_bounds = array<i64: 256, 128>}, {pipeline_mode = #tpu.pipeline_mode<synchronous>, transform_indices = @transform_1, window_bounds = array<i64: 128, 512>}, {pipeline_mode = #tpu.pipeline_mode<synchronous>, transform_indices = @transform_2, window_bounds = array<i64: 1, 512>}, {pipeline_mode = #tpu.pipeline_mode<synchronous>, transform_indices = @transform_3, window_bounds = array<i64: 512, 128>}, {pipeline_mode = #tpu.pipeline_mode<synchronous>, transform_indices = @transform_4, window_bounds = array<i64: 1, 128>}, {pipeline_mode = #tpu.pipeline_mode<synchronous>, transform_indices = @transform_5, window_bounds = array<i64: 128, 128>}, {pipeline_mode = #tpu.pipeline_mode<synchronous>, transform_indices = @transform_6, window_bounds = array<i64: 1, 128>}, {pipeline_mode = #tpu.pipeline_mode<synchronous>, transform_indices = @transform_7, window_bounds = array<i64: 128, 128>}, {pipeline_mode = #tpu.pipeline_mode<synchronous>, transform_indices = @transform_8, window_bounds = array<i64: 1, 128>}, {pipeline_mode = #tpu.pipeline_mode<synchronous>, transform_indices = @transform_9, window_bounds = array<i64: 128, 128>}, {pipeline_mode = #tpu.pipeline_mode<synchronous>, transform_indices = @transform_10, window_bounds = array<i64: 1, 128>}, {transform_indices = @transform_11, window_bounds = array<i64: 256, 128>}, {transform_indices = @transform_12, window_bounds = array<i64: 256, 128>}]} {
    %c0 = arith.constant 0 : index
    %c0_0 = arith.constant 0 : index
    %0 = vector.load %arg1[%c0, %c0_0] : memref<256x128xbf16, #tpu.memory_space<vmem>>, vector<256x128xbf16>
    %c0_1 = arith.constant 0 : index
    %c0_2 = arith.constant 0 : index
    %1 = vector.load %arg2[%c0_1, %c0_2] : memref<128x512xbf16, #tpu.memory_space<vmem>>, vector<128x512xbf16>
    %cst = arith.constant dense<0.000000e+00> : vector<256x512xf32>
    %2 = tpu.matmul %0, %1, %cst {dimension_numbers = #tpu.dot_dimension_numbers<[1], [0], [0], [1], [0, 0, 1, 1], [], []>} : vector<256x128xbf16>, vector<128x512xbf16>, vector<256x512xf32> -> vector<256x512xf32>
    %c0_3 = arith.constant 0 : index
    %c0_4 = arith.constant 0 : index
    %3 = vector.load %arg3[%c0_3, %c0_4] : memref<1x512xf32, #tpu.memory_space<vmem>>, vector<1x512xf32>
    %4 = vector.broadcast %3 : vector<1x512xf32> to vector<256x512xf32>
    %5 = arith.addf %2, %4 : vector<256x512xf32>
    %cst_5 = arith.constant 0.000000e+00 : f32
    %6 = vector.broadcast %cst_5 : f32 to vector<256x512xf32>
    %7 = arith.minimumf %5, %6 : vector<256x512xf32>
    %8 = math.exp %7 : vector<256x512xf32>
    %cst_6 = arith.constant 1.000000e+00 : f32
    %9 = vector.broadcast %cst_6 : f32 to vector<256x512xf32>
    %10 = arith.subf %8, %9 : vector<256x512xf32>
    %cst_7 = arith.constant 1.67326319 : f32
    %11 = vector.broadcast %cst_7 : f32 to vector<256x512xf32>
    %12 = arith.mulf %11, %10 : vector<256x512xf32>
    %cst_8 = arith.constant 0.000000e+00 : f32
    %13 = vector.broadcast %cst_8 : f32 to vector<256x512xf32>
    %14 = arith.cmpf ogt, %5, %13 : vector<256x512xf32>
    %15 = arith.select %14, %5, %12 : vector<256x512xi1>, vector<256x512xf32>
    %cst_9 = arith.constant 1.05070102 : f32
    %16 = vector.broadcast %cst_9 : f32 to vector<256x512xf32>
    %17 = arith.mulf %16, %15 : vector<256x512xf32>
    %18 = arith.truncf %17 : vector<256x512xf32> to vector<256x512xbf16>
    %c0_10 = arith.constant 0 : index
    %c0_11 = arith.constant 0 : index
    %19 = vector.load %arg4[%c0_10, %c0_11] : memref<512x128xbf16, #tpu.memory_space<vmem>>, vector<512x128xbf16>
    %cst_12 = arith.constant dense<0.000000e+00> : vector<256x128xf32>
    %20 = tpu.matmul %18, %19, %cst_12 {dimension_numbers = #tpu.dot_dimension_numbers<[1], [0], [0], [1], [0, 0, 1, 1], [], []>} : vector<256x512xbf16>, vector<512x128xbf16>, vector<256x128xf32> -> vector<256x128xf32>
    %c0_13 = arith.constant 0 : index
    %c0_14 = arith.constant 0 : index
    %21 = vector.load %arg5[%c0_13, %c0_14] : memref<1x128xf32, #tpu.memory_space<vmem>>, vector<1x128xf32>
    %22 = vector.broadcast %21 : vector<1x128xf32> to vector<256x128xf32>
    %23 = arith.addf %20, %22 : vector<256x128xf32>
    %cst_15 = arith.constant 0.000000e+00 : f32
    %24 = vector.broadcast %cst_15 : f32 to vector<256x128xf32>
    %25 = arith.minimumf %23, %24 : vector<256x128xf32>
    %26 = math.exp %25 : vector<256x128xf32>
    %cst_16 = arith.constant 1.000000e+00 : f32
    %27 = vector.broadcast %cst_16 : f32 to vector<256x128xf32>
    %28 = arith.subf %26, %27 : vector<256x128xf32>
    %cst_17 = arith.constant 1.67326319 : f32
    %29 = vector.broadcast %cst_17 : f32 to vector<256x128xf32>
    %30 = arith.mulf %29, %28 : vector<256x128xf32>
    %cst_18 = arith.constant 0.000000e+00 : f32
    %31 = vector.broadcast %cst_18 : f32 to vector<256x128xf32>
    %32 = arith.cmpf ogt, %23, %31 : vector<256x128xf32>
    %33 = arith.select %32, %23, %30 : vector<256x128xi1>, vector<256x128xf32>
    %cst_19 = arith.constant 1.05070102 : f32
    %34 = vector.broadcast %cst_19 : f32 to vector<256x128xf32>
    %35 = arith.mulf %34, %33 : vector<256x128xf32>
    %36 = arith.truncf %35 : vector<256x128xf32> to vector<256x128xbf16>
    %c0_20 = arith.constant 0 : index
    %c0_21 = arith.constant 0 : index
    %37 = vector.load %arg6[%c0_20, %c0_21] : memref<128x128xbf16, #tpu.memory_space<vmem>>, vector<128x128xbf16>
    %cst_22 = arith.constant dense<0.000000e+00> : vector<256x128xf32>
    %38 = tpu.matmul %36, %37, %cst_22 {dimension_numbers = #tpu.dot_dimension_numbers<[1], [0], [0], [1], [0, 0, 1, 1], [], []>} : vector<256x128xbf16>, vector<128x128xbf16>, vector<256x128xf32> -> vector<256x128xf32>
    %c0_23 = arith.constant 0 : index
    %c0_24 = arith.constant 0 : index
    %39 = vector.load %arg7[%c0_23, %c0_24] : memref<1x128xf32, #tpu.memory_space<vmem>>, vector<1x128xf32>
    %40 = vector.broadcast %39 : vector<1x128xf32> to vector<256x128xf32>
    %41 = arith.addf %38, %40 : vector<256x128xf32>
    %cst_25 = arith.constant 0.000000e+00 : f32
    %42 = vector.broadcast %cst_25 : f32 to vector<256x128xf32>
    %43 = arith.minimumf %41, %42 : vector<256x128xf32>
    %44 = math.exp %43 : vector<256x128xf32>
    %cst_26 = arith.constant 1.000000e+00 : f32
    %45 = vector.broadcast %cst_26 : f32 to vector<256x128xf32>
    %46 = arith.subf %44, %45 : vector<256x128xf32>
    %cst_27 = arith.constant 1.67326319 : f32
    %47 = vector.broadcast %cst_27 : f32 to vector<256x128xf32>
    %48 = arith.mulf %47, %46 : vector<256x128xf32>
    %cst_28 = arith.constant 0.000000e+00 : f32
    %49 = vector.broadcast %cst_28 : f32 to vector<256x128xf32>
    %50 = arith.cmpf ogt, %41, %49 : vector<256x128xf32>
    %51 = arith.select %50, %41, %48 : vector<256x128xi1>, vector<256x128xf32>
    %cst_29 = arith.constant 1.05070102 : f32
    %52 = vector.broadcast %cst_29 : f32 to vector<256x128xf32>
    %53 = arith.mulf %52, %51 : vector<256x128xf32>
    %54 = arith.truncf %53 : vector<256x128xf32> to vector<256x128xbf16>
    %c0_30 = arith.constant 0 : index
    %c0_31 = arith.constant 0 : index
    %55 = vector.load %arg8[%c0_30, %c0_31] : memref<128x128xbf16, #tpu.memory_space<vmem>>, vector<128x128xbf16>
    %cst_32 = arith.constant dense<0.000000e+00> : vector<256x128xf32>
    %56 = tpu.matmul %54, %55, %cst_32 {dimension_numbers = #tpu.dot_dimension_numbers<[1], [0], [0], [1], [0, 0, 1, 1], [], []>} : vector<256x128xbf16>, vector<128x128xbf16>, vector<256x128xf32> -> vector<256x128xf32>
    %c0_33 = arith.constant 0 : index
    %c0_34 = arith.constant 0 : index
    %57 = vector.load %arg9[%c0_33, %c0_34] : memref<1x128xf32, #tpu.memory_space<vmem>>, vector<1x128xf32>
    %58 = vector.broadcast %57 : vector<1x128xf32> to vector<256x128xf32>
    %59 = arith.addf %56, %58 : vector<256x128xf32>
    %cst_35 = arith.constant 0.000000e+00 : f32
    %60 = vector.broadcast %cst_35 : f32 to vector<256x128xf32>
    %61 = arith.minimumf %59, %60 : vector<256x128xf32>
    %62 = math.exp %61 : vector<256x128xf32>
    %cst_36 = arith.constant 1.000000e+00 : f32
    %63 = vector.broadcast %cst_36 : f32 to vector<256x128xf32>
    %64 = arith.subf %62, %63 : vector<256x128xf32>
    %cst_37 = arith.constant 1.67326319 : f32
    %65 = vector.broadcast %cst_37 : f32 to vector<256x128xf32>
    %66 = arith.mulf %65, %64 : vector<256x128xf32>
    %cst_38 = arith.constant 0.000000e+00 : f32
    %67 = vector.broadcast %cst_38 : f32 to vector<256x128xf32>
    %68 = arith.cmpf ogt, %59, %67 : vector<256x128xf32>
    %69 = arith.select %68, %59, %66 : vector<256x128xi1>, vector<256x128xf32>
    %cst_39 = arith.constant 1.05070102 : f32
    %70 = vector.broadcast %cst_39 : f32 to vector<256x128xf32>
    %71 = arith.mulf %70, %69 : vector<256x128xf32>
    %c0_40 = arith.constant 0 : index
    %c0_41 = arith.constant 0 : index
    %72 = vector.load %arg12[%c0_40, %c0_41] : memref<256x128xf32, #tpu.memory_space<vmem>>, vector<256x128xf32>
    tpu.vector_store %arg12[%c0_40, %c0_41], %71 {strides = array<i32>} : memref<256x128xf32, #tpu.memory_space<vmem>>, vector<256x128xf32>,
    %73 = arith.truncf %71 : vector<256x128xf32> to vector<256x128xbf16>
    %c0_42 = arith.constant 0 : index
    %c0_43 = arith.constant 0 : index
    %74 = vector.load %arg10[%c0_42, %c0_43] : memref<128x128xbf16, #tpu.memory_space<vmem>>, vector<128x128xbf16>
    %cst_44 = arith.constant dense<0.000000e+00> : vector<256x128xf32>
    %75 = tpu.matmul %73, %74, %cst_44 {dimension_numbers = #tpu.dot_dimension_numbers<[1], [0], [0], [1], [0, 0, 1, 1], [], []>} : vector<256x128xbf16>, vector<128x128xbf16>, vector<256x128xf32> -> vector<256x128xf32>
    %c0_45 = arith.constant 0 : index
    %c0_46 = arith.constant 0 : index
    %76 = vector.load %arg11[%c0_45, %c0_46] : memref<1x128xf32, #tpu.memory_space<vmem>>, vector<1x128xf32>
    %77 = vector.broadcast %76 : vector<1x128xf32> to vector<256x128xf32>
    %78 = arith.addf %75, %77 : vector<256x128xf32>
    %c0_47 = arith.constant 0 : index
    %c0_48 = arith.constant 0 : index
    %79 = vector.load %arg13[%c0_47, %c0_48] : memref<256x128xf32, #tpu.memory_space<vmem>>, vector<256x128xf32>
    tpu.vector_store %arg13[%c0_47, %c0_48], %78 {strides = array<i32>} : memref<256x128xf32, #tpu.memory_space<vmem>>, vector<256x128xf32>,
    return
  }
  func.func @transform_0(%arg0: i32) -> (i32, i32) {
    %c0_i32 = arith.constant 0 : i32
    %c0_i32_0 = arith.constant 0 : i32
    return %arg0, %c0_i32 : i32, i32
  }
  func.func @transform_1(%arg0: i32) -> (i32, i32) {
    %c0_i32 = arith.constant 0 : i32
    %c0_i32_0 = arith.constant 0 : i32
    %c0_i32_1 = arith.constant 0 : i32
    return %c0_i32, %c0_i32_0 : i32, i32
  }
  func.func @transform_2(%arg0: i32) -> (i32, i32) {
    %c0_i32 = arith.constant 0 : i32
    %c0_i32_0 = arith.constant 0 : i32
    %c0_i32_1 = arith.constant 0 : i32
    return %c0_i32, %c0_i32_0 : i32, i32
  }
  func.func @transform_3(%arg0: i32) -> (i32, i32) {
    %c0_i32 = arith.constant 0 : i32
    %c0_i32_0 = arith.constant 0 : i32
    %c0_i32_1 = arith.constant 0 : i32
    return %c0_i32, %c0_i32_0 : i32, i32
  }
  func.func @transform_4(%arg0: i32) -> (i32, i32) {
    %c0_i32 = arith.constant 0 : i32
    %c0_i32_0 = arith.constant 0 : i32
    %c0_i32_1 = arith.constant 0 : i32
    return %c0_i32, %c0_i32_0 : i32, i32
  }
  func.func @transform_5(%arg0: i32) -> (i32, i32) {
    %c0_i32 = arith.constant 0 : i32
    %c0_i32_0 = arith.constant 0 : i32
    %c0_i32_1 = arith.constant 0 : i32
    return %c0_i32, %c0_i32_0 : i32, i32
  }
  func.func @transform_6(%arg0: i32) -> (i32, i32) {
    %c0_i32 = arith.constant 0 : i32
    %c0_i32_0 = arith.constant 0 : i32
    %c0_i32_1 = arith.constant 0 : i32
    return %c0_i32, %c0_i32_0 : i32, i32
  }
  func.func @transform_7(%arg0: i32) -> (i32, i32) {
    %c0_i32 = arith.constant 0 : i32
    %c0_i32_0 = arith.constant 0 : i32
    %c0_i32_1 = arith.constant 0 : i32
    return %c0_i32, %c0_i32_0 : i32, i32
  }
  func.func @transform_8(%arg0: i32) -> (i32, i32) {
    %c0_i32 = arith.constant 0 : i32
    %c0_i32_0 = arith.constant 0 : i32
    %c0_i32_1 = arith.constant 0 : i32
    return %c0_i32, %c0_i32_0 : i32, i32
  }
  func.func @transform_9(%arg0: i32) -> (i32, i32) {
    %c0_i32 = arith.constant 0 : i32
    %c0_i32_0 = arith.constant 0 : i32
    %c0_i32_1 = arith.constant 0 : i32
    return %c0_i32, %c0_i32_0 : i32, i32
  }
  func.func @transform_10(%arg0: i32) -> (i32, i32) {
    %c0_i32 = arith.constant 0 : i32
    %c0_i32_0 = arith.constant 0 : i32
    %c0_i32_1 = arith.constant 0 : i32
    return %c0_i32, %c0_i32_0 : i32, i32
  }
  func.func @transform_11(%arg0: i32) -> (i32, i32) {
    %c0_i32 = arith.constant 0 : i32
    %c0_i32_0 = arith.constant 0 : i32
    return %arg0, %c0_i32 : i32, i32
  }
  func.func @transform_12(%arg0: i32) -> (i32, i32) {
    %c0_i32 = arith.constant 0 : i32
    %c0_i32_0 = arith.constant 0 : i32
    return %arg0, %c0_i32 : i32, i32
  }
}

</mosaic_0001>

<bundles_post_ra>
// kernel: tpu_custom_call.1
= control target key start
LH: loop header
LB: loop body
LE: loop exit
PB: predicated region body
PF: predicated region fallthrough
CT: control target
= control target key end

     0   :  { %18 = vsyncpa [#allocation3], 0  ;;  %s8020_s0 = inlined_call_operand.hbm [shape: bf16[256,128], index: 0, kind: input, shape index: {}]   ;;  %s8021_s1 = inlined_call_operand.hbm [shape: bf16[128,512], index: 1, kind: input, shape index: {}]   ;;  %s8022_s2 = inlined_call_operand.vmem [shape: f32[1,512], index: 2, kind: input, shape index: {}]   ;;  %s8023_s3 = inlined_call_operand.hbm [shape: bf16[512,128], index: 3, kind: input, shape index: {}]   ;;  %s8024_s4 = inlined_call_operand.vmem [shape: f32[1,128], index: 4, kind: input, shape index: {}]   ;;  %s8025_s5 = inlined_call_operand.hbm [shape: bf16[128,128], index: 5, kind: input, shape index: {}]   ;;  %s8026_s6 = inlined_call_operand.vmem [shape: f32[1,128], index: 6, kind: input, shape index: {}]   ;;  %s8027_s7 = inlined_call_operand.hbm [shape: bf16[128,128], index: 7, kind: input, shape index: {}]   ;;  %s8028_s8 = inlined_call_operand.vmem [shape: f32[1,128], index: 8, kind: input, shape index: {}]   ;;  %s8029_s9 = inlined_call_operand.hbm [shape: bf16[128,128], index: 9, kind: input, shape index: {}]   ;;  %s8030_s10 = inlined_call_operand.vmem [shape: f32[1,128], index: 10, kind: input, shape index: {}]   ;;  %s8031_s11 = inlined_call_operand.hbm [shape: f32[256,128], index: 11, kind: output, shape index: {0}]   ;;  %s8032_s12 = inlined_call_operand.hbm [shape: f32[256,128], index: 12, kind: output, shape index: {1}]  }
   0x1   :  { %19 = vsyncpa [#allocation6], 0 }
   0x2   :  { %20 = vsyncpa [#allocation9], 0 }
   0x3   :  { %21 = vsyncpa [#allocation12], 0 }
   0x4   :  { %22 = vsyncpa [#allocation4], 0 }
   0x5   :  { %23 = vsyncpa [#allocation15], 0  ;;  %s5697_s21 = smov [#allocation5]   ;;  %s5509_s25 = scalar_lea.hbm %s8021_s1, 4096 }
   0x6   :  { %s41_s22 = sshll.u32 %s5697_s21, 4  ;;  %p5510_p0 = scmp.ne.s32.totalorder %s8021_s1, %s5509_s25  ;;  %s42_s22 = int_to_ptr.vmem [resolvable:$true] %s41_s22 }
   0x7   :  { %p5513_p1 = scmp.lt.u32.totalorder %s5509_s25, %s8021_s1 }
   0x9   :  { %p5515_p2 = pnand %p5513_p1, %p5510_p0 }
   0xb   :  { %5518 = shalt.err (!%p5515_p2)
}
   0xc   :  { %s5519_s30 = scalar_lea.vmem %s42_s22, 4096  ;;  %p5524_p4 = scmp.lt.s32.totalorder %s42_s22, %s42_s22 }
   0xd   :  { %p5520_p3 = scmp.ne.s32.totalorder %s42_s22, %s5519_s30  ;;  %p5525_p5 = scmp.lt.s32.totalorder %s5519_s30, %s5519_s30 }
   0xf   :  { %p5526_p6 = por %p5525_p5, %p5524_p4 }
  0x11   :  { %p5527_p7 = pnand %p5526_p6, %p5520_p3 }
  0x13   :  { %5530 = shalt.err (!%p5527_p7)
}
  0x14   :  { %s5698_s13 = smov 256   ;;  %s5699_s14 = smov 16  }
  0x15   :  { %47 = dma.hbm_to_vmem [thread:$0]  %s8021_s1, 4096, %s42_s22, [#allocation6], %s5698_s13, %s5698_s13, %s5699_s14  }
  0x16   :  { %s5700_s17 = smov [#allocation8]   ;;  %s5701_s19 = smov [#allocation2]  }
  0x17   :  { %s69_s18 = sshll.u32 %s5700_s17, 4  ;;  %s29_s20 = sshll.u32 %s5701_s19, 4  ;;  %s70_s18 = int_to_ptr.vmem [resolvable:$true] %s69_s18  ;;  %s30_s20 = int_to_ptr.vmem [resolvable:$true] %s29_s20 }
  0x18   :  { %s5531_s24 = scalar_lea.hbm %s8025_s5, 1024 }
  0x19   :  { %p5532_p8 = scmp.ne.s32.totalorder %s8025_s5, %s5531_s24  ;;  %p5535_p9 = scmp.lt.u32.totalorder %s5531_s24, %s8025_s5 }
  0x1b   :  { %p5537_p10 = pnand %p5535_p9, %p5532_p8 }
  0x1d   :  { %5540 = shalt.err (!%p5537_p10)
}
  0x1e   :  { %s5541_s1 = scalar_lea.vmem %s70_s18, 1024  ;;  %p5546_p12 = scmp.lt.s32.totalorder %s70_s18, %s70_s18 }
  0x1f   :  { %p5542_p11 = scmp.ne.s32.totalorder %s70_s18, %s5541_s1  ;;  %p5547_p13 = scmp.lt.s32.totalorder %s5541_s1, %s5541_s1 }
  0x21   :  { %p5548_p0 = por %p5547_p13, %p5546_p12 }
  0x23   :  { %p5549_p1 = pnand %p5548_p0, %p5542_p11 }
  0x25   :  { %5552 = shalt.err (!%p5549_p1)
}
  0x26   :  { %s5702_s22 = smov 64   ;;  %s5703_s29 = smov 4  }
  0x27   :  { %75 = dma.hbm_to_vmem [thread:$0]  %s8025_s5, 1024, %s70_s18, [#allocation9], %s5702_s22, %s5702_s22, %s5703_s29  }
  0x28   :  { %s5553_s16 = scalar_lea.hbm %s8020_s0, 2048 }
  0x29   :  { %p5554_p2 = scmp.ne.s32.totalorder %s8020_s0, %s5553_s16  ;;  %p5557_p3 = scmp.lt.u32.totalorder %s5553_s16, %s8020_s0 }
  0x2b   :  { %p5559_p4 = pnand %p5557_p3, %p5554_p2 }
  0x2d   :  { %5562 = shalt.err (!%p5559_p4)
}
  0x2e   :  { %s5563_s24 = scalar_lea.vmem %s30_s20, 2048  ;;  %p5568_p6 = scmp.lt.s32.totalorder %s30_s20, %s30_s20 }
  0x2f   :  { %p5564_p5 = scmp.ne.s32.totalorder %s30_s20, %s5563_s24  ;;  %p5569_p7 = scmp.lt.s32.totalorder %s5563_s24, %s5563_s24 }
  0x31   :  { %p5570_p8 = por %p5569_p7, %p5568_p6 }
  0x33   :  { %p5571_p9 = pnand %p5570_p8, %p5564_p5 }
  0x35   :  { %5574 = shalt.err (!%p5571_p9)
}
  0x36   :  { %35 = dma.hbm_to_vmem [thread:$0]  %s8020_s0, 2048, %s30_s20, [#allocation3], %s5702_s22, %s5702_s22, %s5703_s29  }
  0x37   :  { %s5704_s25 = smov [#allocation7]   ;;  %s5705_s27 = smov [#allocation10]  }
  0x38   :  { %s55_s26 = sshll.u32 %s5704_s25, 4  ;;  %s83_s28 = sshll.u32 %s5705_s27, 4  ;;  %s56_s26 = int_to_ptr.vmem [resolvable:$true] %s55_s26  ;;  %s84_s28 = int_to_ptr.vmem [resolvable:$true] %s83_s28 }
  0x39   :  { %s5575_s13 = scalar_lea.hbm %s8023_s3, 4096 }
  0x3a   :  { %p5576_p10 = scmp.ne.s32.totalorder %s8023_s3, %s5575_s13  ;;  %p5579_p11 = scmp.lt.u32.totalorder %s5575_s13, %s8023_s3 }
  0x3c   :  { %p5581_p12 = pnand %p5579_p11, %p5576_p10 }
  0x3e   :  { %5584 = shalt.err (!%p5581_p12)
}
  0x3f   :  { %s5585_s0 = scalar_lea.vmem %s56_s26, 4096  ;;  %p5590_p0 = scmp.lt.s32.totalorder %s56_s26, %s56_s26 }
  0x40   :  { %p5586_p13 = scmp.ne.s32.totalorder %s56_s26, %s5585_s0  ;;  %p5591_p1 = scmp.lt.s32.totalorder %s5585_s0, %s5585_s0 }
  0x42   :  { %p5592_p2 = por %p5591_p1, %p5590_p0 }
  0x44   :  { %p5593_p3 = pnand %p5592_p2, %p5586_p13 }
  0x46   :  { %5596 = shalt.err (!%p5593_p3)
}
  0x47   :  { %61 = dma.hbm_to_vmem [thread:$0]  %s8023_s3, 4096, %s56_s26, [#allocation6], %s5702_s22, %s5702_s22, %s5703_s29  }
  0x48   :  { %s5597_s24 = scalar_lea.hbm %s8027_s7, 1024 }
  0x49   :  { %p5598_p4 = scmp.ne.s32.totalorder %s8027_s7, %s5597_s24  ;;  %p5601_p5 = scmp.lt.u32.totalorder %s5597_s24, %s8027_s7 }
  0x4b   :  { %p5603_p6 = pnand %p5601_p5, %p5598_p4 }
  0x4d   :  { %5606 = shalt.err (!%p5603_p6)
}
  0x4e   :  { %s5607_s1 = scalar_lea.vmem %s84_s28, 1024  ;;  %p5612_p8 = scmp.lt.s32.totalorder %s84_s28, %s84_s28 }
  0x4f   :  { %p5608_p7 = scmp.ne.s32.totalorder %s84_s28, %s5607_s1  ;;  %p5613_p9 = scmp.lt.s32.totalorder %s5607_s1, %s5607_s1 }
  0x51   :  { %p5614_p10 = por %p5613_p9, %p5612_p8 }
  0x53   :  { %p5615_p11 = pnand %p5614_p10, %p5608_p7 }
  0x55   :  { %5618 = shalt.err (!%p5615_p11)
}
  0x56   :  { %89 = dma.hbm_to_vmem [thread:$0]  %s8027_s7, 1024, %s84_s28, [#allocation9], %s5702_s22, %s5702_s22, %s5703_s29  }
  0x57   :  { %s5706_s30 = smov [#allocation11]   ;;  %s5619_s16 = scalar_lea.hbm %s8029_s9, 1024 }
  0x58   :  { %s97_s13 = sshll.u32 %s5706_s30, 4  ;;  %p5620_p12 = scmp.ne.s32.totalorder %s8029_s9, %s5619_s16  ;;  %s98_s13 = int_to_ptr.vmem [resolvable:$true] %s97_s13 }
  0x59   :  { %p5623_p13 = scmp.lt.u32.totalorder %s5619_s16, %s8029_s9 }
  0x5b   :  { %p5625_p0 = pnand %p5623_p13, %p5620_p12 }
  0x5d   :  { %5628 = shalt.err (!%p5625_p0)
}
  0x5e   :  { %s5629_s21 = scalar_lea.vmem %s98_s13, 1024  ;;  %p5634_p2 = scmp.lt.s32.totalorder %s98_s13, %s98_s13 }
  0x5f   :  { %p5630_p1 = scmp.ne.s32.totalorder %s98_s13, %s5629_s21  ;;  %p5635_p3 = scmp.lt.s32.totalorder %s5629_s21, %s5629_s21 }
  0x61   :  { %p5636_p4 = por %p5635_p3, %p5634_p2 }
  0x63   :  { %p5637_p5 = pnand %p5636_p4, %p5630_p1 }
  0x65   :  { %5640 = shalt.err (!%p5637_p5)
}
  0x66   :  { %103 = dma.hbm_to_vmem [thread:$0]  %s8029_s9, 1024, %s98_s13, [#allocation12], %s5702_s22, %s5702_s22, %s5703_s29  }
  0x67   :  { %5685 = dma.done.wait [#allocation3], 2048  }
  0x68   :  { %5686 = vsyncadd [#allocation3], 4294965248 }
  0x69   :  { %5687 = dma.done.wait [#allocation6], 8192  }
  0x6a   :  { %5688 = vsyncadd [#allocation6], 4294959104 }
  0x6b   :  { %5689 = dma.done.wait [#allocation9], 2048  }
  0x6c   :  { %5690 = vsyncadd [#allocation9], 4294965248 }
  0x6d   :  { %5691 = dma.done.wait [#allocation12], 1024  }
  0x6e   :  { %5692 = vsyncadd [#allocation12], 4294966272  ;;  %v5707_v0 = vmov 0   ;;  %v4941_v1 = vld [vmem:[#allocation5 + $0x4] ss:$16 sps:$4 sm:$0xff]   ;;  %v5874_v23 = vld [vmem:[#allocation2 + $0x8] sm:$0xff]  }
  0x6f   :  { %499 = vmatprep.mubr.bf16.mxu0 %v5707_v0  ;;  %619 = vmatprep.mubr.bf16.mxu1 %v5707_v0  ;;  %v4943_v2 = vld [vmem:[#allocation5] ss:$16 sps:$4 sm:$0xff]   ;;  %v4944_v3 = vld [vmem:[#allocation5 + $0x24] ss:$16 sps:$4 sm:$0xff]   ;;  %v4969_v17 = vld [vmem:[#allocation5 + $0xc] ss:$16 sps:$4 sm:$0xff]  }
  0x70   :  { %467 = vmatprep.subr.bf16.mxu0 %v4941_v1  ;;  %4910 = vmatprep.subr.bf16.mxu1 %v4941_v1  ;;  %v4946_v4 = vld [vmem:[#allocation5 + $0x20] ss:$16 sps:$4 sm:$0xff]   ;;  %v4947_v5 = vld [vmem:[#allocation5 + $0x44] ss:$16 sps:$4 sm:$0xff]   ;;  %v4967_v20 = vld [vmem:[#allocation5 + $0x8] ss:$16 sps:$4 sm:$0xff]  }
  0x71   :  { %468 = vmatpush1.bf16.msra.mxu0 %v4943_v2  ;;  %4918 = vmatpush1.bf16.msra.mxu1 %v4943_v2  ;;  %v4949_v6 = vld [vmem:[#allocation5 + $0x40] ss:$16 sps:$4 sm:$0xff]   ;;  %v4950_v7 = vld [vmem:[#allocation5 + $0x64] ss:$16 sps:$4 sm:$0xff]   ;;  %v4972_v21 = vld [vmem:[#allocation5 + $0x2c] ss:$16 sps:$4 sm:$0xff]  }
  0x72   :  { %469 = vmatprep.subr.bf16.mxu0 %v4944_v3  ;;  %4911 = vmatprep.subr.bf16.mxu1 %v4944_v3  ;;  %v4952_v8 = vld [vmem:[#allocation5 + $0x60] ss:$16 sps:$4 sm:$0xff]   ;;  %v4953_v9 = vld [vmem:[#allocation5 + $0x84] ss:$16 sps:$4 sm:$0xff]   ;;  %v4970_v22 = vld [vmem:[#allocation5 + $0x28] ss:$16 sps:$4 sm:$0xff]  }
  0x73   :  { %v4955_v10 = vld [vmem:[#allocation5 + $0x80] ss:$16 sps:$4 sm:$0xff]   ;;  %v4956_v11 = vld [vmem:[#allocation5 + $0xa4] ss:$16 sps:$4 sm:$0xff]   ;;  %v5876_v24 = vld [vmem:[#allocation2 + $0x68] sm:$0xff]  }
  0x74   :  { %v4958_v12 = vld [vmem:[#allocation5 + $0xa0] ss:$16 sps:$4 sm:$0xff]   ;;  %v4959_v13 = vld [vmem:[#allocation5 + $0xc4] ss:$16 sps:$4 sm:$0xff]   ;;  %v4977_v25 = vld [vmem:[#allocation5 + $0x4c] ss:$16 sps:$4 sm:$0xff]  }
  0x75   :  { %470 = vmatpush1.bf16.msra.mxu0 %v4946_v4  ;;  %4919 = vmatpush1.bf16.msra.mxu1 %v4946_v4  ;;  %v4961_v14 = vld [vmem:[#allocation5 + $0xc0] ss:$16 sps:$4 sm:$0xff]   ;;  %v4962_v15 = vld [vmem:[#allocation5 + $0xe4] ss:$16 sps:$4 sm:$0xff]   ;;  %v4975_v26 = vld [vmem:[#allocation5 + $0x48] ss:$16 sps:$4 sm:$0xff]  }
  0x76   :  { %471 = vmatprep.subr.bf16.mxu0 %v4947_v5  ;;  %4912 = vmatprep.subr.bf16.mxu1 %v4947_v5  ;;  %v4964_v16 = vld [vmem:[#allocation5 + $0xe0] ss:$16 sps:$4 sm:$0xff]   ;;  %v4980_v27 = vld [vmem:[#allocation5 + $0x6c] ss:$16 sps:$4 sm:$0xff]   ;;  %v4978_v28 = vld [vmem:[#allocation5 + $0x68] ss:$16 sps:$4 sm:$0xff]  }
  0x77   :  { %v5866_v18 = vld [vmem:[#allocation2] sm:$0xff]   ;;  %v4985_v29 = vld [vmem:[#allocation5 + $0x8c] ss:$16 sps:$4 sm:$0xff]   ;;  %v5882_v30 = vld [vmem:[#allocation2 + $0x10] sm:$0xff]  }
  0x78   :  { %v5868_v19 = vld [vmem:[#allocation2 + $0x60] sm:$0xff]   ;;  %v5884_v31 = vld [vmem:[#allocation2 + $0x70] sm:$0xff]   ;;  %v4983_v32 = vld [vmem:[#allocation5 + $0x88] ss:$16 sps:$4 sm:$0xff]  }
  0x79   :  { %472 = vmatpush1.bf16.msra.mxu0 %v4949_v6  ;;  %4920 = vmatpush1.bf16.msra.mxu1 %v4949_v6  ;;  %v4988_v33 = vld [vmem:[#allocation5 + $0xac] ss:$16 sps:$4 sm:$0xff]   ;;  %v4986_v34 = vld [vmem:[#allocation5 + $0xa8] ss:$16 sps:$4 sm:$0xff]   ;;  %v5009_v40 = vld [vmem:[#allocation7 + $0x40] sm:$0xff]  }
  0x7a   :  { %473 = vmatprep.subr.bf16.mxu0 %v4950_v7  ;;  %4913 = vmatprep.subr.bf16.mxu1 %v4950_v7  ;;  %v4993_v35 = vld [vmem:[#allocation5 + $0xcc] ss:$16 sps:$4 sm:$0xff]   ;;  %v4991_v38 = vld [vmem:[#allocation5 + $0xc8] ss:$16 sps:$4 sm:$0xff]   ;;  %v5010_v42 = vld [vmem:[#allocation7] sm:$0xff]  }
  0x7b   :  { %v4989_v36 = vld [vmem:[#allocation2 + $0x18] sm:$0xff]   ;;  %v5005_v43 = vld [vmem:[#allocation7 + $0xc0] sm:$0xff]   ;;  %v5013_v44 = vld [vmem:[#allocation7 + $0x48] sm:$0xff]  }
  0x7c   :  { %v5890_v37 = vld [vmem:[#allocation2 + $0x78] sm:$0xff]   ;;  %v4997_v45 = vld [vmem:[#allocation2 + $0x20] sm:$0xff]   ;;  %v5014_v47 = vld [vmem:[#allocation7 + $0x8] sm:$0xff]  }
  0x7d   :  { %474 = vmatpush1.bf16.msra.mxu0 %v4952_v8  ;;  %4921 = vmatpush1.bf16.msra.mxu1 %v4952_v8  ;;  %v4996_v39 = vld [vmem:[#allocation5 + $0xec] ss:$16 sps:$4 sm:$0xff]   ;;  %v4994_v41 = vld [vmem:[#allocation5 + $0xe8] ss:$16 sps:$4 sm:$0xff]   ;;  %v5006_v46 = vld [vmem:[#allocation7 + $0x80] sm:$0xff]  }
  0x7e   :  { %475 = vmatprep.subr.bf16.mxu0 %v4953_v9  ;;  %4914 = vmatprep.subr.bf16.mxu1 %v4953_v9  ;;  %v5007_v48 = vld [vmem:[#allocation7 + $0xc8] sm:$0xff]   ;;  %v5017_v49 = vld [vmem:[#allocation7 + $0x50] sm:$0xff]   ;;  %v5015_v55 = vld [vmem:[#allocation7 + $0xd8] sm:$0xff]  }
  0x7f   :  { %v5008_v50 = vld [vmem:[#allocation7 + $0x88] sm:$0xff]   ;;  %v5018_v51 = vld [vmem:[#allocation7 + $0x10] sm:$0xff]   ;;  %v5016_v56 = vld [vmem:[#allocation7 + $0x98] sm:$0xff]  }
  0x80   :  { %v5011_v52 = vld [vmem:[#allocation7 + $0xd0] sm:$0xff]   ;;  %v4998_v53 = vld [vmem:[#allocation2 + $0x28] sm:$0xff]   ;;  %v5019_v57 = vld [vmem:[#allocation7 + $0xe0] sm:$0xff]  }
  0x81   :  { %476 = vmatpush1.bf16.msra.mxu0 %v4955_v10  ;;  %4922 = vmatpush1.bf16.msra.mxu1 %v4955_v10  ;;  %v5012_v54 = vld [vmem:[#allocation7 + $0x90] sm:$0xff]   ;;  %v5000_v59 = vld [vmem:[#allocation2 + $0x38] sm:$0xff]   ;;  %v5001_v60 = vld [vmem:[#allocation2 + $0x40] sm:$0xff]  }
  0x82   :  { %477 = vmatprep.subr.bf16.mxu0 %v4956_v11  ;;  %4915 = vmatprep.subr.bf16.mxu1 %v4956_v11  ;;  %v4999_v58 = vld [vmem:[#allocation2 + $0x30] sm:$0xff]   ;;  %v5002_v61 = vld [vmem:[#allocation2 + $0x48] sm:$0xff]   ;;  %v5004_v63 = vld [vmem:[#allocation2 + $0x58] sm:$0xff]  }
  0x83   :  { %v5003_v62 = vld [vmem:[#allocation2 + $0x50] sm:$0xff]   ;;  %v5021_v1 = vld [vmem:[#allocation7 + $0x58] sm:$0xff]   ;;  %v5020_v3 = vld [vmem:[#allocation7 + $0xa0] sm:$0xff]  }
  0x84   :  { %v5022_v2 = vld [vmem:[#allocation7 + $0x18] sm:$0xff]   ;;  %v5023_v4 = vld [vmem:[#allocation7 + $0x60] sm:$0xff]   ;;  %v5027_v6 = vld [vmem:[#allocation7 + $0x68] sm:$0xff]  }
  0x85   :  { %478 = vmatpush1.bf16.msra.mxu0 %v4958_v12  ;;  %4923 = vmatpush1.bf16.msra.mxu1 %v4958_v12  ;;  %v5024_v5 = vld [vmem:[#allocation7 + $0x20] sm:$0xff]   ;;  %v5028_v7 = vld [vmem:[#allocation7 + $0x28] sm:$0xff]   ;;  %v5029_v8 = vld [vmem:[#allocation7 + $0x70] sm:$0xff]  }
  0x86   :  { %479 = vmatprep.subr.bf16.mxu0 %v4959_v13  ;;  %4916 = vmatprep.subr.bf16.mxu1 %v4959_v13  ;;  %v5030_v9 = vld [vmem:[#allocation7 + $0x30] sm:$0xff]   ;;  %v5025_v10 = vld [vmem:[#allocation7 + $0xe8] sm:$0xff]   ;;  %v5031_v12 = vld [vmem:[#allocation7 + $0x78] sm:$0xff]  }
  0x87   :  { %v5026_v11 = vld [vmem:[#allocation7 + $0xa8] sm:$0xff]   ;;  %v5032_v13 = vld [vmem:[#allocation7 + $0x38] sm:$0xff]  }
  0x89   :  { %480 = vmatpush1.bf16.msra.mxu0 %v4961_v14  ;;  %4924 = vmatpush1.bf16.msra.mxu1 %v4961_v14  ;;  %v5033_v14 = vld [vmem:[#allocation7 + $0xf0] sm:$0xff]  }
  0x8a   :  { %481 = vmatprep.subr.bf16.mxu0 %v4962_v15  ;;  %4917 = vmatprep.subr.bf16.mxu1 %v4962_v15  ;;  %v5034_v15 = vld [vmem:[#allocation7 + $0xb0] sm:$0xff]  }
  0x8d   :  { %482 = vmatpush1.bf16.msra.mxu0 %v4964_v16  ;;  %4925 = vmatpush1.bf16.msra.mxu1 %v4964_v16  ;;  %v191_v16 = vlaneseq }
  0x8e   :  { %660 = vmatprep.subr.bf16.mxu1 %v4969_v17  ;;  %4470 = vmatprep.subr.bf16.mxu0 %v5009_v40  ;;  %v5035_v17 = vld [vmem:[#allocation7 + $0xf8] sm:$0xff]  }
  0x90   :  { %500 = vmatmul.mubr.bf16.vlgmr.msra.gmra.mrb[0].mxu0 %v5866_v18  ;;  %620 = vmatmul.mubr.bf16.vlgmr.msra.gmra.mrb[0].mxu1 %v5868_v19 }
  0x91   :  { %661 = vmatpush1.bf16.msra.mxu1 %v4967_v20  ;;  %509 = vmatprep.mubr.bf16.mxu0 %v5707_v0 }
  0x92   :  { %662 = vmatprep.subr.bf16.mxu1 %v4972_v21  ;;  %629 = vmatprep.mubr.bf16.mxu1 %v5707_v0 }
  0x93   :  { %4471 = vmatpush3.bf16.msra.mxu0 %v5010_v42 }
  0x94   :  { %4472 = vmatprep.subr.bf16.mxu0 %v5013_v44 }
  0x95   :  { %663 = vmatpush1.bf16.msra.mxu1 %v4970_v22 }
  0x96   :  { %664 = vmatprep.subr.bf16.mxu1 %v4977_v25 }
  0x97   :  { %4473 = vmatpush3.bf16.msra.mxu0 %v5014_v47 }
  0x98   :  { %510 = vmatmul.mubr.bf16.gmra.mrb[4].mxu0 %v5874_v23  ;;  %630 = vmatmul.mubr.bf16.gmra.mrb[4].mxu1 %v5876_v24 }
  0x99   :  { %665 = vmatpush1.bf16.msra.mxu1 %v4975_v26  ;;  %519 = vmatprep.mubr.bf16.mxu0 %v5707_v0 }
  0x9a   :  { %666 = vmatprep.subr.bf16.mxu1 %v4980_v27  ;;  %639 = vmatprep.mubr.bf16.mxu1 %v5707_v0 }
  0x9b   :  { %4474 = vmatprep.subr.bf16.mxu0 %v5017_v49 }
  0x9c   :  { %4475 = vmatpush3.bf16.msra.mxu0 %v5018_v51 }
  0x9d   :  { %667 = vmatpush1.bf16.msra.mxu1 %v4978_v28  ;;  %4476 = vmatprep.subr.bf16.mxu0 %v5021_v1 }
  0x9e   :  { %668 = vmatprep.subr.bf16.mxu1 %v4985_v29 }
  0xa0   :  { %520 = vmatmul.mubr.bf16.gmra.mrb[8].mxu0 %v5882_v30  ;;  %640 = vmatmul.mubr.bf16.gmra.mrb[8].mxu1 %v5884_v31 }
  0xa1   :  { %669 = vmatpush1.bf16.msra.mxu1 %v4983_v32  ;;  %529 = vmatprep.mubr.bf16.mxu0 %v5707_v0 }
  0xa2   :  { %670 = vmatprep.subr.bf16.mxu1 %v4988_v33  ;;  %649 = vmatprep.mubr.bf16.mxu1 %v5707_v0 }
  0xa3   :  { %4477 = vmatpush3.bf16.msra.mxu0 %v5022_v2 }
  0xa4   :  { %4478 = vmatprep.subr.bf16.mxu0 %v5023_v4 }
  0xa5   :  { %671 = vmatpush1.bf16.msra.mxu1 %v4986_v34 }
  0xa6   :  { %672 = vmatprep.subr.bf16.mxu1 %v4993_v35 }
  0xa7   :  { %4479 = vmatpush3.bf16.msra.mxu0 %v5024_v5 }
  0xa8   :  { %530 = vmatmul.mubr.bf16.gmra.mrb[12].mxu0 %v4989_v36  ;;  %650 = vmatmul.mubr.bf16.gmra.mrb[12].mxu1 %v5890_v37 }
  0xa9   :  { %673 = vmatpush1.bf16.msra.mxu1 %v4991_v38  ;;  %539 = vmatprep.mubr.bf16.mxu0 %v5707_v0 }
  0xaa   :  { %674 = vmatprep.subr.bf16.mxu1 %v4996_v39  ;;  %692 = vmatprep.mubr.bf16.mxu1 %v5707_v0 }
  0xab   :  { %4480 = vmatprep.subr.bf16.mxu0 %v5027_v6 }
  0xac   :  { %4481 = vmatpush3.bf16.msra.mxu0 %v5028_v7 }
  0xad   :  { %675 = vmatpush1.bf16.msra.mxu1 %v4994_v41  ;;  %4482 = vmatprep.subr.bf16.mxu0 %v5029_v8 }
  0xae   :  { %4582 = vmatprep.subr.bf16.mxu1 %v5005_v43 }
  0xb0   :  { %540 = vmatmul.mubr.bf16.gmra.mrb[16].mxu0 %v4997_v45  ;;  %693 = vmatmul.mubr.bf16.vlgmr.msra.gmra.mrb[16].mxu1 %v5866_v18  ;;  %v5036_v18 = vld [vmem:[#allocation7 + $0xb8] sm:$0xff]  }
  0xb1   :  { %549 = vmatprep.mubr.bf16.mxu0 %v5707_v0  ;;  %702 = vmatprep.mubr.bf16.mxu1 %v5707_v0 }
  0xb2   :  { %4583 = vmatpush3.bf16.msra.mxu1 %v5006_v46  ;;  %4483 = vmatpush3.bf16.msra.mxu0 %v5030_v9 }
  0xb3   :  { %4584 = vmatprep.subr.bf16.mxu1 %v5007_v48  ;;  %4484 = vmatprep.subr.bf16.mxu0 %v5031_v12 }
  0xb6   :  { %4585 = vmatpush3.bf16.msra.mxu1 %v5008_v50  ;;  %4485 = vmatpush3.bf16.msra.mxu0 %v5032_v13 }
  0xb7   :  { %4586 = vmatprep.subr.bf16.mxu1 %v5011_v52 }
  0xb8   :  { %550 = vmatmul.mubr.bf16.gmra.mrb[20].mxu0 %v4998_v53  ;;  %703 = vmatmul.mubr.bf16.gmra.mrb[20].mxu1 %v5874_v23 }
  0xb9   :  { %559 = vmatprep.mubr.bf16.mxu0 %v5707_v0  ;;  %712 = vmatprep.mubr.bf16.mxu1 %v5707_v0 }
  0xba   :  { %4587 = vmatpush3.bf16.msra.mxu1 %v5012_v54 }
  0xbb   :  { %4588 = vmatprep.subr.bf16.mxu1 %v5015_v55 }
  0xbe   :  { %4589 = vmatpush3.bf16.msra.mxu1 %v5016_v56 }
  0xbf   :  { %4590 = vmatprep.subr.bf16.mxu1 %v5019_v57 }
  0xc0   :  { %560 = vmatmul.mubr.bf16.gmra.mrb[24].mxu0 %v4999_v58  ;;  %713 = vmatmul.mubr.bf16.gmra.mrb[24].mxu1 %v5882_v30 }
  0xc1   :  { %569 = vmatprep.mubr.bf16.mxu0 %v5707_v0  ;;  %722 = vmatprep.mubr.bf16.mxu1 %v5707_v0 }
  0xc2   :  { %4591 = vmatpush3.bf16.msra.mxu1 %v5020_v3 }
  0xc3   :  { %4592 = vmatprep.subr.bf16.mxu1 %v5025_v10 }
  0xc6   :  { %4593 = vmatpush3.bf16.msra.mxu1 %v5026_v11 }
  0xc7   :  { %4594 = vmatprep.subr.bf16.mxu1 %v5033_v14 }
  0xc8   :  { %570 = vmatmul.mubr.bf16.gmra.mrb[28].mxu0 %v5000_v59  ;;  %723 = vmatmul.mubr.bf16.gmra.mrb[28].mxu1 %v4989_v36 }
  0xc9   :  { %579 = vmatprep.mubr.bf16.mxu0 %v5707_v0  ;;  %732 = vmatprep.mubr.bf16.mxu1 %v5707_v0 }
  0xca   :  { %4595 = vmatpush3.bf16.msra.mxu1 %v5034_v15 }
  0xcb   :  { %4596 = vmatprep.subr.bf16.mxu1 %v5035_v17 }
  0xce   :  { %4597 = vmatpush3.bf16.msra.mxu1 %v5036_v18 }
  0xd0   :  { %580 = vmatmul.mubr.bf16.gmra.mrb[32].mxu0 %v5001_v60  ;;  %733 = vmatmul.mubr.bf16.gmra.mrb[32].mxu1 %v4997_v45 }
  0xd1   :  { %589 = vmatprep.mubr.bf16.mxu0 %v5707_v0  ;;  %742 = vmatprep.mubr.bf16.mxu1 %v5707_v0 }
  0xd8   :  { %590 = vmatmul.mubr.bf16.gmra.mrb[36].mxu0 %v5002_v61  ;;  %743 = vmatmul.mubr.bf16.gmra.mrb[36].mxu1 %v4998_v53 }
  0xd9   :  { %599 = vmatprep.mubr.bf16.mxu0 %v5707_v0  ;;  %752 = vmatprep.mubr.bf16.mxu1 %v5707_v0 }
  0xe0   :  { %600 = vmatmul.mubr.bf16.gmra.mrb[40].mxu0 %v5003_v62  ;;  %753 = vmatmul.mubr.bf16.gmra.mrb[40].mxu1 %v4999_v58 }
  0xe1   :  { %609 = vmatprep.mubr.bf16.mxu0 %v5707_v0  ;;  %762 = vmatprep.mubr.bf16.mxu1 %v5707_v0 }
  0xe8   :  { %610 = vmatmul.mubr.bf16.gmra.mrb[44].mxu0 %v5004_v63  ;;  %763 = vmatmul.mubr.bf16.gmra.mrb[44].mxu1 %v5000_v59 }
  0xe9   :  { %772 = vmatprep.mubr.bf16.mxu1 %v5707_v0 }
  0xf0   :  { %773 = vmatmul.mubr.bf16.gmra.mrb[48].mxu1 %v5001_v60 }
  0xf1   :  { %782 = vmatprep.mubr.bf16.mxu1 %v5707_v0 }
  0xf8   :  { %783 = vmatmul.mubr.bf16.gmra.mrb[52].mxu1 %v5002_v61 }
  0xf9   :  { %792 = vmatprep.mubr.bf16.mxu1 %v5707_v0 }
 0x100   :  { %793 = vmatmul.mubr.bf16.gmra.mrb[56].mxu1 %v5003_v62 }
 0x101   :  { %802 = vmatprep.mubr.bf16.mxu1 %v5707_v0 }
 0x108   :  { %803 = vmatmul.mubr.bf16.gmra.mrb[60].mxu1 %v5004_v63 }
 0x109   :  { %812 = vmatprep.mubr.bf16.mxu1 %v5707_v0 }
 0x110   :  { %813 = vmatmul.mubr.bf16.gmra.mrb[64].mxu1 %v5868_v19  ;;  %v5924_v19 = vshrl.u32 %v191_v16, 7 }
 0x111   :  { %822 = vmatprep.mubr.bf16.mxu1 %v5707_v0 }
 0x112   :  { %v193_v20 = vsub.s32 0, %v5924_v19  ;;  %v197_v32 = vsub.s32 1, %v5924_v19 }
 0x118   :  { %823 = vmatmul.mubr.bf16.gmra.mrb[68].mxu1 %v5876_v24 }
 0x119   :  { %832 = vmatprep.mubr.bf16.mxu1 %v5707_v0 }
 0x120   :  { %833 = vmatmul.mubr.bf16.gmra.mrb[72].mxu1 %v5884_v31 }
 0x121   :  { %842 = vmatprep.mubr.bf16.mxu1 %v5707_v0  ;;  %v5930_v0 = vld [vmem:[%s8022_s2] sm:$0xf] }
 0x122   :  { %v5933_v21 = vrot.slane %v5930_v0, %v193_v20  ;;  %v5939_v36 = vrot.slane %v5930_v0, %v197_v32 }
 0x128   :  { %843 = vmatmul.mubr.bf16.gmra.mrb[76].mxu1 %v5890_v37 }
 0x163   :  { %v501_v22 = vpop.f32.mrb[0].mxu0  ;;  %v621_v23 = vpop.f32.mrb[0].mxu1 }
 0x164   :  { %v502_v24 = vadd.f32 %v501_v22, %v5933_v21  ;;  %v503_v25 = vpop.f32.mrb[1].mxu0  ;;  %v623_v26 = vpop.f32.mrb[1].mxu1  ;;  %v5942_v41 = vadd.f32 %v621_v23, %v5933_v21 }
 0x165   :  { %v505_v27 = vpop.f32.mrb[2].mxu0  ;;  %v625_v28 = vpop.f32.mrb[2].mxu1  ;;  %v5945_v44 = vadd.f32 %v503_v25, %v5939_v36  ;;  %v5952_v47 = vadd.f32 %v623_v26, %v5939_v36 }
 0x166   :  { %v853_v29 = vmin.f32 %v502_v24, 0.0  ;;  %v507_v30 = vpop.f32.mrb[3].mxu0  ;;  %v627_v31 = vpop.f32.mrb[3].mxu1  ;;  %v506_v34 = vadd.f32 %v505_v27, %v5933_v21  ;;  %v949_v49 = vmin.f32 %v5942_v41, 0.0  ;;  %v5959_v51 = vadd.f32 %v625_v28, %v5933_v21 }
 0x167   :  { %v854_v50 = vmin.f32 %v5945_v44, 0.0  ;;  %v950_v52 = vmin.f32 %v5952_v47, 0.0  ;;  %v5963_v53 = vadd.f32 %v507_v30, %v5939_v36  ;;  %v5970_v57 = vadd.f32 %v627_v31, %v5939_v36 }
 0x168   :  { %v981_v33 = vmul.f32 1.442695, %v853_v29  ;;  %v857_v35 = vmin.f32 %v506_v34, 0.0  ;;  %v1173_v61 = vmul.f32 1.442695, %v949_v49  ;;  %vm1493_vm0 = vcmp.gt.f32.partialorder %v502_v24, 0.0 }
 0x169   :  { %v983_v2 = vmul.f32 1.442695, %v854_v50  ;;  %v953_v3 = vmin.f32 %v5959_v51, 0.0  ;;  %v1175_v7 = vmul.f32 1.442695, %v950_v52  ;;  %v858_v8 = vmin.f32 %v5963_v53, 0.0 }
 0x16a   :  { %5061 = vpow2.f32 %v981_v33  ;;  %v989_v39 = vmul.f32 1.442695, %v857_v35  ;;  %v954_v10 = vmin.f32 %v5970_v57, 0.0  ;;  %vm1497_vm1 = vcmp.gt.f32.partialorder %v506_v34, 0.0 }
 0x16b   :  { %v511_v37 = vpop.f32.mrb[4].mxu0  ;;  %v631_v38 = vpop.f32.mrb[4].mxu1  ;;  %v1181_v15 = vmul.f32 1.442695, %v953_v3  ;;  %v991_v17 = vmul.f32 1.442695, %v858_v8 }
 0x16c   :  { %v513_v40 = vpop.f32.mrb[5].mxu0  ;;  %v633_v42 = vpop.f32.mrb[5].mxu1  ;;  %5063 = vpow2.f32 %v989_v39  ;;  %v5977_v62 = vadd.f32 %v511_v37, %v5933_v21  ;;  %v5991_v11 = vadd.f32 %v631_v38, %v5933_v21  ;;  %v1183_v22 = vmul.f32 1.442695, %v954_v10 }
 0x16d   :  { %v515_v43 = vpop.f32.mrb[6].mxu0  ;;  %v5947_v45 = vpop.f32.mrb[6].mxu1  ;;  %5065 = vpow2.f32 %v1173_v61  ;;  %v6002_v27 = vadd.f32 %v513_v40, %v5939_v36  ;;  %v6011_v31 = vadd.f32 %v633_v42, %v5939_v36  ;;  %vm1589_vm2 = vcmp.gt.f32.partialorder %v5942_v41, 0.0 }
 0x16e   :  { %v5949_v46 = vpop.f32.mrb[7].mxu0  ;;  %v5954_v48 = vpop.f32.mrb[7].mxu1  ;;  %v861_v14 = vmin.f32 %v5977_v62, 0.0  ;;  %5067 = vpow2.f32 %v983_v2  ;;  %v957_v23 = vmin.f32 %v5991_v11, 0.0  ;;  %v6016_v33 = vadd.f32 %v515_v43, %v5933_v21 }
 0x16f   :  { %5069 = vpow2.f32 %v1175_v7  ;;  %v862_v40 = vmin.f32 %v6002_v27, 0.0  ;;  %v958_v42 = vmin.f32 %v6011_v31, 0.0  ;;  %v6030_v43 = vadd.f32 %v5947_v45, %v5933_v21 }
 0x170   :  { %v997_v26 = vmul.f32 1.442695, %v861_v14  ;;  %5071 = vpow2.f32 %v1181_v15  ;;  %v1189_v38 = vmul.f32 1.442695, %v957_v23  ;;  %v865_v50 = vmin.f32 %v6016_v33, 0.0 }
 0x171   :  { %5073 = vpow2.f32 %v991_v17  ;;  %v999_v2 = vmul.f32 1.442695, %v862_v40  ;;  %v6039_v3 = vadd.f32 %v5949_v46, %v5939_v36  ;;  %v961_v10 = vmin.f32 %v6030_v43, 0.0 }
 0x172   :  { %5075 = vpow2.f32 %v1183_v22  ;;  %v1005_v14 = vmul.f32 1.442695, %v865_v50  ;;  %vm1494_vm3 = vcmp.gt.f32.partialorder %v5945_v44, 0.0  ;;  %vm1590_vm4 = vcmp.gt.f32.partialorder %v5952_v47, 0.0 }
 0x173   :  { %v5965_v54 = vpop.f32.mrb[8].mxu0  ;;  %v5967_v55 = vpop.f32.mrb[8].mxu1  ;;  %5077 = vpow2.f32 %v997_v26  ;;  %vm1498_vm5 = vcmp.gt.f32.partialorder %v5963_v53, 0.0  ;;  %vm1593_vm6 = vcmp.gt.f32.partialorder %v5959_v51, 0.0  ;;  %vm1594_vm7 = vcmp.gt.f32.partialorder %v5970_v57, 0.0 }
 0x174   :  { %v5062_v56 = vpop.eup %5061  ;;  %v5972_v58 = vpop.f32.mrb[9].mxu0  ;;  %5079 = vpow2.f32 %v1189_v38  ;;  %v6053_v46 = vadd.f32 %v5965_v54, %v5933_v21  ;;  %v866_v38 = vmin.f32 %v6039_v3, 0.0  ;;  %vm1501_vm8 = vcmp.gt.f32.partialorder %v5977_v62, 0.0 }
 0x175   :  { %v5974_v59 = vpop.f32.mrb[9].mxu1  ;;  %v4186_v60 = vadd.f32 -1.0, %v5062_v56  ;;  %v5979_v63 = vpop.f32.mrb[10].mxu0  ;;  %5081 = vpow2.f32 %v999_v2  ;;  %vm1597_vm9 = vcmp.gt.f32.partialorder %v5991_v11, 0.0  ;;  %vm1502_vm10 = vcmp.gt.f32.partialorder %v6002_v27, 0.0 }
 0x176   :  { %v5981_v1 = vpop.f32.mrb[10].mxu1  ;;  %v5984_v4 = vpop.f32.mrb[11].mxu0  ;;  %v869_v15 = vmin.f32 %v6053_v46, 0.0  ;;  %vm1598_vm11 = vcmp.gt.f32.partialorder %v6011_v31, 0.0  ;;  %vm1505_vm12 = vcmp.gt.f32.partialorder %v6016_v33, 0.0  ;;  %vm1601_vm13 = vcmp.gt.f32.partialorder %v6030_v43, 0.0 }
 0x177   :  { %v5986_v5 = vpop.f32.mrb[11].mxu1  ;;  %v1365_v6 = vmul.f32 1.6732632, %v4186_v60  ;;  %v5064_v9 = vpop.eup %5063  ;;  %vm1506_vm14 = vcmp.gt.f32.partialorder %v6039_v3, 0.0 }
 0x178   :  { %v4190_v13 = vadd.f32 -1.0, %v5064_v9  ;;  %v5066_v49 = vpop.eup %5065  ;;  %v1191_v9 = vmul.f32 1.442695, %v958_v42 }
 0x179   :  { %v1621_v12 = vsel %vm1493_vm0, %v502_v24, %v1365_v6  ;;  %v5068_v52 = vpop.eup %5067  ;;  %v201_v6 = vsub.s32 2, %v5924_v19  ;;  %v4282_v8 = vadd.f32 -1.0, %v5066_v49  ;;  %v1197_v49 = vmul.f32 1.442695, %v961_v10 }
 0x17a   :  { %v1369_v16 = vmul.f32 1.6732632, %v4190_v13  ;;  %v5996_v20 = vmul.f32 1.050701, %v1621_v12  ;;  %v5070_v61 = vpop.eup %5069  ;;  %v6049_v12 = vadd.f32 %v5954_v48, %v5939_v36  ;;  %v4187_v13 = vadd.f32 -1.0, %v5068_v52 }
 0x17b   :  { %v5994_v18 = vpop.f32.mrb[12].mxu0  ;;  %v5999_v25 = vpop.f32.mrb[12].mxu1  ;;  %v4283_v23 = vadd.f32 -1.0, %v5070_v61  ;;  %v6064_v48 = vadd.f32 %v5967_v55, %v5933_v21  ;;  %v1461_v42 = vmul.f32 1.6732632, %v4282_v8  ;;  %5083 = vpow2.f32 %v1191_v9 }
 0x17c   :  { %v1625_v24 = vsel %vm1497_vm1, %v506_v34, %v1369_v16  ;;  %v6004_v28 = vpop.f32.mrb[13].mxu0  ;;  %v6006_v29 = vpop.f32.mrb[13].mxu1  ;;  %v962_v55 = vmin.f32 %v6049_v12, 0.0  ;;  %v1366_v52 = vmul.f32 1.6732632, %v4187_v13  ;;  %5085 = vpow2.f32 %v1005_v14 }
 0x17d   :  { %v6008_v30 = vmul.f32 1.050701, %v1625_v24  ;;  %v6013_v32 = vpop.f32.mrb[14].mxu0  ;;  %v6018_v34 = vpop.f32.mrb[14].mxu1  ;;  %v6081_v8 = vadd.f32 %v5972_v58, %v5939_v36  ;;  %v1007_v13 = vmul.f32 1.442695, %v866_v38  ;;  %v6089_v14 = vrot.slane %v5930_v0, %v201_v6 }
 0x17e   :  { %v6020_v35 = vpop.f32.mrb[15].mxu0  ;;  %v6024_v39 = vpop.f32.mrb[15].mxu1  ;;  %5087 = vpow2.f32 %v1197_v49  ;;  %v1199_v58 = vmul.f32 1.442695, %v962_v55  ;;  %v1717_v38 = vsel %vm1589_vm2, %v5942_v41, %v1461_v42  ;;  %v1622_v6 = vsel %vm1494_vm3, %v5945_v44, %v1366_v52 }
 0x17f   :  { %v5072_v22 = vpop.eup %5071  ;;  %5089 = vpow2.f32 %v1007_v13  ;;  %v6115_v41 = vadd.f32 %v5974_v59, %v5939_v36  ;;  %v6117_v44 = vmul.f32 1.050701, %v1717_v38  ;;  %vm1602_vm15 = vcmp.gt.f32.partialorder %v6049_v12, 0.0 }
 0x180   :  { %v5074_v26 = vpop.eup %5073  ;;  %v4286_v61 = vadd.f32 -1.0, %v5072_v22  ;;  %5091 = vpow2.f32 %v1199_v58  ;;  %vm1509_vm0 = vcmp.gt.f32.partialorder %v6053_v46, 0.0  ;;  %vm1605_vm1 = vcmp.gt.f32.partialorder %v6064_v48, 0.0 }
 0x181   :  { %v5076_v40 = vpop.eup %5075  ;;  %v4191_v2 = vadd.f32 -1.0, %v5074_v26  ;;  %8044 = vst [vmem:[#allocation33_spill] sm:$0xff] %v6117_v44  ;;  %v966_v38 = vmin.f32 %v6115_v41, 0.0  ;;  %vm1510_vm2 = vcmp.gt.f32.partialorder %v6081_v8, 0.0  ;;  %vm1606_vm3 = vcmp.gt.f32.partialorder %v6115_v41, 0.0 }
 0x182   :  { %v5078_v50 = vpop.eup %5077 }
 0x183   :  { %v6033_v56 = vpop.f32.mrb[16].mxu0  ;;  %v6035_v60 = vpop.f32.mrb[16].mxu1  ;;  %v1370_v55 = vmul.f32 1.6732632, %v4191_v2  ;;  %v6139_v2 = vadd.f32 %v5981_v1, %v5933_v21 }
 0x184   :  { %v6042_v7 = vpop.f32.mrb[17].mxu0  ;;  %v6044_v45 = vpop.f32.mrb[17].mxu1 }
 0x185   :  { %8033 = vst [vmem:[#allocation22_spill] sm:$0xff] %v6044_v45  ;;  %v6056_v16 = vpop.f32.mrb[18].mxu0  ;;  %v6058_v17 = vpop.f32.mrb[18].mxu1 }
 0x186   :  { %8034 = vst [vmem:[#allocation23_spill] sm:$0xff] %v6056_v16  ;;  %v6066_v24 = vpop.f32.mrb[19].mxu0  ;;  %v6068_v54 = vpop.f32.mrb[19].mxu1  ;;  %v4287_v16 = vadd.f32 -1.0, %v5076_v40  ;;  %v1465_v40 = vmul.f32 1.6732632, %v4286_v61 }
 0x187   :  { %8035 = vst [vmem:[#allocation24_spill] sm:$0xff] %v6066_v24  ;;  %8036 = vst [vmem:[#allocation25_spill] sm:$0xff] %v6068_v54  ;;  %v1462_v54 = vmul.f32 1.6732632, %v4283_v23  ;;  %v965_v24 = vmin.f32 %v6064_v48, 0.0  ;;  %v5080_v26 = vpop.eup %5079 }
 0x188   :  { %v4290_v45 = vadd.f32 -1.0, %v5080_v26  ;;  %v1721_v42 = vsel %vm1593_vm6, %v5959_v51, %v1465_v40 }
 0x189   :  { %v1718_v49 = vsel %vm1590_vm4, %v5952_v47, %v1462_v54  ;;  %v6121_v47 = vadd.f32 %v5979_v63, %v5933_v21  ;;  %v6123_v54 = vmul.f32 1.050701, %v1622_v6  ;;  %v1626_v63 = vsel %vm1498_vm5, %v5963_v53, %v1370_v55 }
 0x18a   :  { %v1469_v58 = vmul.f32 1.6732632, %v4290_v45  ;;  %v6151_v53 = vadd.f32 %v5984_v4, %v5939_v36  ;;  %v6169_v4 = vmul.f32 1.050701, %v1721_v42  ;;  %v6171_v55 = vmul.f32 1.050701, %v1626_v63 }
 0x18b   :  { %v6076_v37 = vpop.f32.mrb[20].mxu0  ;;  %v6083_v9 = vpop.f32.mrb[20].mxu1  ;;  %v1207_v63 = vmul.f32 1.442695, %v966_v38  ;;  %vm1513_vm4 = vcmp.gt.f32.partialorder %v6121_v47, 0.0  ;;  %vm1609_vm5 = vcmp.gt.f32.partialorder %v6139_v2, 0.0 }
 0x18c   :  { %8037 = vst [vmem:[#allocation26_spill] sm:$0xff] %v6076_v37  ;;  %8038 = vst [vmem:[#allocation27_spill] sm:$0xff] %v6083_v9  ;;  %v6085_v10 = vpop.f32.mrb[21].mxu0  ;;  %v6091_v22 = vpop.f32.mrb[21].mxu1  ;;  %v4194_v37 = vadd.f32 -1.0, %v5078_v50  ;;  %vm1514_vm6 = vcmp.gt.f32.partialorder %v6151_v53, 0.0 }
 0x18d   :  { %8039 = vst [vmem:[#allocation28_spill] sm:$0xff] %v6085_v10  ;;  %8040 = vst [vmem:[#allocation29_spill] sm:$0xff] %v6091_v22  ;;  %v6093_v23 = vpop.f32.mrb[22].mxu0  ;;  %v6096_v9 = vpop.f32.mrb[22].mxu1  ;;  %v1205_v50 = vmul.f32 1.442695, %v965_v24 }
 0x18e   :  { %8041 = vst [vmem:[#allocation30_spill] sm:$0xff] %v6093_v23  ;;  %8042 = vst [vmem:[#allocation31_spill] sm:$0xff] %v6096_v9  ;;  %v6098_v10 = vpop.f32.mrb[23].mxu0  ;;  %v1013_v23 = vmul.f32 1.442695, %v869_v15  ;;  %v6106_v22 = vpop.f32.mrb[23].mxu1 }
 0x18f   :  { %8043 = vst [vmem:[#allocation32_spill] sm:$0xff] %v6098_v10  ;;  %v870_v10 = vmin.f32 %v6081_v8, 0.0  ;;  %v1466_v9 = vmul.f32 1.6732632, %v4287_v16  ;;  %v1373_v15 = vmul.f32 1.6732632, %v4194_v37  ;;  %v5082_v24 = vpop.eup %5081 }
 0x190   :  { %v6125_v16 = vmul.f32 1.050701, %v1718_v49  ;;  %5093 = vpow2.f32 %v1013_v23  ;;  %v5084_v37 = vpop.eup %5083  ;;  %v4195_v40 = vadd.f32 -1.0, %v5082_v24  ;;  %v873_v49 = vmin.f32 %v6121_v47, 0.0  ;;  %8051 = vst [vmem:[#allocation40_spill] sm:$0xff] %v6169_v4 }
 0x191   :  { %5095 = vpow2.f32 %v1205_v50  ;;  %v1015_v61 = vmul.f32 1.442695, %v870_v10  ;;  %v5086_v51 = vpop.eup %5085  ;;  %v1722_v23 = vsel %vm1594_vm7, %v5970_v57, %v1466_v9  ;;  %v1629_v6 = vsel %vm1501_vm8, %v5977_v62, %v1373_v15 }
 0x192   :  { %8045 = vst [vmem:[#allocation34_spill] sm:$0xff] %v6125_v16  ;;  %v6163_v57 = vadd.f32 %v5986_v5, %v5939_v36  ;;  %v4291_v50 = vadd.f32 -1.0, %v5084_v37  ;;  %v5088_v44 = vpop.eup %5087  ;;  %v6174_v62 = vmul.f32 1.050701, %v1722_v23  ;;  %v969_v5 = vmin.f32 %v6139_v2, 0.0 }
 0x193   :  { %v6130_v59 = vpop.f32.mrb[24].mxu0  ;;  %v6132_v52 = vpop.f32.mrb[24].mxu1  ;;  %5097 = vpow2.f32 %v1015_v61  ;;  %v6180_v15 = vadd.f32 %v5994_v18, %v5933_v21  ;;  %v6182_v24 = vmul.f32 1.050701, %v1629_v6  ;;  %v4198_v42 = vadd.f32 -1.0, %v5086_v51 }
 0x194   :  { %v6141_v13 = vpop.f32.mrb[25].mxu0  ;;  %v6143_v26 = vpop.f32.mrb[25].mxu1  ;;  %8052 = vst [vmem:[#allocation41_spill] sm:$0xff] %v6174_v62  ;;  %v874_v4 = vmin.f32 %v6151_v53, 0.0  ;;  %v1725_v37 = vsel %vm1597_vm9, %v5991_v11, %v1469_v58  ;;  %v1374_v23 = vmul.f32 1.6732632, %v4195_v40  ;;  %v6192_v6 = vadd.f32 %v5999_v25, %v5933_v21 }
 0x195   :  { %8046 = vst [vmem:[#allocation35_spill] sm:$0xff] %v6143_v26  ;;  %v6153_v10 = vpop.f32.mrb[26].mxu0  ;;  %v6155_v1 = vpop.f32.mrb[26].mxu1  ;;  %v1021_v62 = vmul.f32 1.442695, %v873_v49  ;;  %v970_v61 = vmin.f32 %v6163_v57, 0.0  ;;  %v6202_v40 = vadd.f32 %v6004_v28, %v5939_v36  ;;  %5099 = vpow2.f32 %v1207_v63 }
 0x196   :  { %8047 = vst [vmem:[#allocation36_spill] sm:$0xff] %v6153_v10  ;;  %8048 = vst [vmem:[#allocation37_spill] sm:$0xff] %v6155_v1  ;;  %v6165_v45 = vpop.f32.mrb[27].mxu0  ;;  %v6167_v9 = vpop.f32.mrb[27].mxu1  ;;  %v4294_v18 = vadd.f32 -1.0, %v5088_v44  ;;  %v877_v58 = vmin.f32 %v6180_v15, 0.0 }
 0x197   :  { %8049 = vst [vmem:[#allocation38_spill] sm:$0xff] %v6165_v45  ;;  %8050 = vst [vmem:[#allocation39_spill] sm:$0xff] %v6167_v9  ;;  %v5090_v16 = vpop.eup %5089  ;;  %v1470_v9 = vmul.f32 1.6732632, %v4291_v50  ;;  %v1213_v11 = vmul.f32 1.442695, %v969_v5  ;;  %5101 = vpow2.f32 %v1021_v62 }
 0x198   :  { %v5092_v45 = vpop.eup %5091  ;;  %v6208_v50 = vmul.f32 1.050701, %v1725_v37  ;;  %v4199_v10 = vadd.f32 -1.0, %v5090_v16  ;;  %v1215_v5 = vmul.f32 1.442695, %v970_v61  ;;  %v878_v61 = vmin.f32 %v6202_v40, 0.0 }
 0x199   :  { %v4295_v37 = vadd.f32 -1.0, %v5092_v45  ;;  %5103 = vpow2.f32 %v1213_v11  ;;  %v1029_v63 = vmul.f32 1.442695, %v877_v58  ;;  %v6230_v45 = vadd.f32 %v6006_v29, %v5939_v36 }
 0x19a   :  { %v5094_v25 = vpop.eup %5093  ;;  %8057 = vst [vmem:[#allocation46_spill] sm:$0xff] %v6208_v50  ;;  %v1726_v50 = vsel %vm1598_vm11, %v6011_v31, %v1470_v9  ;;  %v1878_v11 = vpack.c.bf16 %v6171_v55, %v6123_v54  ;;  %vm1610_vm7 = vcmp.gt.f32.partialorder %v6163_v57, 0.0  ;;  %vm1517_vm8 = vcmp.gt.f32.partialorder %v6180_v15, 0.0 }
 0x19b   :  { %v6194_v51 = vpop.f32.mrb[28].mxu0  ;;  %v6196_v38 = vpop.f32.mrb[28].mxu1  ;;  %v4202_v62 = vadd.f32 -1.0, %v5094_v25  ;;  %v1474_v25 = vmul.f32 1.6732632, %v4295_v37  ;;  %v6264_v37 = vadd.f32 %v6018_v34, %v5933_v21  ;;  %vm1613_vm9 = vcmp.gt.f32.partialorder %v6192_v6, 0.0 }
 0x19c   :  { %8053 = vst [vmem:[#allocation42_spill] sm:$0xff] %v6194_v51  ;;  %8054 = vst [vmem:[#allocation43_spill] sm:$0xff] %v6196_v38  ;;  %v6204_v49 = vpop.f32.mrb[29].mxu0  ;;  %v6206_v44 = vpop.f32.mrb[29].mxu1  ;;  %v1377_v51 = vmul.f32 1.6732632, %v4198_v42  ;;  %2236 = vmatprep.mubr.bf16.mxu0 %v1878_v11 }
 0x19d   :  { %8055 = vst [vmem:[#allocation44_spill] sm:$0xff] %v6204_v49  ;;  %8056 = vst [vmem:[#allocation45_spill] sm:$0xff] %v6206_v44  ;;  %v1023_v38 = vmul.f32 1.442695, %v874_v4  ;;  %v5096_v1 = vpop.eup %5095  ;;  %v6211_v26 = vpop.f32.mrb[30].mxu0  ;;  %v1630_v44 = vsel %vm1502_vm10, %v6002_v27, %v1374_v23  ;;  %v973_v4 = vmin.f32 %v6192_v6, 0.0  ;;  %v1730_v34 = vsel %vm1602_vm15, %v6049_v12, %v1474_v25 }
 0x19e   :  { %v6213_v28 = vpop.f32.mrb[30].mxu1  ;;  %v1473_v49 = vmul.f32 1.6732632, %v4294_v18  ;;  %v6220_v42 = vpop.f32.mrb[31].mxu0  ;;  %v4298_v27 = vadd.f32 -1.0, %v5096_v1  ;;  %v1633_v58 = vsel %vm1505_vm12, %v6016_v33, %v1377_v51  ;;  %v974_v33 = vmin.f32 %v6230_v45, 0.0 }
 0x19f   :  { %8058 = vst [vmem:[#allocation47_spill] sm:$0xff] %v6220_v42  ;;  %v6222_v16 = vpop.f32.mrb[31].mxu1  ;;  %5105 = vpow2.f32 %v1023_v38  ;;  %v5098_v23 = vpop.eup %5097  ;;  %v6232_v18 = vmul.f32 1.050701, %v1630_v44  ;;  %v1378_v42 = vmul.f32 1.6732632, %v4199_v10  ;;  %v6250_v51 = vadd.f32 %v6013_v32, %v5933_v21 }
 0x1a0   :  { %5107 = vpow2.f32 %v1215_v5  ;;  %v1221_v31 = vmul.f32 1.442695, %v973_v4  ;;  %v1729_v29 = vsel %vm1601_vm13, %v6030_v43, %v1473_v49  ;;  %v1381_v9 = vmul.f32 1.6732632, %v4202_v62  ;;  %v5100_v32 = vpop.eup %5099 }
 0x1a1   :  { %5109 = vpow2.f32 %v1029_v63  ;;  %v1031_v10 = vmul.f32 1.442695, %v878_v61  ;;  %v1477_v54 = vmul.f32 1.6732632, %v4298_v27  ;;  %v4203_v55 = vadd.f32 -1.0, %v5098_v23  ;;  %v5102_v63 = vpop.eup %5101 }
 0x1a2   :  { %v8059_v44 = vpack.c.bf16 %v6008_v30, %v5996_v20  ;;  %v6257_v43 = vmul.f32 1.050701, %v1726_v50  ;;  %v6259_v49 = vmul.f32 1.050701, %v1633_v58  ;;  %v6268_v62 = vmul.f32 1.050701, %v1729_v29 }
 0x1a3   :  { %v6240_v1 = vpop.f32.mrb[32].mxu0  ;;  %v6245_v38 = vpop.f32.mrb[32].mxu1  ;;  %v1634_v20 = vsel %vm1506_vm14, %v6039_v3, %v1378_v42  ;;  %5111 = vpow2.f32 %v1221_v31  ;;  %v1637_v61 = vsel %vm1509_vm0, %v6053_v46, %v1381_v9  ;;  %v6286_v3 = vadd.f32 %v6035_v60, %v6089_v14 }
 0x1a4   :  { %2237 = vmatmul.mubr.bf16.vlgmr.msra.gmra.mrb[48].mxu0 %v8059_v44  ;;  %v6255_v5 = vpop.f32.mrb[33].mxu0  ;;  %8060 = vst [vmem:[#allocation48_spill] sm:$0xff] %v6257_v43  ;;  %v6266_v4 = vpop.f32.mrb[33].mxu1  ;;  %8061 = vst [vmem:[#allocation49_spill] sm:$0xff] %v6268_v62  ;;  %5113 = vpow2.f32 %v1031_v10  ;;  %v1733_v23 = vsel %vm1605_vm1, %v6064_v48, %v1477_v54  ;;  %v1382_v11 = vmul.f32 1.6732632, %v4203_v55 }
 0x1a5   :  { %v6274_v30 = vpop.f32.mrb[34].mxu0  ;;  %v6276_v50 = vpop.f32.mrb[34].mxu1  ;;  %v1223_v12 = vmul.f32 1.442695, %v974_v33  ;;  %v881_v58 = vmin.f32 %v6250_v51, 0.0  ;;  %v4299_v31 = vadd.f32 -1.0, %v5100_v32  ;;  %v6316_v32 = vadd.f32 %v6020_v35, %v5939_v36 }
 0x1a6   :  { %v6288_v42 = vpop.f32.mrb[35].mxu0  ;;  %v6290_v27 = vpop.f32.mrb[35].mxu1  ;;  %v6297_v25 = vmul.f32 1.050701, %v1634_v20  ;;  %v977_v60 = vmin.f32 %v6264_v37, 0.0  ;;  %v855_v29 = vmin.f32 %v6286_v3, 0.0 }
 0x1a7   :  { %v5104_v46 = vpop.eup %5103  ;;  %v6301_v10 = vmul.f32 1.050701, %v1730_v34  ;;  %v4206_v44 = vadd.f32 -1.0, %v5102_v63  ;;  %v6308_v33 = vmul.f32 1.050701, %v1637_v61  ;;  %v1638_v34 = vsel %vm1510_vm2, %v6081_v8, %v1382_v11 }
 0x1a8   :  { %v6310_v20 = vmul.f32 1.050701, %v1733_v23  ;;  %v985_v63 = vmul.f32 1.442695, %v855_v29  ;;  %v4302_v62 = vadd.f32 -1.0, %v5104_v46  ;;  %5115 = vpow2.f32 %v1223_v12 }
 0x1a9   :  { %v5106_v9 = vpop.eup %5105  ;;  %8062 = vst [vmem:[#allocation50_spill] sm:$0xff] %v6301_v10  ;;  %v1037_v10 = vmul.f32 1.442695, %v881_v58  ;;  %v1229_v43 = vmul.f32 1.442695, %v977_v60  ;;  %v6336_v58 = vadd.f32 %v6024_v39, %v5939_v36  ;;  %v6347_v60 = vadd.f32 %v6033_v56, %v5933_v21 }
 0x1aa   :  { %v5108_v55 = vpop.eup %5107  ;;  %8065 = vst [vmem:[#allocation53_spill] sm:$0xff] %v6310_v20  ;;  %v1478_v20 = vmul.f32 1.6732632, %v4299_v31  ;;  %5117 = vpow2.f32 %v985_v63  ;;  %v1385_v8 = vmul.f32 1.6732632, %v4206_v44  ;;  %v4207_v11 = vadd.f32 -1.0, %v5106_v9 }
 0x1ab   :  { %v6304_v48 = vpop.f32.mrb[36].mxu0  ;;  %v6306_v54 = vpop.f32.mrb[36].mxu1  ;;  %v4303_v12 = vadd.f32 -1.0, %v5108_v55  ;;  %v6351_v9 = vadd.f32 %v6058_v17, %v6089_v14  ;;  %5119 = vpow2.f32 %v1037_v10  ;;  %v6357_v63 = vadd.f32 %v6042_v7, %v5939_v36 }
 0x1ac   :  { %8063 = vst [vmem:[#allocation51_spill] sm:$0xff] %v6304_v48  ;;  %8064 = vst [vmem:[#allocation52_spill] sm:$0xff] %v6306_v54  ;;  %v6321_v61 = vpop.f32.mrb[37].mxu0  ;;  %v5110_v23 = vpop.eup %5109  ;;  %v8067_v54 = vsub.s32 3, %v5924_v19  ;;  %v6342_v19 = vmul.f32 1.050701, %v1638_v34  ;;  %v1734_v56 = vsel %vm1606_vm3, %v6115_v41, %v1478_v20  ;;  %5121 = vpow2.f32 %v1229_v43 }
 0x1ad   :  { %8066 = vst [vmem:[#allocation54_spill] sm:$0xff] %v6321_v61  ;;  %v6329_v29 = vpop.f32.mrb[37].mxu1  ;;  %v6331_v48 = vpop.f32.mrb[38].mxu0  ;;  %v4210_v55 = vadd.f32 -1.0, %v5110_v23  ;;  %v1386_v10 = vmul.f32 1.6732632, %v4207_v11 }
 0x1ae   :  { %v6327_v35 = vrot.slane %v5930_v0, %v8067_v54  ;;  %8068 = vst [vmem:[#allocation55_spill] sm:$0xff] %v6329_v29  ;;  %8069 = vst [vmem:[#allocation56_spill] sm:$0xff] %v6331_v48  ;;  %v6338_v46 = vpop.f32.mrb[38].mxu1  ;;  %v6340_v31 = vpop.f32.mrb[39].mxu0  ;;  %v882_v0 = vmin.f32 %v6316_v32, 0.0  ;;  %vm1518_vm10 = vcmp.gt.f32.partialorder %v6202_v40, 0.0 }
 0x1af   :  { %8070 = vst [vmem:[#allocation57_spill] sm:$0xff] %v6338_v46  ;;  %8071 = vst [vmem:[#allocation58_spill] sm:$0xff] %v6340_v31  ;;  %v6353_v44 = vpop.f32.mrb[39].mxu1  ;;  %v5112_v39 = vpop.eup %5111  ;;  %v1481_v54 = vmul.f32 1.6732632, %v4302_v62  ;;  %v8073_v31 = vld [vmem:[#allocation22_spill] sm:$0xff]  ;;  %v1641_v62 = vsel %vm1513_vm4, %v6121_v47, %v1385_v8  ;;  %v1882_v8 = vpack.c.bf16 %v6297_v25, %v6232_v18  ;;  %v1642_v18 = vsel %vm1514_vm6, %v6151_v53, %v1386_v10 }
 0x1b0   :  { %8072 = vst [vmem:[#allocation59_spill] sm:$0xff] %v6353_v44  ;;  %v5114_v34 = vpop.eup %5113  ;;  %v6364_v17 = vadd.f32 %v8073_v31, %v6327_v35  ;;  %v859_v44 = vmin.f32 %v6351_v9, 0.0  ;;  %v1482_v23 = vmul.f32 1.6732632, %v4303_v12  ;;  %v978_v7 = vmin.f32 %v6336_v58, 0.0 }
 0x1b1   :  { %v4306_v41 = vadd.f32 -1.0, %v5112_v39  ;;  %v1039_v43 = vmul.f32 1.442695, %v882_v0  ;;  %v885_v20 = vmin.f32 %v6347_v60, 0.0  ;;  %v1737_v46 = vsel %vm1609_vm5, %v6139_v2, %v1481_v54  ;;  %2244 = vmatprep.mubr.bf16.mxu0 %v1882_v8 }
 0x1b2   :  { %v993_v31 = vmul.f32 1.442695, %v859_v44  ;;  %v1389_v48 = vmul.f32 1.6732632, %v4210_v55  ;;  %v886_v47 = vmin.f32 %v6357_v63, 0.0  ;;  %v4211_v29 = vadd.f32 -1.0, %v5114_v34  ;;  %v5116_v54 = vpop.eup %5115 }
 0x1b3   :  { %v6380_v11 = vpop.f32.mrb[40].mxu0  ;;  %v6382_v12 = vpop.f32.mrb[40].mxu1  ;;  %v856_v0 = vmin.f32 %v6364_v17, 0.0  ;;  %v1881_v44 = vpack.c.bf16 %v6259_v49, %v6182_v24  ;;  %v6391_v55 = vmul.f32 1.050701, %v1734_v56  ;;  %v1738_v25 = vsel %vm1610_vm7, %v6163_v57, %v1482_v23  ;;  %v8081_v56 = vld [vmem:[#allocation23_spill] sm:$0xff] }
 0x1b4   :  { %8074 = vst [vmem:[#allocation22_spill] sm:$0xff] %v6380_v11  ;;  %8075 = vst [vmem:[#allocation60_spill] sm:$0xff] %v6382_v12  ;;  %5123 = vpow2.f32 %v993_v31  ;;  %v6387_v39 = vpop.f32.mrb[41].mxu0  ;;  %v6389_v2 = vpop.f32.mrb[41].mxu1  ;;  %v1231_v34 = vmul.f32 1.442695, %v978_v7 }
 0x1b5   :  { %8076 = vst [vmem:[#allocation61_spill] sm:$0xff] %v6387_v39  ;;  %8077 = vst [vmem:[#allocation62_spill] sm:$0xff] %v6389_v2  ;;  %v6399_v31 = vpop.f32.mrb[42].mxu0  ;;  %v6401_v24 = vpop.f32.mrb[42].mxu1  ;;  %v1485_v39 = vmul.f32 1.6732632, %v4306_v41  ;;  %5125 = vpow2.f32 %v1039_v43  ;;  %2245 = vmatmul.mubr.bf16.gmra.mrb[52].mxu0 %v1881_v44 }
 0x1b6   :  { %8078 = vst [vmem:[#allocation63_spill] sm:$0xff] %v6391_v55  ;;  %8079 = vst [vmem:[#allocation64_spill] sm:$0xff] %v6399_v31  ;;  %v5118_v49 = vpop.eup %5117  ;;  %v1045_v2 = vmul.f32 1.442695, %v885_v20  ;;  %v6405_v55 = vadd.f32 %v8081_v56, %v5933_v21  ;;  %v6407_v53 = vpop.f32.mrb[43].mxu0  ;;  %vm1614_vm11 = vcmp.gt.f32.partialorder %v6230_v45, 0.0  ;;  %v1645_v20 = vsel %vm1517_vm8, %v6180_v15, %v1389_v48 }
 0x1b7   :  { %8080 = vst [vmem:[#allocation65_spill] sm:$0xff] %v6401_v24  ;;  %8082 = vst [vmem:[#allocation23_spill] sm:$0xff] %v6407_v53  ;;  %v6409_v10 = vpop.f32.mrb[43].mxu1  ;;  %v6411_v57 = vmul.f32 1.050701, %v1641_v62  ;;  %v8085_v41 = vld [vmem:[#allocation24_spill] sm:$0xff]  ;;  %v5120_v53 = vpop.eup %5119  ;;  %5127 = vpow2.f32 %v1231_v34 }
 0x1b8   :  { %8083 = vst [vmem:[#allocation66_spill] sm:$0xff] %v6409_v10  ;;  %v6413_v23 = vmul.f32 1.050701, %v1737_v46  ;;  %v1047_v7 = vmul.f32 1.442695, %v886_v47  ;;  %v6418_v43 = vadd.f32 %v8085_v41, %v5939_v36  ;;  %v4307_v44 = vadd.f32 -1.0, %v5116_v54 }
 0x1b9   :  { %v1390_v8 = vmul.f32 1.6732632, %v4211_v29  ;;  %v987_v56 = vmul.f32 1.442695, %v856_v0  ;;  %v6423_v10 = vmul.f32 1.050701, %v1642_v18  ;;  %v1741_v47 = vsel %vm1613_vm9, %v6192_v6, %v1485_v39 }
 0x1ba   :  { %8084 = vst [vmem:[#allocation67_spill] sm:$0xff] %v6413_v23  ;;  %v6425_v62 = vmul.f32 1.050701, %v1738_v25  ;;  %v4188_v46 = vadd.f32 -1.0, %v5118_v49  ;;  %v5122_v23 = vpop.eup %5121  ;;  %5129 = vpow2.f32 %v1045_v2  ;;  %v889_v41 = vmin.f32 %v6405_v55, 0.0  ;;  %v8087_v15 = vld [vmem:[#allocation25_spill] sm:$0xff] }
 0x1bb   :  { %v6433_v48 = vadd.f32 %v8087_v15, %v6327_v35  ;;  %v6435_v29 = vpop.f32.mrb[44].mxu0  ;;  %v6437_v0 = vmul.f32 1.050701, %v1645_v20  ;;  %vm1521_vm12 = vcmp.gt.f32.partialorder %v6250_v51, 0.0  ;;  %5131 = vpow2.f32 %v1047_v7  ;;  %v6441_v18 = vpop.f32.mrb[44].mxu1 }
 0x1bc   :  { %8086 = vst [vmem:[#allocation24_spill] sm:$0xff] %v6425_v62  ;;  %8088 = vst [vmem:[#allocation25_spill] sm:$0xff] %v6435_v29  ;;  %v890_v54 = vmin.f32 %v6418_v43, 0.0  ;;  %v6443_v25 = vpop.f32.mrb[45].mxu0  ;;  %v1646_v6 = vsel %vm1518_vm10, %v6202_v40, %v1390_v8  ;;  %v1486_v39 = vmul.f32 1.6732632, %v4307_v44  ;;  %5133 = vpow2.f32 %v987_v56 }
 0x1bd   :  { %8089 = vst [vmem:[#allocation68_spill] sm:$0xff] %v6441_v18  ;;  %8090 = vst [vmem:[#allocation69_spill] sm:$0xff] %v6443_v25  ;;  %v4214_v2 = vadd.f32 -1.0, %v5120_v53  ;;  %v6448_v34 = vpop.f32.mrb[45].mxu1  ;;  %v6450_v49 = vpop.f32.mrb[46].mxu0  ;;  %v4310_v7 = vadd.f32 -1.0, %v5122_v23 }
 0x1be   :  { %8091 = vst [vmem:[#allocation70_spill] sm:$0xff] %v6448_v34  ;;  %8092 = vst [vmem:[#allocation71_spill] sm:$0xff] %v6450_v49  ;;  %v6452_v20 = vmul.f32 1.050701, %v1741_v47  ;;  %v1367_v15 = vmul.f32 1.6732632, %v4188_v46  ;;  %v5124_v25 = vpop.eup %5123 }
 0x1bf   :  { %v8094_v62 = vld [vmem:[#allocation26_spill] sm:$0xff]  ;;  %vm1617_vm13 = vcmp.gt.f32.partialorder %v6264_v37, 0.0  ;;  %v1053_v29 = vmul.f32 1.442695, %v889_v41  ;;  %v860_v40 = vmin.f32 %v6433_v48, 0.0  ;;  %v8095_v53 = vld [vmem:[#allocation27_spill] sm:$0xff]  ;;  %v5126_v41 = vpop.eup %5125 }
 0x1c0   :  { %8093 = vst [vmem:[#allocation72_spill] sm:$0xff] %v6452_v20  ;;  %v6456_v18 = vadd.f32 %v8094_v62, %v5933_v21  ;;  %v6462_v8 = vadd.f32 %v8095_v53, %v6089_v14  ;;  %v6464_v44 = vpop.f32.mrb[46].mxu1  ;;  %v6466_v56 = vpop.f32.mrb[47].mxu0  ;;  %v6468_v23 = vmul.f32 1.050701, %v1646_v6  ;;  %v4192_v46 = vadd.f32 -1.0, %v5124_v25 }
 0x1c1   :  { %8096 = vst [vmem:[#allocation26_spill] sm:$0xff] %v6464_v44  ;;  %8097 = vst [vmem:[#allocation27_spill] sm:$0xff] %v6466_v56  ;;  %v1055_v47 = vmul.f32 1.442695, %v890_v54  ;;  %v8098_v62 = vld [vmem:[#allocation28_spill] sm:$0xff]  ;;  %v6474_v49 = vpop.f32.mrb[47].mxu1  ;;  %v1742_v53 = vsel %vm1614_vm11, %v6230_v45, %v1486_v39  ;;  %5135 = vpow2.f32 %v1053_v29 }
 0x1c2   :  { %v6472_v20 = vadd.f32 %v8098_v62, %v5939_v36  ;;  %8099 = vst [vmem:[#allocation28_spill] sm:$0xff] %v6474_v49  ;;  %v1393_v34 = vmul.f32 1.6732632, %v4214_v2  ;;  %vm1522_vm14 = vcmp.gt.f32.partialorder %v6316_v32, 0.0  ;;  %vm1495_vm15 = vcmp.gt.f32.partialorder %v6286_v3, 0.0  ;;  %v8100_v6 = vld [vmem:[#allocation29_spill] sm:$0xff]  ;;  %v5128_v2 = vpop.eup %5127 }
 0x1c3   :  { %v6483_v25 = vadd.f32 %v8100_v6, %v6327_v35  ;;  %v1489_v54 = vmul.f32 1.6732632, %v4310_v7  ;;  %v1623_v62 = vsel %vm1495_vm15, %v6286_v3, %v1367_v15  ;;  %v1371_v56 = vmul.f32 1.6732632, %v4192_v46  ;;  %v6489_v39 = vpop.f32.mrb[48].mxu1  ;;  %v8103_v46 = vld [vmem:[#allocation30_spill] sm:$0xff] }
 0x1c4   :  { %v893_v49 = vmin.f32 %v6456_v18, 0.0  ;;  %vm1499_vm0 = vcmp.gt.f32.partialorder %v6351_v9, 0.0  ;;  %v995_v44 = vmul.f32 1.442695, %v860_v40  ;;  %v863_v45 = vmin.f32 %v6462_v8, 0.0  ;;  %8101 = vst [vmem:[#allocation29_spill] sm:$0xff] %v6489_v39  ;;  %v5130_v3 = vpop.eup %5129 }
 0x1c5   :  { %v4215_v24 = vadd.f32 -1.0, %v5126_v41  ;;  %v1627_v31 = vsel %vm1499_vm0, %v6351_v9, %v1371_v56  ;;  %5137 = vpow2.f32 %v1055_v47  ;;  %v894_v7 = vmin.f32 %v6472_v20, 0.0  ;;  %v6493_v6 = vpop.f32.mrb[49].mxu1  ;;  %v5132_v41 = vpop.eup %5131 }
 0x1c6   :  { %8102 = vst [vmem:[#allocation73_spill] sm:$0xff] %v6493_v6  ;;  %v6495_v15 = vmul.f32 1.050701, %v1623_v62  ;;  %v6497_v29 = vmul.f32 1.050701, %v1627_v31  ;;  %v864_v40 = vmin.f32 %v6483_v25, 0.0  ;;  %v6502_v12 = vadd.f32 %v8103_v46, %v5933_v21  ;;  %v5134_v46 = vpop.eup %5133 }
 0x1c7   :  { %v6504_v39 = vpop.f32.mrb[50].mxu1  ;;  %v6506_v9 = vmul.f32 1.050701, %v1742_v53  ;;  %v1649_v56 = vsel %vm1521_vm12, %v6250_v51, %v1393_v34  ;;  %v1745_v31 = vsel %vm1617_vm13, %v6264_v37, %v1489_v54  ;;  %vm1525_vm1 = vcmp.gt.f32.partialorder %v6347_v60, 0.0 }
 0x1c8   :  { %8104 = vst [vmem:[#allocation30_spill] sm:$0xff] %v6504_v39  ;;  %v1061_v47 = vmul.f32 1.442695, %v893_v49  ;;  %v6515_v62 = vpop.f32.mrb[51].mxu1  ;;  %vm1526_vm2 = vcmp.gt.f32.partialorder %v6357_v63, 0.0  ;;  %5139 = vpow2.f32 %v995_v44  ;;  %v8107_v39 = vld [vmem:[#allocation31_spill] sm:$0xff]  ;;  %v1886_v53 = vpack.c.bf16 %v6423_v10, %v6342_v19 }
 0x1c9   :  { %8105 = vst [vmem:[#allocation74_spill] sm:$0xff] %v6506_v9  ;;  %8106 = vst [vmem:[#allocation75_spill] sm:$0xff] %v6515_v62  ;;  %v1001_v9 = vmul.f32 1.442695, %v863_v45  ;;  %v6522_v51 = vadd.f32 %v8107_v39, %v6089_v14  ;;  %v1394_v34 = vmul.f32 1.6732632, %v4215_v24  ;;  %v1885_v44 = vpack.c.bf16 %v6411_v57, %v6308_v33 }
 0x1ca   :  { %v4311_v6 = vadd.f32 -1.0, %v5128_v2  ;;  %vm1618_vm3 = vcmp.gt.f32.partialorder %v6336_v58, 0.0  ;;  %v4218_v37 = vadd.f32 -1.0, %v5130_v3  ;;  %v1063_v49 = vmul.f32 1.442695, %v894_v7  ;;  %v8108_v24 = vld [vmem:[#allocation32_spill] sm:$0xff]  ;;  %2252 = vmatprep.mubr.bf16.mxu0 %v1886_v53 }
 0x1cb   :  { %vm1496_vm4 = vcmp.gt.f32.partialorder %v6364_v17, 0.0  ;;  %v1003_v54 = vmul.f32 1.442695, %v864_v40  ;;  %v897_v62 = vmin.f32 %v6502_v12, 0.0  ;;  %v4219_v45 = vadd.f32 -1.0, %v5132_v41  ;;  %v6542_v19 = vpop.f32.mrb[52].mxu1  ;;  %2253 = vmatmul.mubr.bf16.gmra.mrb[56].mxu0 %v1885_v44 }
 0x1cc   :  { %v4189_v39 = vadd.f32 -1.0, %v5134_v46  ;;  %5141 = vpow2.f32 %v1061_v47  ;;  %v6533_v2 = vadd.f32 %v8108_v24, %v5939_v36  ;;  %v6535_v3 = vmul.f32 1.050701, %v1649_v56  ;;  %8109 = vst [vmem:[#allocation31_spill] sm:$0xff] %v6542_v19  ;;  %v6553_v41 = vpop.f32.mrb[53].mxu1 }
 0x1cd   :  { %5143 = vpow2.f32 %v1001_v9  ;;  %v867_v7 = vmin.f32 %v6522_v51, 0.0  ;;  %v6540_v40 = vadd.f32 %v6106_v22, %v6327_v35  ;;  %v6544_v33 = vmul.f32 1.050701, %v1745_v31  ;;  %8111 = vst [vmem:[#allocation76_spill] sm:$0xff] %v6553_v41  ;;  %v5136_v9 = vpop.eup %5135 }
 0x1ce   :  { %v1650_v10 = vsel %vm1522_vm14, %v6316_v32, %v1394_v34  ;;  %5145 = vpow2.f32 %v1063_v49  ;;  %v6551_v57 = vadd.f32 %v6130_v59, %v5933_v21  ;;  %v1490_v22 = vmul.f32 1.6732632, %v4311_v6 }
 0x1cf   :  { %8110 = vst [vmem:[#allocation32_spill] sm:$0xff] %v6544_v33  ;;  %v1397_v56 = vmul.f32 1.6732632, %v4218_v37  ;;  %5147 = vpow2.f32 %v1003_v54  ;;  %v1069_v47 = vmul.f32 1.442695, %v897_v62  ;;  %v5138_v46 = vpop.eup %5137  ;;  %v898_v24 = vmin.f32 %v6533_v2, 0.0 }
 0x1d0   :  { %v1398_v31 = vmul.f32 1.6732632, %v4219_v45  ;;  %v1368_v53 = vmul.f32 1.6732632, %v4189_v39  ;;  %v6556_v33 = vpop.f32.mrb[54].mxu1  ;;  %vm1529_vm5 = vcmp.gt.f32.partialorder %v6405_v55, 0.0  ;;  %v6562_v34 = vadd.f32 %v6132_v52, %v6089_v14 }
 0x1d1   :  { %8112 = vst [vmem:[#allocation77_spill] sm:$0xff] %v6556_v33  ;;  %v1009_v32 = vmul.f32 1.442695, %v867_v7  ;;  %v868_v59 = vmin.f32 %v6540_v40, 0.0  ;;  %v6564_v6 = vpop.f32.mrb[55].mxu1  ;;  %v4222_v62 = vadd.f32 -1.0, %v5136_v9  ;;  %v6571_v54 = vadd.f32 %v6141_v13, %v5939_v36 }
 0x1d2   :  { %8113 = vst [vmem:[#allocation78_spill] sm:$0xff] %v6564_v6  ;;  %v6566_v37 = vmul.f32 1.050701, %v1650_v10  ;;  %v901_v49 = vmin.f32 %v6551_v57, 0.0  ;;  %v5140_v44 = vpop.eup %5139  ;;  %v1746_v45 = vsel %vm1618_vm3, %v6336_v58, %v1490_v22  ;;  %v1653_v52 = vsel %vm1525_vm1, %v6347_v60, %v1397_v56  ;;  %v8114_v39 = vld [vmem:[#allocation35_spill] sm:$0xff]  ;;  %v8115_v56 = vld [vmem:[#allocation36_spill] sm:$0xff] }
 0x1d3   :  { %vm1530_vm6 = vcmp.gt.f32.partialorder %v6418_v43, 0.0  ;;  %5149 = vpow2.f32 %v1069_v47  ;;  %v6582_v7 = vadd.f32 %v8114_v39, %v6327_v35  ;;  %v1654_v13 = vsel %vm1526_vm2, %v6357_v63, %v1398_v31 }
 0x1d4   :  { %v1624_v10 = vsel %vm1496_vm4, %v6364_v17, %v1368_v53  ;;  %v4223_v58 = vadd.f32 -1.0, %v5138_v46  ;;  %v1071_v9 = vmul.f32 1.442695, %v898_v24  ;;  %5151 = vpow2.f32 %v1009_v32  ;;  %v8117_v24 = vld [vmem:[#allocation37_spill] sm:$0xff] }
 0x1d5   :  { %v1011_v22 = vmul.f32 1.442695, %v868_v59  ;;  %v871_v60 = vmin.f32 %v6562_v34, 0.0  ;;  %v6593_v47 = vadd.f32 %v8115_v56, %v5933_v21  ;;  %v1401_v6 = vmul.f32 1.6732632, %v4222_v62  ;;  %v6606_v59 = vpop.f32.mrb[56].mxu1 }
 0x1d6   :  { %v5142_v39 = vpop.eup %5141  ;;  %v4193_v33 = vadd.f32 -1.0, %v5140_v44  ;;  %vm1500_vm7 = vcmp.gt.f32.partialorder %v6433_v48, 0.0  ;;  %v1077_v63 = vmul.f32 1.442695, %v901_v49  ;;  %v902_v31 = vmin.f32 %v6571_v54, 0.0  ;;  %8118 = vst [vmem:[#allocation36_spill] sm:$0xff] %v6606_v59 }
 0x1d7   :  { %v5144_v41 = vpop.eup %5143  ;;  %v6597_v17 = vmul.f32 1.050701, %v1746_v45  ;;  %v6599_v46 = vmul.f32 1.050701, %v1653_v52  ;;  %v872_v53 = vmin.f32 %v6582_v7, 0.0  ;;  %v6604_v32 = vadd.f32 %v8117_v24, %v6089_v14  ;;  %v6613_v49 = vpop.f32.mrb[57].mxu1 }
 0x1d8   :  { %v5146_v62 = vpop.eup %5145  ;;  %v6608_v44 = vmul.f32 1.050701, %v1654_v13  ;;  %v6610_v56 = vmul.f32 1.050701, %v1624_v10  ;;  %vm1533_vm8 = vcmp.gt.f32.partialorder %v6456_v18, 0.0  ;;  %5153 = vpow2.f32 %v1071_v9  ;;  %8119 = vst [vmem:[#allocation37_spill] sm:$0xff] %v6613_v49 }
 0x1d9   :  { %8116 = vst [vmem:[#allocation35_spill] sm:$0xff] %v6597_v17  ;;  %v5148_v45 = vpop.eup %5147  ;;  %v1402_v52 = vmul.f32 1.6732632, %v4223_v58  ;;  %vm1534_vm9 = vcmp.gt.f32.partialorder %v6472_v20, 0.0  ;;  %5155 = vpow2.f32 %v1011_v22  ;;  %v1017_v17 = vmul.f32 1.442695, %v871_v60 }
 0x1da   :  { %v905_v24 = vmin.f32 %v6593_v47, 0.0  ;;  %v6617_v19 = vpop.f32.mrb[58].mxu1  ;;  %v1657_v13 = vsel %vm1529_vm5, %v6405_v55, %v1401_v6  ;;  %v1372_v10 = vmul.f32 1.6732632, %v4193_v33  ;;  %5157 = vpow2.f32 %v1077_v63  ;;  %v8122_v55 = vld [vmem:[#allocation38_spill] sm:$0xff]  ;;  %v8123_v63 = vld [vmem:[#allocation39_spill] sm:$0xff] }
 0x1db   :  { %8120 = vst [vmem:[#allocation79_spill] sm:$0xff] %v6617_v19  ;;  %v1079_v59 = vmul.f32 1.442695, %v902_v31  ;;  %v6622_v9 = vpop.f32.mrb[59].mxu1  ;;  %v4226_v49 = vadd.f32 -1.0, %v5142_v39  ;;  %vm1503_vm10 = vcmp.gt.f32.partialorder %v6462_v8, 0.0  ;;  %v1890_v60 = vpack.c.bf16 %v6566_v37, %v6468_v23 }
 0x1dc   :  { %8121 = vst [vmem:[#allocation80_spill] sm:$0xff] %v6622_v9  ;;  %v1019_v58 = vmul.f32 1.442695, %v872_v53  ;;  %v875_v22 = vmin.f32 %v6604_v32, 0.0  ;;  %v4196_v11 = vadd.f32 -1.0, %v5144_v41  ;;  %v4227_v19 = vadd.f32 -1.0, %v5146_v62 }
 0x1dd   :  { %v4197_v61 = vadd.f32 -1.0, %v5148_v45  ;;  %vm1504_vm11 = vcmp.gt.f32.partialorder %v6483_v25, 0.0  ;;  %v6631_v33 = vadd.f32 %v8122_v55, %v5939_v36  ;;  %v5150_v6 = vpop.eup %5149  ;;  %vm1537_vm12 = vcmp.gt.f32.partialorder %v6502_v12, 0.0  ;;  %2260 = vmatprep.mubr.bf16.mxu0 %v1890_v60  ;;  %v8124_v53 = vld [vmem:[#allocation42_spill] sm:$0xff] }
 0x1de   :  { %5159 = vpow2.f32 %v1017_v17  ;;  %v1085_v39 = vmul.f32 1.442695, %v905_v24  ;;  %v6636_v31 = vadd.f32 %v8123_v63, %v6327_v35  ;;  %v1889_v23 = vpack.c.bf16 %v6535_v3, %v6437_v0  ;;  %v5152_v17 = vpop.eup %5151  ;;  %v6652_v0 = vpop.f32.mrb[60].mxu1 }
 0x1df   :  { %v6640_v41 = vmul.f32 1.050701, %v1657_v13  ;;  %v1658_v37 = vsel %vm1530_vm6, %v6418_v43, %v1402_v52  ;;  %5161 = vpow2.f32 %v1079_v59  ;;  %v6647_v62 = vadd.f32 %v8124_v53, %v5933_v21  ;;  %8125 = vst [vmem:[#allocation38_spill] sm:$0xff] %v6652_v0 }
 0x1e0   :  { %v1628_v45 = vsel %vm1500_vm7, %v6433_v48, %v1372_v10  ;;  %v1405_v24 = vmul.f32 1.6732632, %v4226_v49  ;;  %5163 = vpow2.f32 %v1019_v58  ;;  %v1025_v60 = vmul.f32 1.442695, %v875_v22  ;;  %2261 = vmatmul.mubr.bf16.gmra.mrb[60].mxu0 %v1889_v23 }
 0x1e1   :  { %v1375_v3 = vmul.f32 1.6732632, %v4196_v11  ;;  %v1406_v13 = vmul.f32 1.6732632, %v4227_v19  ;;  %v4230_v55 = vadd.f32 -1.0, %v5150_v6  ;;  %v906_v43 = vmin.f32 %v6631_v33, 0.0 }
 0x1e2   :  { %v6655_v59 = vmul.f32 1.050701, %v1658_v37  ;;  %v1376_v52 = vmul.f32 1.6732632, %v4197_v61  ;;  %vm1507_vm13 = vcmp.gt.f32.partialorder %v6522_v51, 0.0  ;;  %5165 = vpow2.f32 %v1085_v39  ;;  %v5154_v48 = vpop.eup %5153  ;;  %v8126_v11 = vld [vmem:[#allocation43_spill] sm:$0xff] }
 0x1e3   :  { %v876_v63 = vmin.f32 %v6636_v31, 0.0  ;;  %v4200_v49 = vadd.f32 -1.0, %v5152_v17  ;;  %vm1538_vm14 = vcmp.gt.f32.partialorder %v6533_v2, 0.0  ;;  %v909_v10 = vmin.f32 %v6647_v62, 0.0  ;;  %v5156_v58 = vpop.eup %5155  ;;  %v8127_v6 = vld [vmem:[#allocation44_spill] sm:$0xff] }
 0x1e4   :  { %v6663_v19 = vadd.f32 %v8126_v11, %v6089_v14  ;;  %v6665_v22 = vmul.f32 1.050701, %v1628_v45  ;;  %v1661_v61 = vsel %vm1533_vm8, %v6456_v18, %v1405_v24  ;;  %5167 = vpow2.f32 %v1025_v60  ;;  %v5158_v23 = vpop.eup %5157  ;;  %v8128_v11 = vld [vmem:[#allocation45_spill] sm:$0xff] }
 0x1e5   :  { %v6672_v39 = vadd.f32 %v8127_v6, %v5939_v36  ;;  %v1631_v37 = vsel %vm1503_vm10, %v6462_v8, %v1375_v3  ;;  %v1662_v53 = vsel %vm1534_vm9, %v6472_v20, %v1406_v13  ;;  %v1409_v17 = vmul.f32 1.6732632, %v4230_v55 }
 0x1e6   :  { %vm1541_vm15 = vcmp.gt.f32.partialorder %v6551_v57, 0.0  ;;  %v1087_v45 = vmul.f32 1.442695, %v906_v43  ;;  %v1632_v18 = vsel %vm1504_vm11, %v6483_v25, %v1376_v52  ;;  %v4231_v24 = vadd.f32 -1.0, %v5154_v48 }
 0x1e7   :  { %vm1508_vm0 = vcmp.gt.f32.partialorder %v6540_v40, 0.0  ;;  %v1027_v60 = vmul.f32 1.442695, %v876_v63  ;;  %v6687_v6 = vadd.f32 %v8128_v11, %v6327_v35  ;;  %v1379_v8 = vmul.f32 1.6732632, %v4200_v49 }
 0x1e8   :  { %v4201_v3 = vadd.f32 -1.0, %v5156_v58  ;;  %v1093_v0 = vmul.f32 1.442695, %v909_v10  ;;  %v879_v20 = vmin.f32 %v6663_v19, 0.0  ;;  %v5160_v13 = vpop.eup %5159  ;;  %v6690_v55 = vmul.f32 1.050701, %v1661_v61 }
 0x1e9   :  { %v6692_v43 = vmul.f32 1.050701, %v1631_v37  ;;  %v4234_v9 = vadd.f32 -1.0, %v5158_v23  ;;  %v910_v25 = vmin.f32 %v6672_v39, 0.0  ;;  %v5162_v52 = vpop.eup %5161  ;;  %v6695_v48 = vmul.f32 1.050701, %v1662_v53 }
 0x1ea   :  { %v6697_v63 = vmul.f32 1.050701, %v1632_v18  ;;  %v1665_v49 = vsel %vm1537_vm12, %v6502_v12, %v1409_v17  ;;  %5169 = vpow2.f32 %v1087_v45  ;;  %v5164_v10 = vpop.eup %5163  ;;  %v1410_v58 = vmul.f32 1.6732632, %v4231_v24 }
 0x1eb   :  { %vm1542_vm1 = vcmp.gt.f32.partialorder %v6571_v54, 0.0  ;;  %5171 = vpow2.f32 %v1027_v60  ;;  %v880_v61 = vmin.f32 %v6687_v6, 0.0  ;;  %v6706_v23 = vadd.f32 %v6211_v26, %v5933_v21 }
 0x1ec   :  { %v1635_v37 = vsel %vm1507_vm13, %v6522_v51, %v1379_v8  ;;  %v1380_v53 = vmul.f32 1.6732632, %v4201_v3  ;;  %vm1511_vm2 = vcmp.gt.f32.partialorder %v6562_v34, 0.0  ;;  %5173 = vpow2.f32 %v1093_v0  ;;  %v5166_v17 = vpop.eup %5165 }
 0x1ed   :  { %v1033_v12 = vmul.f32 1.442695, %v879_v20  ;;  %v1413_v45 = vmul.f32 1.6732632, %v4234_v9  ;;  %v4204_v18 = vadd.f32 -1.0, %v5160_v13  ;;  %v4235_v24 = vadd.f32 -1.0, %v5162_v52 }
 0x1ee   :  { %vm1512_vm3 = vcmp.gt.f32.partialorder %v6582_v7, 0.0  ;;  %v1095_v60 = vmul.f32 1.442695, %v910_v25  ;;  %v6713_v11 = vmul.f32 1.050701, %v1665_v49  ;;  %v4205_v26 = vadd.f32 -1.0, %v5164_v10  ;;  %v5168_v8 = vpop.eup %5167 }
 0x1ef   :  { %vm1545_vm4 = vcmp.gt.f32.partialorder %v6593_v47, 0.0  ;;  %v6718_v51 = vadd.f32 %v6213_v28, %v6089_v14  ;;  %v6720_v3 = vmul.f32 1.050701, %v1635_v37  ;;  %v1666_v9 = vsel %vm1538_vm14, %v6533_v2, %v1410_v58  ;;  %v8129_v52 = vld [vmem:[#allocation47_spill] sm:$0xff] }
 0x1f0   :  { %v1035_v0 = vmul.f32 1.442695, %v880_v61  ;;  %v913_v20 = vmin.f32 %v6706_v23, 0.0  ;;  %v1636_v13 = vsel %vm1508_vm0, %v6540_v40, %v1380_v53  ;;  %v4238_v25 = vadd.f32 -1.0, %v5166_v17 }
 0x1f1   :  { %5175 = vpow2.f32 %v1033_v12  ;;  %v6731_v28 = vadd.f32 %v8129_v52, %v5939_v36  ;;  %v1669_v49 = vsel %vm1541_vm15, %v6551_v57, %v1413_v45  ;;  %v1383_v10 = vmul.f32 1.6732632, %v4204_v18  ;;  %v6744_v57 = vpop.f32.mrb[61].mxu1 }
 0x1f2   :  { %v1414_v37 = vmul.f32 1.6732632, %v4235_v24  ;;  %5177 = vpow2.f32 %v1095_v60  ;;  %v1384_v2 = vmul.f32 1.6732632, %v4205_v26  ;;  %v4208_v58 = vadd.f32 -1.0, %v5168_v8  ;;  %v6754_v60 = vpop.f32.mrb[62].mxu1 }
 0x1f3   :  { %v883_v61 = vmin.f32 %v6718_v51, 0.0  ;;  %v1894_v40 = vpack.c.bf16 %v6655_v59, %v6608_v44  ;;  %v6739_v53 = vmul.f32 1.050701, %v1666_v9  ;;  %vm1515_vm5 = vcmp.gt.f32.partialorder %v6604_v32, 0.0 }
 0x1f4   :  { %5179 = vpow2.f32 %v1035_v0  ;;  %v1101_v12 = vmul.f32 1.442695, %v913_v20  ;;  %v1880_v17 = vpack.c.bf16 %v6665_v22, %v6610_v56  ;;  %v5170_v45 = vpop.eup %5169  ;;  %v1417_v18 = vmul.f32 1.6732632, %v4238_v25 }
 0x1f5   :  { %vm1546_vm6 = vcmp.gt.f32.partialorder %v6631_v33, 0.0  ;;  %v914_v24 = vmin.f32 %v6731_v28, 0.0  ;;  %v6750_v44 = vadd.f32 %v6222_v16, %v6327_v35  ;;  %2268 = vmatprep.mubr.bf16.mxu0 %v1894_v40  ;;  %v1893_v59 = vpack.c.bf16 %v6640_v41, %v6599_v46  ;;  %v5172_v26 = vpop.eup %5171 }
 0x1f6   :  { %v6756_v56 = vmul.f32 1.050701, %v1636_v13  ;;  %v6758_v22 = vmul.f32 1.050701, %v1669_v49  ;;  %v1639_v8 = vsel %vm1511_vm2, %v6562_v34, %v1383_v10  ;;  %2397 = vmatprep.mubr.bf16.mxu1 %v1880_v17  ;;  %v6765_v16 = vadd.f32 %v6240_v1, %v5933_v21  ;;  %v5174_v9 = vpop.eup %5173  ;;  %v6786_v13 = vpop.f32.mrb[63].mxu1 }
 0x1f7   :  { %v1670_v46 = vsel %vm1542_vm1, %v6571_v54, %v1414_v37  ;;  %v1640_v41 = vsel %vm1512_vm3, %v6582_v7, %v1384_v2  ;;  %v1387_v0 = vmul.f32 1.6732632, %v4208_v58  ;;  %vm1549_vm7 = vcmp.gt.f32.partialorder %v6647_v62, 0.0  ;;  %2269 = vmatmul.mubr.bf16.gmra.mrb[64].mxu0 %v1893_v59  ;;  %v6792_v49 = vpop.f32.mrb[64].mxu1 }
 0x1f8   :  { %v1041_v20 = vmul.f32 1.442695, %v883_v61  ;;  %v8130_v34 = vpack.c.bf16 %v6497_v29, %v6495_v15  ;;  %v4239_v1 = vadd.f32 -1.0, %v5170_v45  ;;  %vm1516_vm8 = vcmp.gt.f32.partialorder %v6636_v31, 0.0 }
 0x1f9   :  { %5181 = vpow2.f32 %v1101_v12  ;;  %v6780_v54 = vadd.f32 %v6245_v38, %v6089_v14  ;;  %v6784_v7 = vadd.f32 %v6255_v5, %v5939_v36  ;;  %v1673_v25 = vsel %vm1545_vm4, %v6593_v47, %v1417_v18 }
 0x1fa   :  { %2398 = vmatmul.mubr.bf16.vlgmr.msra.gmra.mrb[80].mxu1 %v8130_v34  ;;  %v4209_v15 = vadd.f32 -1.0, %v5172_v26  ;;  %v1103_v29 = vmul.f32 1.442695, %v914_v24  ;;  %v884_v52 = vmin.f32 %v6750_v44, 0.0  ;;  %v6794_v10 = vmul.f32 1.050701, %v1639_v8 }
 0x1fb   :  { %v6796_v38 = vmul.f32 1.050701, %v1670_v46  ;;  %v4242_v37 = vadd.f32 -1.0, %v5174_v9  ;;  %v917_v5 = vmin.f32 %v6765_v16, 0.0  ;;  %v5176_v2 = vpop.eup %5175  ;;  %v6799_v58 = vmul.f32 1.050701, %v1640_v41 }
 0x1fc   :  { %5183 = vpow2.f32 %v1041_v20  ;;  %v887_v61 = vmin.f32 %v6780_v54, 0.0  ;;  %v6804_v47 = vadd.f32 %v6266_v4, %v6327_v35  ;;  %v5178_v40 = vpop.eup %5177  ;;  %v6806_v12 = vmul.f32 1.050701, %v1673_v25  ;;  %v6817_v41 = vpop.f32.mrb[65].mxu1 }
 0x1fd   :  { %v1418_v17 = vmul.f32 1.6732632, %v4239_v1  ;;  %v918_v45 = vmin.f32 %v6784_v7, 0.0  ;;  %v6811_v18 = vadd.f32 %v6274_v30, %v5933_v21  ;;  %v1643_v24 = vsel %vm1515_vm5, %v6604_v32, %v1387_v0  ;;  %v6821_v1 = vpop.f32.mrb[66].mxu1 }
 0x1fe   :  { %v1388_v59 = vmul.f32 1.6732632, %v4209_v15  ;;  %5185 = vpow2.f32 %v1103_v29  ;;  %v1043_v26 = vmul.f32 1.442695, %v884_v52  ;;  %v5180_v8 = vpop.eup %5179  ;;  %v1421_v4 = vmul.f32 1.6732632, %v4242_v37 }
 0x1ff   :  { %v4212_v9 = vadd.f32 -1.0, %v5176_v2  ;;  %vm1519_vm9 = vcmp.gt.f32.partialorder %v6663_v19, 0.0  ;;  %v1109_v46 = vmul.f32 1.442695, %v917_v5  ;;  %v4243_v20 = vadd.f32 -1.0, %v5178_v40 }
 0x200   :  { %vm1550_vm10 = vcmp.gt.f32.partialorder %v6672_v39, 0.0  ;;  %v1049_v30 = vmul.f32 1.442695, %v887_v61  ;;  %v888_v34 = vmin.f32 %v6804_v47, 0.0  ;;  %v6823_v32 = vmul.f32 1.050701, %v1643_v24 }
 0x201   :  { %v1674_v0 = vsel %vm1546_vm6, %v6631_v33, %v1418_v17  ;;  %vm1520_vm11 = vcmp.gt.f32.partialorder %v6687_v6, 0.0  ;;  %v1111_v25 = vmul.f32 1.442695, %v918_v45  ;;  %v921_v15 = vmin.f32 %v6811_v18, 0.0  ;;  %v6847_v17 = vpop.f32.mrb[67].mxu1 }
 0x202   :  { %v1644_v29 = vsel %vm1516_vm8, %v6636_v31, %v1388_v59  ;;  %v4213_v52 = vadd.f32 -1.0, %v5180_v8  ;;  %5187 = vpow2.f32 %v1043_v26  ;;  %v6835_v37 = vadd.f32 %v6276_v50, %v6089_v14  ;;  %v6853_v59 = vpop.f32.mrb[68].mxu1 }
 0x203   :  { %v5182_v5 = vpop.eup %5181  ;;  %v1677_v33 = vsel %vm1549_vm7, %v6647_v62, %v1421_v4  ;;  %v1391_v2 = vmul.f32 1.6732632, %v4212_v9  ;;  %vm1553_vm12 = vcmp.gt.f32.partialorder %v6706_v23, 0.0  ;;  %5189 = vpow2.f32 %v1109_v46  ;;  %8131 = vst [vmem:[#allocation39_spill] sm:$0xff] %v6853_v59 }
 0x204   :  { %v6843_v61 = vadd.f32 %v6288_v42, %v5939_v36  ;;  %v1422_v31 = vmul.f32 1.6732632, %v4243_v20  ;;  %5191 = vpow2.f32 %v1049_v30  ;;  %v1051_v40 = vmul.f32 1.442695, %v888_v34  ;;  %v8133_v30 = vld [vmem:[#allocation52_spill] sm:$0xff] }
 0x205   :  { %v1898_v50 = vpack.c.bf16 %v6739_v53, %v6695_v48  ;;  %5193 = vpow2.f32 %v1111_v25  ;;  %v1117_v45 = vmul.f32 1.442695, %v921_v15  ;;  %v1884_v62 = vpack.c.bf16 %v6756_v56, %v6697_v63  ;;  %v8134_v15 = vld [vmem:[#allocation54_spill] sm:$0xff] }
 0x206   :  { %v1897_v24 = vpack.c.bf16 %v6713_v11, %v6690_v55  ;;  %v5184_v42 = vpop.eup %5183  ;;  %v1392_v26 = vmul.f32 1.6732632, %v4213_v52  ;;  %v4246_v8 = vadd.f32 -1.0, %v5182_v5  ;;  %v891_v4 = vmin.f32 %v6835_v37, 0.0  ;;  %v6890_v52 = vpop.f32.mrb[69].mxu1 }
 0x207   :  { %2276 = vmatprep.mubr.bf16.mxu0 %v1898_v50  ;;  %v1883_v48 = vpack.c.bf16 %v6720_v3, %v6692_v43  ;;  %v6858_v53 = vmul.f32 1.050701, %v1674_v0  ;;  %v6860_v9 = vmul.f32 1.050701, %v1644_v29  ;;  %v922_v63 = vmin.f32 %v6843_v61, 0.0  ;;  %2405 = vmatprep.mubr.bf16.mxu1 %v1884_v62  ;;  %v8132_v43 = vld [vmem:[#allocation51_spill] sm:$0xff] }
 0x208   :  { %v6865_v55 = vadd.f32 %v6290_v27, %v6327_v35  ;;  %2277 = vmatmul.mubr.bf16.gmra.mrb[68].mxu0 %v1897_v24  ;;  %v5186_v11 = vpop.eup %5185  ;;  %v6867_v56 = vmul.f32 1.050701, %v1677_v33  ;;  %v1647_v46 = vsel %vm1519_vm9, %v6663_v19, %v1391_v2  ;;  %5195 = vpow2.f32 %v1051_v40  ;;  %8135 = vst [vmem:[#allocation42_spill] sm:$0xff] %v6890_v52  ;;  %v6894_v2 = vpop.f32.mrb[70].mxu1 }
 0x209   :  { %2406 = vmatmul.mubr.bf16.gmra.mrb[84].mxu1 %v1883_v48  ;;  %v6874_v3 = vadd.f32 %v8132_v43, %v5933_v21  ;;  %v1678_v27 = vsel %vm1550_vm10, %v6672_v39, %v1422_v31  ;;  %v4216_v20 = vadd.f32 -1.0, %v5184_v42  ;;  %5197 = vpow2.f32 %v1117_v45  ;;  %8136 = vst [vmem:[#allocation43_spill] sm:$0xff] %v6894_v2  ;;  %v8137_v48 = vld [vmem:[#allocation55_spill] sm:$0xff] }
 0x20a   :  { %v6881_v34 = vadd.f32 %v8133_v30, %v6089_v14  ;;  %v1648_v19 = vsel %vm1520_vm11, %v6687_v6, %v1392_v26  ;;  %v1425_v0 = vmul.f32 1.6732632, %v4246_v8  ;;  %v1057_v25 = vmul.f32 1.442695, %v891_v4 }
 0x20b   :  { %v6888_v29 = vadd.f32 %v8134_v15, %v5939_v36  ;;  %vm1523_vm13 = vcmp.gt.f32.partialorder %v6718_v51, 0.0  ;;  %v4247_v39 = vadd.f32 -1.0, %v5186_v11  ;;  %v1119_v5 = vmul.f32 1.442695, %v922_v63  ;;  %v6914_v11 = vpop.f32.mrb[71].mxu1 }
 0x20c   :  { %v892_v33 = vmin.f32 %v6865_v55, 0.0  ;;  %v5188_v31 = vpop.eup %5187  ;;  %v6896_v40 = vmul.f32 1.050701, %v1647_v46  ;;  %v6898_v6 = vmul.f32 1.050701, %v1678_v27  ;;  %vm1554_vm14 = vcmp.gt.f32.partialorder %v6731_v28, 0.0 }
 0x20d   :  { %v925_v50 = vmin.f32 %v6874_v3, 0.0  ;;  %v5190_v45 = vpop.eup %5189  ;;  %v6902_v62 = vmul.f32 1.050701, %v1648_v19  ;;  %v1395_v24 = vmul.f32 1.6732632, %v4216_v20  ;;  %vm1557_vm15 = vcmp.gt.f32.partialorder %v6765_v16, 0.0 }
 0x20e   :  { %v895_v42 = vmin.f32 %v6881_v34, 0.0  ;;  %v5192_v26 = vpop.eup %5191  ;;  %v1681_v8 = vsel %vm1553_vm12, %v6706_v23, %v1425_v0  ;;  %5199 = vpow2.f32 %v1057_v25  ;;  %v926_v4 = vmin.f32 %v6888_v29, 0.0  ;;  %8138 = vst [vmem:[#allocation44_spill] sm:$0xff] %v6914_v11  ;;  %v8139_v20 = vld [vmem:[#allocation56_spill] sm:$0xff]  ;;  %v6921_v23 = vpop.f32.mrb[72].mxu1 }
 0x20f   :  { %v6912_v63 = vadd.f32 %v8137_v48, %v6327_v35  ;;  %v5194_v46 = vpop.eup %5193  ;;  %v1426_v43 = vmul.f32 1.6732632, %v4247_v39  ;;  %vm1524_vm0 = vcmp.gt.f32.partialorder %v6750_v44, 0.0  ;;  %5201 = vpow2.f32 %v1119_v5  ;;  %8140 = vst [vmem:[#allocation45_spill] sm:$0xff] %v6921_v23 }
 0x210   :  { %v1059_v27 = vmul.f32 1.442695, %v892_v33  ;;  %v6919_v30 = vadd.f32 %v8139_v20, %v5933_v21  ;;  %v4217_v19 = vadd.f32 -1.0, %v5188_v31  ;;  %v4250_v0 = vadd.f32 -1.0, %v5190_v45 }
 0x211   :  { %vm1527_vm1 = vcmp.gt.f32.partialorder %v6780_v54, 0.0  ;;  %v1125_v25 = vmul.f32 1.442695, %v925_v50  ;;  %v6924_v15 = vmul.f32 1.050701, %v1681_v8  ;;  %v4220_v48 = vadd.f32 -1.0, %v5192_v26 }
 0x212   :  { %vm1558_vm2 = vcmp.gt.f32.partialorder %v6784_v7, 0.0  ;;  %v1065_v39 = vmul.f32 1.442695, %v895_v42  ;;  %v5196_v11 = vpop.eup %5195  ;;  %v1651_v5 = vsel %vm1523_vm13, %v6718_v51, %v1395_v24  ;;  %v4251_v33 = vadd.f32 -1.0, %v5194_v46  ;;  %v8141_v26 = vld [vmem:[#allocation57_spill] sm:$0xff]  ;;  %v6939_v8 = vpop.f32.mrb[73].mxu1 }
 0x213   :  { %v1127_v20 = vmul.f32 1.442695, %v926_v4  ;;  %v896_v23 = vmin.f32 %v6912_v63, 0.0  ;;  %v5198_v31 = vpop.eup %5197  ;;  %v1682_v50 = vsel %vm1554_vm14, %v6731_v28, %v1426_v43  ;;  %5203 = vpow2.f32 %v1059_v27  ;;  %8142 = vst [vmem:[#allocation47_spill] sm:$0xff] %v6939_v8  ;;  %v8143_v24 = vld [vmem:[#allocation58_spill] sm:$0xff]  ;;  %v8144_v43 = vld [vmem:[#allocation59_spill] sm:$0xff] }
 0x214   :  { %v929_v45 = vmin.f32 %v6919_v30, 0.0  ;;  %v6937_v42 = vadd.f32 %v8141_v26, %v6089_v14  ;;  %v1396_v2 = vmul.f32 1.6732632, %v4217_v19  ;;  %v1429_v51 = vmul.f32 1.6732632, %v4250_v0  ;;  %v6951_v0 = vpop.f32.mrb[74].mxu1 }
 0x215   :  { %vm1561_vm3 = vcmp.gt.f32.partialorder %v6811_v18, 0.0  ;;  %5205 = vpow2.f32 %v1125_v25  ;;  %v6944_v4 = vadd.f32 %v8143_v24, %v5939_v36  ;;  %v1399_v46 = vmul.f32 1.6732632, %v4220_v48  ;;  %8145 = vst [vmem:[#allocation51_spill] sm:$0xff] %v6951_v0 }
 0x216   :  { %v4221_v28 = vadd.f32 -1.0, %v5196_v11  ;;  %5207 = vpow2.f32 %v1065_v39  ;;  %v6948_v27 = vadd.f32 %v8144_v43, %v6327_v35  ;;  %v1430_v26 = vmul.f32 1.6732632, %v4251_v33 }
 0x217   :  { %vm1528_vm4 = vcmp.gt.f32.partialorder %v6804_v47, 0.0  ;;  %v4254_v8 = vadd.f32 -1.0, %v5198_v31  ;;  %5209 = vpow2.f32 %v1127_v20  ;;  %v1067_v19 = vmul.f32 1.442695, %v896_v23  ;;  %v6967_v20 = vpop.f32.mrb[75].mxu1 }
 0x218   :  { %v6953_v25 = vmul.f32 1.050701, %v1651_v5  ;;  %v1133_v52 = vmul.f32 1.442695, %v929_v45  ;;  %v899_v24 = vmin.f32 %v6937_v42, 0.0  ;;  %v1902_v11 = vpack.c.bf16 %v6858_v53, %v6796_v38  ;;  %v5200_v48 = vpop.eup %5199  ;;  %8146 = vst [vmem:[#allocation52_spill] sm:$0xff] %v6967_v20 }
 0x219   :  { %v6958_v39 = vmul.f32 1.050701, %v1682_v50  ;;  %v1652_v33 = vsel %vm1524_vm0, %v6750_v44, %v1396_v2  ;;  %v1685_v23 = vsel %vm1557_vm15, %v6765_v16, %v1429_v51  ;;  %v930_v5 = vmin.f32 %v6944_v4, 0.0  ;;  %v5202_v31 = vpop.eup %5201  ;;  %v6977_v2 = vpop.f32.mrb[76].mxu1 }
 0x21a   :  { %v1655_v38 = vsel %vm1527_vm1, %v6780_v54, %v1399_v46  ;;  %v900_v53 = vmin.f32 %v6948_v27, 0.0  ;;  %2284 = vmatprep.mubr.bf16.mxu0 %v1902_v11  ;;  %v1888_v50 = vpack.c.bf16 %v6860_v9, %v6799_v58  ;;  %v1901_v44 = vpack.c.bf16 %v6806_v12, %v6758_v22  ;;  %8147 = vst [vmem:[#allocation54_spill] sm:$0xff] %v6977_v2  ;;  %v8148_v58 = vld [vmem:[#allocation22_spill] sm:$0xff] }
 0x21b   :  { %v1686_v16 = vsel %vm1558_vm2, %v6784_v7, %v1430_v26  ;;  %v1400_v45 = vmul.f32 1.6732632, %v4221_v28  ;;  %v1433_v51 = vmul.f32 1.6732632, %v4254_v8  ;;  %5211 = vpow2.f32 %v1067_v19  ;;  %v8149_v8 = vld [vmem:[#allocation60_spill] sm:$0xff] }
 0x21c   :  { %vm1531_vm5 = vcmp.gt.f32.partialorder %v6835_v37, 0.0  ;;  %vm1562_vm6 = vcmp.gt.f32.partialorder %v6843_v61, 0.0  ;;  %5213 = vpow2.f32 %v1133_v52  ;;  %v1073_v54 = vmul.f32 1.442695, %v899_v24  ;;  %2413 = vmatprep.mubr.bf16.mxu1 %v1888_v50  ;;  %2285 = vmatmul.mubr.bf16.gmra.mrb[72].mxu0 %v1901_v44  ;;  %v7001_v24 = vpop.f32.mrb[77].mxu1 }
 0x21d   :  { %v1887_v22 = vpack.c.bf16 %v6823_v32, %v6794_v10  ;;  %v6988_v12 = vadd.f32 %v8148_v58, %v5933_v21  ;;  %v4224_v9 = vadd.f32 -1.0, %v5200_v48  ;;  %v4255_v7 = vadd.f32 -1.0, %v5202_v31  ;;  %v5204_v43 = vpop.eup %5203  ;;  %v8150_v10 = vld [vmem:[#allocation61_spill] sm:$0xff]  ;;  %8151 = vst [vmem:[#allocation55_spill] sm:$0xff] %v7001_v24  ;;  %v7008_v50 = vpop.f32.mrb[78].mxu1 }
 0x21e   :  { %v1135_v46 = vmul.f32 1.442695, %v930_v5  ;;  %v6992_v28 = vadd.f32 %v8149_v8, %v6089_v14  ;;  %v6994_v26 = vmul.f32 1.050701, %v1652_v33  ;;  %v1075_v52 = vmul.f32 1.442695, %v900_v53 }
 0x21f   :  { %2414 = vmatmul.mubr.bf16.gmra.mrb[88].mxu1 %v1887_v22  ;;  %v933_v19 = vmin.f32 %v6988_v12, 0.0  ;;  %v6999_v32 = vadd.f32 %v8150_v10, %v5939_v36  ;;  %v5206_v11 = vpop.eup %5205  ;;  %v7003_v48 = vmul.f32 1.050701, %v1685_v23  ;;  %v7005_v5 = vmul.f32 1.050701, %v1655_v38  ;;  %8152 = vst [vmem:[#allocation56_spill] sm:$0xff] %v7008_v50 }
 0x220   :  { %v903_v31 = vmin.f32 %v6992_v28, 0.0  ;;  %v5208_v33 = vpop.eup %5207  ;;  %v7010_v53 = vmul.f32 1.050701, %v1686_v16  ;;  %v1656_v44 = vsel %vm1528_vm4, %v6804_v47, %v1400_v45  ;;  %v1689_v22 = vsel %vm1561_vm3, %v6811_v18, %v1433_v51  ;;  %v8153_v16 = vld [vmem:[#allocation62_spill] sm:$0xff]  ;;  %v7027_v45 = vpop.f32.mrb[79].mxu1  ;;  %v8155_v50 = vld [vmem:[#allocation64_spill] sm:$0xff] }
 0x221   :  { %vm1565_vm7 = vcmp.gt.f32.partialorder %v6874_v3, 0.0  ;;  %5215 = vpow2.f32 %v1073_v54  ;;  %v5210_v23 = vpop.eup %5209  ;;  %v1403_v38 = vmul.f32 1.6732632, %v4224_v9  ;;  %v1434_v58 = vmul.f32 1.6732632, %v4255_v7  ;;  %8154 = vst [vmem:[#allocation57_spill] sm:$0xff] %v7027_v45 }
 0x222   :  { %vm1532_vm8 = vcmp.gt.f32.partialorder %v6865_v55, 0.0  ;;  %5217 = vpow2.f32 %v1135_v46  ;;  %v7022_v8 = vadd.f32 %v8153_v16, %v6327_v35  ;;  %v4225_v10 = vadd.f32 -1.0, %v5204_v43 }
 0x223   :  { %vm1535_vm9 = vcmp.gt.f32.partialorder %v6881_v34, 0.0  ;;  %vm1566_vm10 = vcmp.gt.f32.partialorder %v6888_v29, 0.0  ;;  %5219 = vpow2.f32 %v1075_v52  ;;  %v1141_v47 = vmul.f32 1.442695, %v933_v19 }
 0x224   :  { %v934_v18 = vmin.f32 %v6999_v32, 0.0  ;;  %v4258_v51 = vadd.f32 -1.0, %v5206_v11  ;;  %v4228_v54 = vadd.f32 -1.0, %v5208_v33  ;;  %v1081_v9 = vmul.f32 1.442695, %v903_v31  ;;  %v8156_v11 = vld [vmem:[#allocation65_spill] sm:$0xff] }
 0x225   :  { %v904_v7 = vmin.f32 %v7022_v8, 0.0  ;;  %v7030_v46 = vmul.f32 1.050701, %v1656_v44  ;;  %v7032_v16 = vmul.f32 1.050701, %v1689_v22  ;;  %v4259_v43 = vadd.f32 -1.0, %v5210_v23  ;;  %v5212_v52 = vpop.eup %5211 }
 0x226   :  { %v7036_v24 = vadd.f32 %v8155_v50, %v5933_v21  ;;  %v1659_v19 = vsel %vm1531_vm5, %v6835_v37, %v1403_v38  ;;  %v1143_v45 = vmul.f32 1.442695, %v934_v18  ;;  %v7043_v31 = vadd.f32 %v8156_v11, %v6089_v14  ;;  %v8157_v33 = vld [vmem:[#allocation23_spill] sm:$0xff]  ;;  %v5214_v22 = vpop.eup %5213 }
 0x227   :  { %v7047_v44 = vadd.f32 %v8157_v33, %v5939_v36  ;;  %v1404_v23 = vmul.f32 1.6732632, %v4225_v10  ;;  %5221 = vpow2.f32 %v1141_v47  ;;  %v1083_v2 = vmul.f32 1.442695, %v904_v7 }
 0x228   :  { %v937_v50 = vmin.f32 %v7036_v24, 0.0  ;;  %v1690_v20 = vsel %vm1562_vm6, %v6843_v61, %v1434_v58  ;;  %v1437_v37 = vmul.f32 1.6732632, %v4258_v51  ;;  %v1407_v38 = vmul.f32 1.6732632, %v4228_v54  ;;  %v5037_v51 = vld [vmem:[#allocation8] sm:$0xff]  }
 0x229   :  { %5223 = vpow2.f32 %v1081_v9  ;;  %v7053_v18 = vmul.f32 1.050701, %v1659_v19  ;;  %v1438_v11 = vmul.f32 1.6732632, %v4259_v43  ;;  %vm1569_vm11 = vcmp.gt.f32.partialorder %v6919_v30, 0.0  ;;  %v8158_v43 = vld [vmem:[#allocation66_spill] sm:$0xff]  ;;  %4766 = vmatprep.subr.bf16.mxu0 %v5037_v51 }
 0x22a   :  { %v907_v33 = vmin.f32 %v7043_v31, 0.0  ;;  %v4229_v0 = vadd.f32 -1.0, %v5212_v52  ;;  %vm1536_vm12 = vcmp.gt.f32.partialorder %v6912_v63, 0.0  ;;  %v4262_v10 = vadd.f32 -1.0, %v5214_v22  ;;  %4767 = vmatpush3.bf16.msra.mxu0 %v5037_v51 }
 0x22b   :  { %5225 = vpow2.f32 %v1143_v45  ;;  %v938_v47 = vmin.f32 %v7047_v44, 0.0  ;;  %v5216_v7 = vpop.eup %5215  ;;  %v7059_v59 = vmul.f32 1.050701, %v1690_v20  ;;  %v1660_v61 = vsel %vm1532_vm8, %v6865_v55, %v1404_v23  ;;  %v5038_v55 = vld [vmem:[#allocation8 + $0x8] sm:$0xff]  }
 0x22c   :  { %5227 = vpow2.f32 %v1083_v2  ;;  %v1149_v58 = vmul.f32 1.442695, %v937_v50  ;;  %v5218_v54 = vpop.eup %5217  ;;  %v1693_v9 = vsel %vm1565_vm7, %v6874_v3, %v1437_v37  ;;  %v1663_v45 = vsel %vm1535_vm9, %v6881_v34, %v1407_v38  ;;  %4768 = vmatprep.subr.bf16.mxu0 %v5038_v55 }
 0x22d   :  { %vm1570_vm13 = vcmp.gt.f32.partialorder %v6944_v4, 0.0  ;;  %v1089_v20 = vmul.f32 1.442695, %v907_v33  ;;  %v7073_v52 = vadd.f32 %v8158_v43, %v6327_v35  ;;  %v5220_v2 = vpop.eup %5219  ;;  %v1151_v19 = vmul.f32 1.442695, %v938_v47 }
 0x22e   :  { %v1906_v22 = vpack.c.bf16 %v6958_v39, %v6898_v6  ;;  %v1892_v3 = vpack.c.bf16 %v6994_v26, %v6902_v62  ;;  %v1905_v23 = vpack.c.bf16 %v6924_v15, %v6867_v56  ;;  %v1694_v34 = vsel %vm1566_vm10, %v6888_v29, %v1438_v11  ;;  %v8159_v15 = vld [vmem:[#allocation25_spill] sm:$0xff]  ;;  %4769 = vmatpush3.bf16.msra.mxu0 %v5038_v55 }
 0x22f   :  { %v1408_v50 = vmul.f32 1.6732632, %v4229_v0  ;;  %v1441_v37 = vmul.f32 1.6732632, %v4262_v10  ;;  %vm1539_vm14 = vcmp.gt.f32.partialorder %v6937_v42, 0.0  ;;  %v908_v38 = vmin.f32 %v7073_v52, 0.0 }
 0x230   :  { %v4232_v33 = vadd.f32 -1.0, %v5216_v7  ;;  %v4263_v6 = vadd.f32 -1.0, %v5218_v54  ;;  %vm1540_vm15 = vcmp.gt.f32.partialorder %v6948_v27, 0.0  ;;  %5229 = vpow2.f32 %v1149_v58  ;;  %2292 = vmatprep.mubr.bf16.mxu0 %v1906_v22  ;;  %2421 = vmatprep.mubr.bf16.mxu1 %v1892_v3  ;;  %v8160_v10 = vld [vmem:[#allocation69_spill] sm:$0xff]  ;;  %v8161_v58 = vld [vmem:[#allocation68_spill] sm:$0xff]  ;;  %v8162_v22 = vld [vmem:[#allocation70_spill] sm:$0xff] }
 0x231   :  { %v1891_v56 = vpack.c.bf16 %v6953_v25, %v6896_v40  ;;  %v7089_v62 = vmul.f32 1.050701, %v1660_v61  ;;  %v4233_v29 = vadd.f32 -1.0, %v5220_v2  ;;  %5231 = vpow2.f32 %v1089_v20  ;;  %2293 = vmatmul.mubr.bf16.gmra.mrb[76].mxu0 %v1905_v23  ;;  %v5222_v39 = vpop.eup %5221 }
 0x232   :  { %v7093_v0 = vadd.f32 %v8159_v15, %v5933_v21  ;;  %v7095_v26 = vmul.f32 1.050701, %v1693_v9  ;;  %v7097_v11 = vmul.f32 1.050701, %v1663_v45  ;;  %5233 = vpow2.f32 %v1151_v19 }
 0x233   :  { %2422 = vmatmul.mubr.bf16.gmra.mrb[92].mxu1 %v1891_v56  ;;  %v7101_v40 = vadd.f32 %v8160_v10, %v5939_v36  ;;  %v5224_v25 = vpop.eup %5223  ;;  %v7103_v47 = vmul.f32 1.050701, %v1694_v34  ;;  %vm1573_vm0 = vcmp.gt.f32.partialorder %v6988_v12, 0.0  ;;  %v1091_v7 = vmul.f32 1.442695, %v908_v38 }
 0x234   :  { %v941_v61 = vmin.f32 %v7093_v0, 0.0  ;;  %v7109_v51 = vadd.f32 %v8161_v58, %v6089_v14  ;;  %v1664_v54 = vsel %vm1536_vm12, %v6912_v63, %v1408_v50  ;;  %v1697_v9 = vsel %vm1569_vm11, %v6919_v30, %v1441_v37  ;;  %v8163_v30 = vld [vmem:[#allocation71_spill] sm:$0xff] }
 0x235   :  { %v1411_v45 = vmul.f32 1.6732632, %v4232_v33  ;;  %v1442_v20 = vmul.f32 1.6732632, %v4263_v6  ;;  %v5226_v43 = vpop.eup %5225  ;;  %v1412_v2 = vmul.f32 1.6732632, %v4233_v29  ;;  %v7121_v55 = vadd.f32 %v8162_v22, %v6327_v35 }
 0x236   :  { %v4266_v19 = vadd.f32 -1.0, %v5222_v39  ;;  %vm1543_vm1 = vcmp.gt.f32.partialorder %v6992_v28, 0.0  ;;  %vm1574_vm2 = vcmp.gt.f32.partialorder %v6999_v32, 0.0  ;;  %v5228_v3 = vpop.eup %5227  ;;  %v4236_v23 = vadd.f32 -1.0, %v5224_v25  ;;  %v8164_v25 = vld [vmem:[#allocation26_spill] sm:$0xff] }
 0x237   :  { %v1157_v63 = vmul.f32 1.442695, %v941_v61  ;;  %v942_v34 = vmin.f32 %v7101_v40, 0.0  ;;  %v7126_v50 = vadd.f32 %v8163_v30, %v5933_v21  ;;  %v7128_v37 = vmul.f32 1.050701, %v1664_v54 }
 0x238   :  { %v7130_v38 = vmul.f32 1.050701, %v1697_v9  ;;  %5235 = vpow2.f32 %v1091_v7  ;;  %v911_v33 = vmin.f32 %v7109_v51, 0.0  ;;  %v1667_v6 = vsel %vm1539_vm14, %v6937_v42, %v1411_v45 }
 0x239   :  { %v1698_v56 = vsel %vm1570_vm13, %v6944_v4, %v1442_v20  ;;  %v4267_v29 = vadd.f32 -1.0, %v5226_v43  ;;  %vm1544_vm3 = vcmp.gt.f32.partialorder %v7022_v8, 0.0  ;;  %v1159_v21 = vmul.f32 1.442695, %v942_v34 }
 0x23a   :  { %v1668_v15 = vsel %vm1540_vm15, %v6948_v27, %v1412_v2  ;;  %v4237_v39 = vadd.f32 -1.0, %v5228_v3  ;;  %v912_v10 = vmin.f32 %v7121_v55, 0.0  ;;  %v7146_v7 = vadd.f32 %v8164_v25, %v6089_v14  ;;  %v5230_v42 = vpop.eup %5229 }
 0x23b   :  { %v1445_v61 = vmul.f32 1.6732632, %v4266_v19  ;;  %v1415_v58 = vmul.f32 1.6732632, %v4236_v23  ;;  %5237 = vpow2.f32 %v1157_v63  ;;  %v945_v4 = vmin.f32 %v7126_v50, 0.0  ;;  %v5232_v54 = vpop.eup %5231  ;;  %v8165_v19 = vld [vmem:[#allocation27_spill] sm:$0xff] }
 0x23c   :  { %v7149_v9 = vmul.f32 1.050701, %v1667_v6  ;;  %v1097_v45 = vmul.f32 1.442695, %v911_v33  ;;  %5239 = vpow2.f32 %v1159_v21  ;;  %v1099_v20 = vmul.f32 1.442695, %v912_v10  ;;  %v5234_v27 = vpop.eup %5233 }
 0x23d   :  { %v7151_v43 = vmul.f32 1.050701, %v1698_v56  ;;  %v1446_v2 = vmul.f32 1.6732632, %v4267_v29  ;;  %vm1577_vm4 = vcmp.gt.f32.partialorder %v7036_v24, 0.0  ;;  %vm1578_vm5 = vcmp.gt.f32.partialorder %v7047_v44, 0.0 }
 0x23e   :  { %v1165_v22 = vmul.f32 1.442695, %v945_v4  ;;  %v7157_v3 = vadd.f32 %v8165_v19, %v5939_v36  ;;  %v7159_v23 = vmul.f32 1.050701, %v1668_v15  ;;  %v1416_v63 = vmul.f32 1.6732632, %v4237_v39 }
 0x23f   :  { %5241 = vpow2.f32 %v1099_v20  ;;  %v915_v34 = vmin.f32 %v7146_v7, 0.0  ;;  %v1701_v30 = vsel %vm1573_vm0, %v6988_v12, %v1445_v61  ;;  %v1671_v33 = vsel %vm1543_vm1, %v6992_v28, %v1415_v58  ;;  %v8166_v12 = vld [vmem:[#allocation28_spill] sm:$0xff] }
 0x240   :  { %v4270_v6 = vadd.f32 -1.0, %v5230_v42  ;;  %v4240_v56 = vadd.f32 -1.0, %v5232_v54  ;;  %vm1547_vm6 = vcmp.gt.f32.partialorder %v7043_v31, 0.0  ;;  %v4271_v36 = vadd.f32 -1.0, %v5234_v27 }
 0x241   :  { %5243 = vpow2.f32 %v1097_v45  ;;  %v1105_v29 = vmul.f32 1.442695, %v915_v34  ;;  %v946_v21 = vmin.f32 %v7157_v3, 0.0  ;;  %v1702_v15 = vsel %vm1574_vm2, %v6999_v32, %v1446_v2 }
 0x242   :  { %5245 = vpow2.f32 %v1165_v22  ;;  %v7175_v39 = vadd.f32 %v8166_v12, %v6327_v35  ;;  %v1910_v28 = vpack.c.bf16 %v7059_v59, %v7010_v53  ;;  %v5236_v10 = vpop.eup %5235  ;;  %v1672_v25 = vsel %vm1544_vm3, %v7022_v8, %v1416_v63  ;;  %v8167_v53 = vld [vmem:[#allocation29_spill] sm:$0xff] }
 0x243   :  { %v1167_v42 = vmul.f32 1.442695, %v946_v21  ;;  %v1896_v61 = vpack.c.bf16 %v7089_v62, %v7030_v46  ;;  %v1909_v32 = vpack.c.bf16 %v7032_v16, %v7003_v48  ;;  %v1449_v58 = vmul.f32 1.6732632, %v4270_v6  ;;  %v8168_v16 = vld [vmem:[#allocation73_spill] sm:$0xff] }
 0x244   :  { %v1419_v4 = vmul.f32 1.6732632, %v4240_v56  ;;  %5247 = vpow2.f32 %v1105_v29  ;;  %v916_v54 = vmin.f32 %v7175_v39, 0.0  ;;  %2300 = vmatprep.mubr.bf16.mxu0 %v1910_v28  ;;  %v1450_v45 = vmul.f32 1.6732632, %v4271_v36  ;;  %v8170_v28 = vld [vmem:[#allocation75_spill] sm:$0xff] }
 0x245   :  { %5249 = vpow2.f32 %v1167_v42  ;;  %2429 = vmatprep.mubr.bf16.mxu1 %v1896_v61  ;;  %2301 = vmatmul.mubr.bf16.gmra.mrb[80].mxu0 %v1909_v32  ;;  %v1895_v59 = vpack.c.bf16 %v7053_v18, %v7005_v5  ;;  %v7191_v8 = vadd.f32 %v8167_v53, %v6089_v14  ;;  %v5238_v46 = vpop.eup %5237  ;;  %v4241_v62 = vadd.f32 -1.0, %v5236_v10  ;;  %v8169_v18 = vld [vmem:[#allocation30_spill] sm:$0xff] }
 0x246   :  { %vm1548_vm7 = vcmp.gt.f32.partialorder %v7073_v52, 0.0  ;;  %v1107_v48 = vmul.f32 1.442695, %v916_v54  ;;  %v7196_v20 = vadd.f32 %v8168_v16, %v6327_v35  ;;  %v5240_v27 = vpop.eup %5239  ;;  %v7198_v2 = vmul.f32 1.050701, %v1701_v30 }
 0x247   :  { %v7200_v22 = vmul.f32 1.050701, %v1671_v33  ;;  %2430 = vmatmul.mubr.bf16.gmra.mrb[96].mxu1 %v1895_v59  ;;  %v919_v5 = vmin.f32 %v7191_v8, 0.0  ;;  %v7205_v19 = vadd.f32 %v8169_v18, %v6089_v14  ;;  %v7207_v63 = vmul.f32 1.050701, %v1702_v15 }
 0x248   :  { %v7209_v34 = vmul.f32 1.050701, %v1672_v25  ;;  %v4275_v6 = vadd.f32 -1.0, %v5240_v27  ;;  %5251 = vpow2.f32 %v1107_v48  ;;  %v1705_v30 = vsel %vm1577_vm4, %v7036_v24, %v1449_v58 }
 0x249   :  { %v5242_v56 = vpop.eup %5241  ;;  %v1675_v33 = vsel %vm1547_vm6, %v7043_v31, %v1419_v4  ;;  %v1706_v36 = vsel %vm1578_vm5, %v7047_v44, %v1450_v45  ;;  %v1914_v29 = vpack.c.bf16 %v7151_v43, %v7103_v47  ;;  %v1420_v21 = vmul.f32 1.6732632, %v4241_v62 }
 0x24a   :  { %v4274_v15 = vadd.f32 -1.0, %v5238_v46  ;;  %v920_v12 = vmin.f32 %v7196_v20, 0.0  ;;  %v7225_v10 = vadd.f32 %v8170_v28, %v6327_v35  ;;  %vm1581_vm8 = vcmp.gt.f32.partialorder %v7093_v0, 0.0 }
 0x24b   :  { %v5244_v24 = vpop.eup %5243  ;;  %v1454_v25 = vmul.f32 1.6732632, %v4275_v6  ;;  %v1113_v31 = vmul.f32 1.442695, %v919_v5  ;;  %v923_v42 = vmin.f32 %v7205_v19, 0.0  ;;  %2308 = vmatprep.mubr.bf16.mxu0 %v1914_v29  ;;  %vm1582_vm9 = vcmp.gt.f32.partialorder %v7101_v40, 0.0 }
 0x24c   :  { %v5246_v44 = vpop.eup %5245  ;;  %v7229_v61 = vmul.f32 1.050701, %v1705_v30  ;;  %v7231_v47 = vmul.f32 1.050701, %v1675_v33  ;;  %v4245_v43 = vadd.f32 -1.0, %v5242_v56  ;;  %vm1585_vm10 = vcmp.gt.f32.partialorder %v7126_v50, 0.0 }
 0x24d   :  { %v1834_v32 = vmul.f32 1.050701, %v1706_v36  ;;  %vm1586_vm11 = vcmp.gt.f32.partialorder %v7157_v3, 0.0  ;;  %v1121_v58 = vmul.f32 1.442695, %v923_v42  ;;  %v1900_v4 = vpack.c.bf16 %v7159_v23, %v7128_v37  ;;  %v8171_v56 = vld [vmem:[#allocation31_spill] sm:$0xff] }
 0x24e   :  { %v5248_v54 = vpop.eup %5247  ;;  %v1676_v45 = vsel %vm1548_vm7, %v7073_v52, %v1420_v21  ;;  %v1453_v59 = vmul.f32 1.6732632, %v4274_v15  ;;  %vm1552_vm12 = vcmp.gt.f32.partialorder %v7121_v55, 0.0  ;;  %v1115_v53 = vmul.f32 1.442695, %v920_v12  ;;  %v5039_v52 = vld [vmem:[#allocation8 + $0x10] sm:$0xff]  }
 0x24f   :  { %v924_v46 = vmin.f32 %v7225_v10, 0.0  ;;  %v5250_v62 = vpop.eup %5249  ;;  %v4244_v48 = vadd.f32 -1.0, %v5244_v24  ;;  %v1710_v16 = vsel %vm1582_vm9, %v7101_v40, %v1454_v25  ;;  %v4278_v27 = vadd.f32 -1.0, %v5246_v44  ;;  %2437 = vmatprep.mubr.bf16.mxu1 %v1900_v4  ;;  %v8172_v40 = vld [vmem:[#allocation76_spill] sm:$0xff]  ;;  %4770 = vmatprep.subr.bf16.mxu0 %v5039_v52  ;;  %v8174_v15 = vld [vmem:[#allocation78_spill] sm:$0xff] }
 0x250   :  { %5253 = vpow2.f32 %v1113_v31  ;;  %v1424_v5 = vmul.f32 1.6732632, %v4245_v43  ;;  %v4279_v37 = vadd.f32 -1.0, %v5250_v62  ;;  %v1913_v23 = vpack.c.bf16 %v7130_v38, %v7095_v26  ;;  %v8173_v26 = vld [vmem:[#allocation77_spill] sm:$0xff]  ;;  %4771 = vmatpush3.bf16.msra.mxu0 %v5039_v52 }
 0x251   :  { %5255 = vpow2.f32 %v1121_v58  ;;  %vm1551_vm13 = vcmp.gt.f32.partialorder %v7109_v51, 0.0  ;;  %v1123_v18 = vmul.f32 1.442695, %v924_v46  ;;  %v1899_v6 = vpack.c.bf16 %v7149_v9, %v7097_v11 }
 0x252   :  { %v7251_v30 = vadd.f32 %v8171_v56, %v6089_v14  ;;  %v7255_v33 = vadd.f32 %v8172_v40, %v6327_v35  ;;  %v5252_v36 = vpop.eup %5251  ;;  %v4248_v29 = vadd.f32 -1.0, %v5248_v54  ;;  %v1458_v21 = vmul.f32 1.6732632, %v4279_v37  ;;  %2309 = vmatmul.mubr.bf16.gmra.mrb[84].mxu0 %v1913_v23 }
 0x253   :  { %5257 = vpow2.f32 %v1115_v53  ;;  %v7259_v38 = vadd.f32 %v8173_v26, %v6089_v14  ;;  %vm1555_vm14 = vcmp.gt.f32.partialorder %v7146_v7, 0.0  ;;  %v4249_v11 = vadd.f32 -1.0, %v5252_v36  ;;  %2438 = vmatmul.mubr.bf16.gmra.mrb[100].mxu1 %v1899_v6  ;;  %v8177_v36 = vld [vmem:[#allocation79_spill] sm:$0xff] }
 0x254   :  { %5259 = vpow2.f32 %v1123_v18  ;;  %v927_v9 = vmin.f32 %v7251_v30, 0.0  ;;  %v7265_v12 = vadd.f32 %v8174_v15, %v6327_v35  ;;  %v1804_v28 = vmul.f32 1.050701, %v1676_v45 }
 0x255   :  { %v1457_v24 = vmul.f32 1.6732632, %v4278_v27  ;;  %vm1556_vm15 = vcmp.gt.f32.partialorder %v7175_v39, 0.0  ;;  %v928_v25 = vmin.f32 %v7255_v33, 0.0  ;;  %v1714_v31 = vsel %vm1586_vm11, %v7157_v3, %v1458_v21 }
 0x256   :  { %v1428_v42 = vmul.f32 1.6732632, %v4249_v11  ;;  %v1129_v44 = vmul.f32 1.442695, %v927_v9  ;;  %v1918_v43 = vpack.c.bf16 %v1834_v32, %v7207_v63  ;;  %v1709_v58 = vsel %vm1581_vm8, %v7093_v0, %v1453_v59 }
 0x257   :  { %v1423_v4 = vmul.f32 1.6732632, %v4244_v48  ;;  %v1838_v54 = vmul.f32 1.050701, %v1710_v16  ;;  %v931_v45 = vmin.f32 %v7259_v38, 0.0  ;;  %v1680_v53 = vsel %vm1552_vm12, %v7121_v55, %v1424_v5 }
 0x258   :  { %v1427_v46 = vmul.f32 1.6732632, %v4248_v29  ;;  %v1684_v62 = vsel %vm1556_vm15, %v7175_v39, %v1428_v42  ;;  %v932_v3 = vmin.f32 %v7265_v12, 0.0  ;;  %2316 = vmatprep.mubr.bf16.mxu0 %v1918_v43  ;;  %v1713_v63 = vsel %vm1585_vm10, %v7126_v50, %v1457_v24 }
 0x259   :  { %v1842_v32 = vmul.f32 1.050701, %v1714_v31  ;;  %v1131_v0 = vmul.f32 1.442695, %v928_v25  ;;  %v1137_v59 = vmul.f32 1.442695, %v931_v45  ;;  %5261 = vpow2.f32 %v1129_v44 }
 0x25a   :  { %v5254_v48 = vpop.eup %5253  ;;  %v1812_v16 = vmul.f32 1.050701, %v1684_v62  ;;  %v1139_v27 = vmul.f32 1.442695, %v932_v3  ;;  %v1904_v37 = vpack.c.bf16 %v1804_v28, %v7209_v34  ;;  %v1837_v5 = vmul.f32 1.050701, %v1709_v58 }
 0x25b   :  { %v5256_v55 = vpop.eup %5255  ;;  %v1679_v39 = vsel %vm1551_vm13, %v7109_v51, %v1423_v4  ;;  %5263 = vpow2.f32 %v1137_v59  ;;  %v1917_v23 = vpack.c.bf16 %v7229_v61, %v7198_v2  ;;  %v1808_v50 = vmul.f32 1.050701, %v1680_v53  ;;  %v8175_v51 = vld [vmem:[#allocation36_spill] sm:$0xff]  ;;  %v8176_v2 = vld [vmem:[#allocation37_spill] sm:$0xff]  ;;  %v8179_v59 = vld [vmem:[#allocation38_spill] sm:$0xff] }
 0x25c   :  { %v1841_v52 = vmul.f32 1.050701, %v1713_v63  ;;  %5265 = vpow2.f32 %v1139_v27  ;;  %2445 = vmatprep.mubr.bf16.mxu1 %v1904_v37  ;;  %v1903_v18 = vpack.c.bf16 %v7231_v47, %v7200_v22  ;;  %v1683_v34 = vsel %vm1555_vm14, %v7146_v7, %v1427_v46  ;;  %v8178_v47 = vld [vmem:[#allocation80_spill] sm:$0xff]  ;;  %v8181_v27 = vld [vmem:[#allocation41_spill] sm:$0xff] }
 0x25d   :  { %v5258_v6 = vpop.eup %5257  ;;  %5267 = vpow2.f32 %v1131_v0  ;;  %2317 = vmatmul.mubr.bf16.gmra.mrb[88].mxu0 %v1917_v23  ;;  %v7298_v56 = vadd.f32 %v8175_v51, %v6089_v14  ;;  %v7302_v61 = vadd.f32 %v8176_v2, %v6327_v35  ;;  %v7306_v22 = vadd.f32 %v8177_v36, %v6089_v14 }
 0x25e   :  { %v5260_v40 = vpop.eup %5259  ;;  %2446 = vmatmul.mubr.bf16.gmra.mrb[104].mxu1 %v1903_v18  ;;  %v7310_v29 = vadd.f32 %v8178_v47, %v6327_v35  ;;  %v1922_v7 = vpack.c.bf16 %v1842_v32, %v1838_v54  ;;  %v1908_v21 = vpack.c.bf16 %v1812_v16, %v1808_v50  ;;  %v4252_v26 = vadd.f32 -1.0, %v5254_v48  ;;  %v8180_v16 = vld [vmem:[#allocation34_spill] sm:$0xff] }
 0x25f   :  { %v4256_v11 = vadd.f32 -1.0, %v5256_v55  ;;  %v4257_v9 = vadd.f32 -1.0, %v5260_v40  ;;  %v935_v15 = vmin.f32 %v7298_v56, 0.0  ;;  %v1811_v28 = vmul.f32 1.050701, %v1683_v34 }
 0x260   :  { %v4253_v24 = vadd.f32 -1.0, %v5258_v6  ;;  %v936_v25 = vmin.f32 %v7302_v61, 0.0  ;;  %v939_v31 = vmin.f32 %v7306_v22, 0.0  ;;  %2324 = vmatprep.mubr.bf16.mxu0 %v1922_v7  ;;  %2453 = vmatprep.mubr.bf16.mxu1 %v1908_v21  ;;  %v1807_v42 = vmul.f32 1.050701, %v1679_v39 }
 0x261   :  { %vm1559_vm0 = vcmp.gt.f32.partialorder %v7191_v8, 0.0  ;;  %v1145_v44 = vmul.f32 1.442695, %v935_v15  ;;  %v940_v43 = vmin.f32 %v7310_v29, 0.0  ;;  %v1436_v58 = vmul.f32 1.6732632, %v4257_v9 }
 0x262   :  { %v1147_v4 = vmul.f32 1.442695, %v936_v25  ;;  %v1153_v54 = vmul.f32 1.442695, %v939_v31  ;;  %v1921_v45 = vpack.c.bf16 %v1841_v52, %v1837_v5  ;;  %v1431_v53 = vmul.f32 1.6732632, %v4252_v26 }
 0x263   :  { %v1435_v46 = vmul.f32 1.6732632, %v4256_v11  ;;  %5269 = vpow2.f32 %v1145_v44  ;;  %v1155_v62 = vmul.f32 1.442695, %v940_v43  ;;  %v5262_v3 = vpop.eup %5261  ;;  %v1432_v63 = vmul.f32 1.6732632, %v4253_v24 }
 0x264   :  { %vm1560_vm1 = vcmp.gt.f32.partialorder %v7196_v20, 0.0  ;;  %5271 = vpow2.f32 %v1147_v4  ;;  %v1907_v32 = vpack.c.bf16 %v1811_v28, %v1807_v42  ;;  %vm1564_vm2 = vcmp.gt.f32.partialorder %v7225_v10, 0.0  ;;  %v8182_v31 = vld [vmem:[#allocation33_spill] sm:$0xff]  ;;  %v8183_v42 = vld [vmem:[#allocation40_spill] sm:$0xff] }
 0x265   :  { %v5264_v0 = vpop.eup %5263  ;;  %5273 = vpow2.f32 %v1153_v54  ;;  %2325 = vmatmul.mubr.bf16.gmra.mrb[92].mxu0 %v1921_v45  ;;  %v7321_v48 = vadd.f32 %v8179_v59, %v6089_v14  ;;  %v1926_v37 = vpack.c.bf16 %v8181_v27, %v8180_v16  ;;  %vm1563_vm3 = vcmp.gt.f32.partialorder %v7205_v19, 0.0 }
 0x266   :  { %v5266_v55 = vpop.eup %5265  ;;  %v1692_v5 = vsel %vm1564_vm2, %v7225_v10, %v1436_v58  ;;  %5275 = vpow2.f32 %v1155_v62  ;;  %2454 = vmatmul.mubr.bf16.gmra.mrb[108].mxu1 %v1907_v32  ;;  %v7329_v39 = vadd.f32 %v6744_v57, %v6327_v35  ;;  %v1687_v50 = vsel %vm1559_vm0, %v7191_v8, %v1431_v53  ;;  %v8184_v53 = vld [vmem:[#allocation48_spill] sm:$0xff] }
 0x267   :  { %v5268_v23 = vpop.eup %5267  ;;  %v1691_v52 = vsel %vm1563_vm3, %v7205_v19, %v1435_v46  ;;  %vm1572_vm4 = vcmp.gt.f32.partialorder %v7265_v12, 0.0  ;;  %v943_v18 = vmin.f32 %v7321_v48, 0.0  ;;  %2332 = vmatprep.mubr.bf16.mxu0 %v1926_v37  ;;  %v1688_v10 = vsel %vm1560_vm1, %v7196_v20, %v1432_v63  ;;  %v8185_v46 = vld [vmem:[#allocation50_spill] sm:$0xff] }
 0x268   :  { %v4260_v6 = vadd.f32 -1.0, %v5262_v3  ;;  %vm1567_vm5 = vcmp.gt.f32.partialorder %v7251_v30, 0.0  ;;  %vm1571_vm6 = vcmp.gt.f32.partialorder %v7259_v38, 0.0  ;;  %v4265_v57 = vadd.f32 -1.0, %v5266_v55 }
 0x269   :  { %v944_v34 = vmin.f32 %v7329_v39, 0.0  ;;  %v1820_v8 = vmul.f32 1.050701, %v1692_v5  ;;  %vm1568_vm7 = vcmp.gt.f32.partialorder %v7255_v33, 0.0  ;;  %v4264_v19 = vadd.f32 -1.0, %v5264_v0 }
 0x26a   :  { %v1161_v51 = vmul.f32 1.442695, %v943_v18  ;;  %v7346_v2 = vadd.f32 %v6754_v60, %v6089_v14  ;;  %v1819_v40 = vmul.f32 1.050701, %v1691_v52  ;;  %v4261_v36 = vadd.f32 -1.0, %v5268_v23 }
 0x26b   :  { %v1163_v20 = vmul.f32 1.442695, %v944_v34  ;;  %v7350_v47 = vadd.f32 %v6786_v13, %v6327_v35  ;;  %v1815_v7 = vmul.f32 1.050701, %v1687_v50  ;;  %v1816_v21 = vmul.f32 1.050701, %v1688_v10 }
 0x26c   :  { %5277 = vpow2.f32 %v1161_v51  ;;  %v947_v26 = vmin.f32 %v7346_v2, 0.0  ;;  %v1439_v11 = vmul.f32 1.6732632, %v4260_v6  ;;  %v1444_v9 = vmul.f32 1.6732632, %v4265_v57 }
 0x26d   :  { %5279 = vpow2.f32 %v1163_v20  ;;  %v948_v15 = vmin.f32 %v7350_v47, 0.0  ;;  %v5270_v28 = vpop.eup %5269  ;;  %v1443_v60 = vmul.f32 1.6732632, %v4264_v19  ;;  %v1912_v25 = vpack.c.bf16 %v1820_v8, %v1816_v21  ;;  %v8186_v21 = vld [vmem:[#allocation46_spill] sm:$0xff] }
 0x26e   :  { %v1169_v24 = vmul.f32 1.442695, %v947_v26  ;;  %v1925_v44 = vpack.c.bf16 %v8183_v42, %v8182_v31  ;;  %v5272_v43 = vpop.eup %5271  ;;  %v1440_v13 = vmul.f32 1.6732632, %v4261_v36  ;;  %v1911_v4 = vpack.c.bf16 %v1819_v40, %v1815_v7  ;;  %v8187_v26 = vld [vmem:[#allocation49_spill] sm:$0xff]  ;;  %v8190_v31 = vld [vmem:[#allocation24_spill] sm:$0xff] }
 0x26f   :  { %v1171_v58 = vmul.f32 1.442695, %v948_v15  ;;  %v7358_v54 = vadd.f32 %v6792_v49, %v6089_v14  ;;  %v5274_v45 = vpop.eup %5273  ;;  %vm1576_vm8 = vcmp.gt.f32.partialorder %v7302_v61, 0.0  ;;  %vm1580_vm9 = vcmp.gt.f32.partialorder %v7310_v29, 0.0  ;;  %2461 = vmatprep.mubr.bf16.mxu1 %v1912_v25  ;;  %v8189_v25 = vld [vmem:[#allocation63_spill] sm:$0xff] }
 0x270   :  { %5281 = vpow2.f32 %v1169_v24  ;;  %2333 = vmatmul.mubr.bf16.gmra.mrb[96].mxu0 %v1925_v44  ;;  %v1930_v62 = vpack.c.bf16 %v8185_v46, %v8184_v53  ;;  %v7366_v3 = vadd.f32 %v6817_v41, %v6327_v35  ;;  %v5276_v63 = vpop.eup %5275  ;;  %v1700_v49 = vsel %vm1572_vm4, %v7265_v12, %v1444_v9  ;;  %2462 = vmatmul.mubr.bf16.gmra.mrb[112].mxu1 %v1911_v4 }
 0x271   :  { %v4269_v32 = vadd.f32 -1.0, %v5272_v43  ;;  %5283 = vpow2.f32 %v1171_v58  ;;  %v951_v0 = vmin.f32 %v7358_v54, 0.0  ;;  %v1695_v59 = vsel %vm1567_vm5, %v7251_v30, %v1439_v11  ;;  %v8191_v43 = vld [vmem:[#allocation42_spill] sm:$0xff] }
 0x272   :  { %v1699_v16 = vsel %vm1571_vm6, %v7259_v38, %v1443_v60  ;;  %v4273_v41 = vadd.f32 -1.0, %v5276_v63  ;;  %2340 = vmatprep.mubr.bf16.mxu0 %v1930_v62  ;;  %v952_v27 = vmin.f32 %v7366_v3, 0.0  ;;  %v1696_v12 = vsel %vm1568_vm7, %v7255_v33, %v1440_v13 }
 0x273   :  { %v4268_v37 = vadd.f32 -1.0, %v5270_v28  ;;  %vm1575_vm10 = vcmp.gt.f32.partialorder %v7298_v56, 0.0  ;;  %v4272_v55 = vadd.f32 -1.0, %v5274_v45  ;;  %v1177_v5 = vmul.f32 1.442695, %v951_v0  ;;  %v8192_v0 = vld [vmem:[#allocation43_spill] sm:$0xff] }
 0x274   :  { %v1828_v23 = vmul.f32 1.050701, %v1700_v49  ;;  %vm1579_vm11 = vcmp.gt.f32.partialorder %v7306_v22, 0.0  ;;  %v1452_v30 = vmul.f32 1.6732632, %v4273_v41  ;;  %v7386_v18 = vadd.f32 %v6821_v1, %v6089_v14 }
 0x275   :  { %v1179_v50 = vmul.f32 1.442695, %v952_v27  ;;  %v1827_v52 = vmul.f32 1.050701, %v1699_v16  ;;  %v1448_v38 = vmul.f32 1.6732632, %v4269_v32  ;;  %5285 = vpow2.f32 %v1177_v5 }
 0x276   :  { %v5278_v10 = vpop.eup %5277  ;;  %v1823_v6 = vmul.f32 1.050701, %v1695_v59  ;;  %v1824_v33 = vmul.f32 1.050701, %v1696_v12  ;;  %v7390_v57 = vadd.f32 %v6847_v17, %v6327_v35  ;;  %v1447_v8 = vmul.f32 1.6732632, %v4268_v37 }
 0x277   :  { %5287 = vpow2.f32 %v1179_v50  ;;  %v5280_v34 = vpop.eup %5279  ;;  %v1451_v19 = vmul.f32 1.6732632, %v4272_v55  ;;  %vm1583_vm12 = vcmp.gt.f32.partialorder %v7321_v48, 0.0  ;;  %v955_v51 = vmin.f32 %v7386_v18, 0.0  ;;  %v8193_v12 = vld [vmem:[#allocation44_spill] sm:$0xff] }
 0x278   :  { %v1708_v1 = vsel %vm1580_vm9, %v7310_v29, %v1452_v30  ;;  %v4276_v40 = vadd.f32 -1.0, %v5278_v10  ;;  %v956_v36 = vmin.f32 %v7390_v57, 0.0  ;;  %v1916_v20 = vpack.c.bf16 %v1828_v23, %v1824_v33  ;;  %v8188_v29 = vld [vmem:[#allocation39_spill] sm:$0xff] }
 0x279   :  { %v1704_v17 = vsel %vm1576_vm8, %v7302_v61, %v1448_v38  ;;  %vm1584_vm13 = vcmp.gt.f32.partialorder %v7329_v39, 0.0  ;;  %v1185_v7 = vmul.f32 1.442695, %v955_v51  ;;  %v1929_v11 = vpack.c.bf16 %v8187_v26, %v8186_v21  ;;  %v8194_v51 = vld [vmem:[#allocation53_spill] sm:$0xff]  ;;  %v7455_v21 = vpop.f32.mrb[48].mxu0 }
 0x27a   :  { %v1915_v9 = vpack.c.bf16 %v1827_v52, %v1823_v6  ;;  %v5282_v15 = vpop.eup %5281  ;;  %v4277_v28 = vadd.f32 -1.0, %v5280_v34  ;;  %v1187_v60 = vmul.f32 1.442695, %v956_v36  ;;  %2469 = vmatprep.mubr.bf16.mxu1 %v1916_v20  ;;  %v7406_v24 = vadd.f32 %v8188_v29, %v6089_v14  ;;  %v5040_v52 = vld [vmem:[#allocation8 + $0x18] sm:$0xff]   ;;  %v7462_v29 = vpop.f32.mrb[49].mxu0 }
 0x27b   :  { %v1934_v42 = vpack.c.bf16 %v8190_v31, %v8189_v25  ;;  %v5284_v44 = vpop.eup %5283  ;;  %v1836_v61 = vmul.f32 1.050701, %v1708_v1  ;;  %vm1588_vm14 = vcmp.gt.f32.partialorder %v7350_v47, 0.0  ;;  %5289 = vpow2.f32 %v1185_v7  ;;  %2341 = vmatmul.mubr.bf16.gmra.mrb[100].mxu0 %v1929_v11  ;;  %4772 = vmatprep.subr.bf16.mxu0 %v5040_v52  ;;  %v8195_v1 = vld [vmem:[#allocation67_spill] sm:$0xff] }
 0x27c   :  { %2470 = vmatmul.mubr.bf16.gmra.mrb[116].mxu1 %v1915_v9  ;;  %v7413_v13 = vadd.f32 %v8191_v43, %v6327_v35  ;;  %v1703_v58 = vsel %vm1575_vm10, %v7298_v56, %v1447_v8  ;;  %v1455_v4 = vmul.f32 1.6732632, %v4276_v40  ;;  %vm1587_vm15 = vcmp.gt.f32.partialorder %v7346_v2, 0.0  ;;  %4773 = vmatpush3.bf16.msra.mxu0 %v5040_v52 }
 0x27d   :  { %v4281_v45 = vadd.f32 -1.0, %v5284_v44  ;;  %5291 = vpow2.f32 %v1187_v60  ;;  %2348 = vmatprep.mubr.bf16.mxu0 %v1934_v42  ;;  %v1832_v53 = vmul.f32 1.050701, %v1704_v17  ;;  %v1707_v46 = vsel %vm1579_vm11, %v7306_v22, %v1451_v19  ;;  %v8196_v17 = vld [vmem:[#allocation45_spill] sm:$0xff] }
 0x27e   :  { %v4280_v62 = vadd.f32 -1.0, %v5282_v15  ;;  %v959_v63 = vmin.f32 %v7406_v24, 0.0  ;;  %v1456_v49 = vmul.f32 1.6732632, %v4277_v28  ;;  %vm1591_vm0 = vcmp.gt.f32.partialorder %v7358_v54, 0.0  ;;  %v8197_v15 = vld [vmem:[#allocation74_spill] sm:$0xff] }
 0x27f   :  { %v1460_v32 = vmul.f32 1.6732632, %v4281_v45  ;;  %v960_v56 = vmin.f32 %v7413_v13, 0.0  ;;  %v7427_v59 = vadd.f32 %v8192_v0, %v6089_v14  ;;  %v5286_v16 = vpop.eup %5285  ;;  %v1831_v41 = vmul.f32 1.050701, %v1703_v58  ;;  %v8198_v28 = vld [vmem:[#allocation35_spill] sm:$0xff] }
 0x280   :  { %v1193_v27 = vmul.f32 1.442695, %v959_v63  ;;  %v7431_v37 = vadd.f32 %v8193_v12, %v6327_v35  ;;  %v1920_v22 = vpack.c.bf16 %v1836_v61, %v1832_v53  ;;  %v1835_v5 = vmul.f32 1.050701, %v1707_v46  ;;  %v7465_v61 = vpop.f32.mrb[50].mxu0  ;;  %v8199_v58 = vld [vmem:[#allocation47_spill] sm:$0xff] }
 0x281   :  { %v5288_v55 = vpop.eup %5287  ;;  %v1711_v23 = vsel %vm1583_vm12, %v7321_v48, %v1455_v4  ;;  %v4284_v30 = vadd.f32 -1.0, %v5286_v16  ;;  %v1195_v50 = vmul.f32 1.442695, %v960_v56  ;;  %v1459_v38 = vmul.f32 1.6732632, %v4280_v62  ;;  %v8200_v45 = vld [vmem:[#allocation51_spill] sm:$0xff] }
 0x282   :  { %v1716_v10 = vsel %vm1588_vm14, %v7350_v47, %v1460_v32  ;;  %5293 = vpow2.f32 %v1193_v27  ;;  %v963_v6 = vmin.f32 %v7427_v59, 0.0  ;;  %2477 = vmatprep.mubr.bf16.mxu1 %v1920_v22  ;;  %v1712_v33 = vsel %vm1584_vm13, %v7329_v39, %v1456_v49  ;;  %v7479_v46 = vpop.f32.mrb[51].mxu0  ;;  %v8201_v49 = vld [vmem:[#allocation52_spill] sm:$0xff] }
 0x283   :  { %v4285_v34 = vadd.f32 -1.0, %v5288_v55  ;;  %vm1592_vm1 = vcmp.gt.f32.partialorder %v7366_v3, 0.0  ;;  %vm1596_vm2 = vcmp.gt.f32.partialorder %v7390_v57, 0.0  ;;  %5295 = vpow2.f32 %v1195_v50 }
 0x284   :  { %v964_v48 = vmin.f32 %v7431_v37, 0.0  ;;  %v7446_v8 = vmul.f32 1.050701, %v1711_v23  ;;  %v1463_v47 = vmul.f32 1.6732632, %v4284_v30  ;;  %vm1595_vm3 = vcmp.gt.f32.partialorder %v7386_v18, 0.0 }
 0x285   :  { %v1201_v19 = vmul.f32 1.442695, %v963_v6  ;;  %v1933_v40 = vpack.c.bf16 %v8195_v1, %v8194_v51  ;;  %v1844_v39 = vmul.f32 1.050701, %v1716_v10  ;;  %v1919_v20 = vpack.c.bf16 %v1835_v5, %v1831_v41  ;;  %v5290_v26 = vpop.eup %5289  ;;  %v8205_v1 = vld [vmem:[#allocation55_spill] sm:$0xff] }
 0x286   :  { %v1203_v36 = vmul.f32 1.442695, %v964_v48  ;;  %v7453_v7 = vadd.f32 %v8196_v17, %v6089_v14  ;;  %v1840_v11 = vmul.f32 1.050701, %v1712_v33  ;;  %v1715_v9 = vsel %vm1587_vm15, %v7346_v2, %v1459_v38  ;;  %v8206_v17 = vld [vmem:[#allocation56_spill] sm:$0xff] }
 0x287   :  { %5297 = vpow2.f32 %v1201_v19  ;;  %2349 = vmatmul.mubr.bf16.gmra.mrb[104].mxu0 %v1933_v40  ;;  %v1938_v60 = vpack.c.bf16 %v8198_v28, %v8197_v15  ;;  %v5292_v25 = vpop.eup %5291  ;;  %v1464_v31 = vmul.f32 1.6732632, %v4285_v34  ;;  %v4288_v42 = vadd.f32 -1.0, %v5290_v26  ;;  %2478 = vmatmul.mubr.bf16.gmra.mrb[120].mxu1 %v1919_v20  ;;  %v8202_v34 = vld [vmem:[#allocation72_spill] sm:$0xff]  ;;  %v8204_v19 = vld [vmem:[#allocation54_spill] sm:$0xff]  ;;  %v8207_v28 = vld [vmem:[#allocation57_spill] sm:$0xff] }
 0x288   :  { %5299 = vpow2.f32 %v1203_v36  ;;  %v967_v44 = vmin.f32 %v7453_v7, 0.0  ;;  %v1719_v2 = vsel %vm1591_vm0, %v7358_v54, %v1463_v47  ;;  %v4289_v43 = vadd.f32 -1.0, %v5292_v25 }
 0x289   :  { %vm1599_vm4 = vcmp.gt.f32.partialorder %v7406_v24, 0.0  ;;  %2356 = vmatprep.mubr.bf16.mxu0 %v1938_v60  ;;  %v7473_v4 = vadd.f32 %v8199_v58, %v6327_v35  ;;  %v7477_v53 = vadd.f32 %v8200_v45, %v6089_v14  ;;  %v1467_v62 = vmul.f32 1.6732632, %v4288_v42 }
 0x28a   :  { %v1209_v63 = vmul.f32 1.442695, %v967_v44  ;;  %v7483_v32 = vadd.f32 %v8201_v49, %v6327_v35  ;;  %v1924_v54 = vpack.c.bf16 %v1844_v39, %v1840_v11  ;;  %v1843_v56 = vmul.f32 1.050701, %v1715_v9 }
 0x28b   :  { %v1468_v0 = vmul.f32 1.6732632, %v4289_v43  ;;  %v968_v16 = vmin.f32 %v7473_v4, 0.0  ;;  %v971_v41 = vmin.f32 %v7477_v53, 0.0  ;;  %v7487_v27 = vmul.f32 1.050701, %v1719_v2 }
 0x28c   :  { %vm1600_vm5 = vcmp.gt.f32.partialorder %v7413_v13, 0.0  ;;  %5301 = vpow2.f32 %v1209_v63  ;;  %v972_v12 = vmin.f32 %v7483_v32, 0.0  ;;  %2485 = vmatprep.mubr.bf16.mxu1 %v1924_v54  ;;  %v5294_v22 = vpop.eup %5293  ;;  %v1720_v55 = vsel %vm1592_vm1, %v7366_v3, %v1464_v31  ;;  %v8203_v3 = vld [vmem:[#allocation32_spill] sm:$0xff] }
 0x28d   :  { %v1724_v5 = vsel %vm1596_vm2, %v7390_v57, %v1468_v0  ;;  %vm1603_vm6 = vcmp.gt.f32.partialorder %v7427_v59, 0.0  ;;  %v1211_v23 = vmul.f32 1.442695, %v968_v16  ;;  %v1217_v30 = vmul.f32 1.442695, %v971_v41  ;;  %v5296_v50 = vpop.eup %5295 }
 0x28e   :  { %v1723_v52 = vsel %vm1595_vm3, %v7386_v18, %v1467_v62  ;;  %v1852_v38 = vmul.f32 1.050701, %v1724_v5  ;;  %v4292_v10 = vadd.f32 -1.0, %v5294_v22  ;;  %v1219_v6 = vmul.f32 1.442695, %v972_v12  ;;  %v5041_v18 = vld [vmem:[#allocation8 + $0x20] sm:$0xff]  }
 0x28f   :  { %v4293_v33 = vadd.f32 -1.0, %v5296_v50  ;;  %5303 = vpow2.f32 %v1211_v23  ;;  %v1937_v48 = vpack.c.bf16 %v8203_v3, %v8202_v34  ;;  %v1923_v47 = vpack.c.bf16 %v1843_v56, %v7446_v8  ;;  %4774 = vmatprep.subr.bf16.mxu0 %v5041_v18 }
 0x290   :  { %v1471_v57 = vmul.f32 1.6732632, %v4292_v10  ;;  %5305 = vpow2.f32 %v1217_v30  ;;  %v7506_v51 = vadd.f32 %v8204_v19, %v6089_v14  ;;  %v7510_v40 = vadd.f32 %v8205_v1, %v6327_v35  ;;  %4775 = vmatpush3.bf16.msra.mxu0 %v5041_v18  ;;  %v4492_v30 = vpop.f32.mrb[52].mxu0 }
 0x291   :  { %v5298_v39 = vpop.eup %5297  ;;  %v1848_v36 = vmul.f32 1.050701, %v1720_v55  ;;  %v1472_v20 = vmul.f32 1.6732632, %v4293_v33  ;;  %5307 = vpow2.f32 %v1219_v6  ;;  %2357 = vmatmul.mubr.bf16.gmra.mrb[108].mxu0 %v1937_v48  ;;  %2486 = vmatmul.mubr.bf16.gmra.mrb[124].mxu1 %v1923_v47  ;;  %v7514_v8 = vadd.f32 %v8206_v17, %v6089_v14  ;;  %v4493_v10 = vpop.f32.mrb[53].mxu0 }
 0x292   :  { %v5300_v26 = vpop.eup %5299  ;;  %v1727_v11 = vsel %vm1599_vm4, %v7406_v24, %v1471_v57  ;;  %v4296_v9 = vadd.f32 -1.0, %v5298_v39  ;;  %v975_v15 = vmin.f32 %v7506_v51, 0.0  ;;  %v7522_v60 = vadd.f32 %v8207_v28, %v6327_v35  ;;  %v4495_v33 = vpop.f32.mrb[54].mxu0 }
 0x293   :  { %v1851_v25 = vmul.f32 1.050701, %v1723_v52  ;;  %v1728_v31 = vsel %vm1600_vm5, %v7413_v13, %v1472_v20  ;;  %v4297_v14 = vadd.f32 -1.0, %v5300_v26  ;;  %v976_v42 = vmin.f32 %v7510_v40, 0.0 }
 0x294   :  { %v1855_v44 = vmul.f32 1.050701, %v1727_v11  ;;  %v1475_v2 = vmul.f32 1.6732632, %v4296_v9  ;;  %v1225_v24 = vmul.f32 1.442695, %v975_v15  ;;  %v1928_v43 = vpack.c.bf16 %v1852_v38, %v1848_v36 }
 0x295   :  { %v1476_v58 = vmul.f32 1.6732632, %v4297_v14  ;;  %vm1604_vm7 = vcmp.gt.f32.partialorder %v7431_v37, 0.0  ;;  %v1227_v45 = vmul.f32 1.442695, %v976_v42  ;;  %v979_v35 = vmin.f32 %v7514_v8, 0.0 }
 0x296   :  { %v5302_v62 = vpop.eup %5301  ;;  %v1856_v63 = vmul.f32 1.050701, %v1728_v31  ;;  %v1731_v13 = vsel %vm1603_vm6, %v7427_v59, %v1475_v2  ;;  %5309 = vpow2.f32 %v1225_v24  ;;  %v980_v49 = vmin.f32 %v7522_v60, 0.0  ;;  %2493 = vmatprep.mubr.bf16.mxu1 %v1928_v43  ;;  %v5043_v15 = vld [vmem:[#allocation8 + $0x30] sm:$0xff]  }
 0x297   :  { %v1859_v54 = vmul.f32 1.050701, %v1731_v13  ;;  %v1732_v56 = vsel %vm1604_vm7, %v7431_v37, %v1476_v58  ;;  %v4300_v0 = vadd.f32 -1.0, %v5302_v62  ;;  %5311 = vpow2.f32 %v1227_v45 }
 0x298   :  { %v1860_v16 = vmul.f32 1.050701, %v1732_v56  ;;  %v1233_v41 = vmul.f32 1.442695, %v979_v35  ;;  %v1235_v12 = vmul.f32 1.442695, %v980_v49  ;;  %v1927_v22 = vpack.c.bf16 %v1851_v25, %v7487_v27 }
 0x299   :  { %v5304_v55 = vpop.eup %5303  ;;  %v1479_v5 = vmul.f32 1.6732632, %v4300_v0  ;;  %v1931_v23 = vpack.c.bf16 %v1859_v54, %v1855_v44  ;;  %v7538_v59 = vadd.f32 %v7462_v29, %v7455_v21  ;;  %v7542_v38 = vadd.f32 %v7479_v46, %v7465_v61  ;;  %v4496_v29 = vpop.f32.mrb[55].mxu0 }
 0x29a   :  { %v5306_v50 = vpop.eup %5305  ;;  %v4301_v52 = vadd.f32 -1.0, %v5304_v55  ;;  %5313 = vpow2.f32 %v1233_v41  ;;  %2494 = vmatmul.mubr.bf16.gmra.mrb[128].mxu1 %v1927_v22  ;;  %v1932_v37 = vpack.c.bf16 %v1860_v16, %v1856_v63  ;;  %vm1607_vm8 = vcmp.gt.f32.partialorder %v7453_v7, 0.0  ;;  %v5044_v41 = vld [vmem:[#allocation8 + $0x38] sm:$0xff]  }
 0x29b   :  { %v5308_v6 = vpop.eup %5307  ;;  %v4304_v27 = vadd.f32 -1.0, %v5306_v50  ;;  %5315 = vpow2.f32 %v1235_v12  ;;  %vm1608_vm9 = vcmp.gt.f32.partialorder %v7473_v4, 0.0  ;;  %v1735_v3 = vsel %vm1607_vm8, %v7453_v7, %v1479_v5 }
 0x29c   :  { %v1480_v34 = vmul.f32 1.6732632, %v4301_v52  ;;  %v4305_v21 = vadd.f32 -1.0, %v5308_v6  ;;  %2501 = vmatprep.mubr.bf16.mxu1 %v1932_v37  ;;  %v7547_v47 = vadd.f32 %v4493_v10, %v4492_v30  ;;  %v7549_v61 = vadd.f32 %v4496_v29, %v4495_v33  ;;  %v7575_v30 = vld [vmem:[%s8024_s4] ss:$0 sm:$0xff] }
 0x29d   :  { %v1483_v48 = vmul.f32 1.6732632, %v4304_v27  ;;  %vm1611_vm10 = vcmp.gt.f32.partialorder %v7477_v53, 0.0  ;;  %vm1612_vm11 = vcmp.gt.f32.partialorder %v7483_v32, 0.0  ;;  %v1863_v18 = vmul.f32 1.050701, %v1735_v3 }
 0x29e   :  { %v1736_v46 = vsel %vm1608_vm9, %v7473_v4, %v1480_v34  ;;  %v1484_v57 = vmul.f32 1.6732632, %v4305_v21  ;;  %v5042_v4 = vld [vmem:[#allocation8 + $0x28] sm:$0xff]   ;;  %vm1615_vm12 = vcmp.gt.f32.partialorder %v7506_v51, 0.0  ;;  %vm1616_vm13 = vcmp.gt.f32.partialorder %v7510_v40, 0.0  ;;  %v4498_v54 = vpop.f32.mrb[56].mxu0 }
 0x29f   :  { %v1739_v19 = vsel %vm1611_vm10, %v7477_v53, %v1483_v48  ;;  %v1864_v20 = vmul.f32 1.050701, %v1736_v46  ;;  %4776 = vmatprep.subr.bf16.mxu0 %v5042_v4  ;;  %vm1619_vm14 = vcmp.gt.f32.partialorder %v7514_v8, 0.0  ;;  %vm1620_vm15 = vcmp.gt.f32.partialorder %v7522_v60, 0.0 }
 0x2a0   :  { %v5310_v1 = vpop.eup %5309  ;;  %v1867_v39 = vmul.f32 1.050701, %v1739_v19  ;;  %v1740_v36 = vsel %vm1612_vm11, %v7483_v32, %v1484_v57  ;;  %4777 = vmatpush3.bf16.msra.mxu0 %v5042_v4  ;;  %v2239_v6 = vadd.f32 %v7538_v59, %v7575_v30  ;;  %v2242_v48 = vadd.f32 %v7542_v38, %v7575_v30 }
 0x2a1   :  { %v5312_v7 = vpop.eup %5311  ;;  %v1868_v17 = vmul.f32 1.050701, %v1740_v36  ;;  %v4308_v26 = vadd.f32 -1.0, %v5310_v1  ;;  %4778 = vmatprep.subr.bf16.mxu0 %v5043_v15  ;;  %v2247_v38 = vadd.f32 %v7547_v47, %v7575_v30 }
 0x2a2   :  { %v4309_v11 = vadd.f32 -1.0, %v5312_v7  ;;  %2502 = vmatmul.mubr.bf16.gmra.mrb[132].mxu1 %v1931_v23  ;;  %v1935_v9 = vpack.c.bf16 %v1867_v39, %v1863_v18 }
 0x2a3   :  { %v1487_v28 = vmul.f32 1.6732632, %v4308_v26  ;;  %v1936_v25 = vpack.c.bf16 %v1868_v17, %v1864_v20 }
 0x2a4   :  { %v5314_v31 = vpop.eup %5313  ;;  %v1488_v53 = vmul.f32 1.6732632, %v4309_v11  ;;  %4779 = vmatpush3.bf16.msra.mxu0 %v5043_v15 }
 0x2a5   :  { %v5316_v14 = vpop.eup %5315  ;;  %v4312_v42 = vadd.f32 -1.0, %v5314_v31  ;;  %2509 = vmatprep.mubr.bf16.mxu1 %v1936_v25  ;;  %v1743_v44 = vsel %vm1615_vm12, %v7506_v51, %v1487_v28  ;;  %4780 = vmatprep.subr.bf16.mxu0 %v5044_v41 }
 0x2a6   :  { %v4313_v32 = vadd.f32 -1.0, %v5316_v14  ;;  %v1744_v24 = vsel %vm1616_vm13, %v7510_v40, %v1488_v53  ;;  %v1871_v45 = vmul.f32 1.050701, %v1743_v44  ;;  %v4499_v40 = vpop.f32.mrb[57].mxu0  ;;  %v2250_v14 = vadd.f32 %v7549_v61, %v7575_v30 }
 0x2a7   :  { %v1491_v2 = vmul.f32 1.6732632, %v4312_v42  ;;  %v1872_v63 = vmul.f32 1.050701, %v1744_v24  ;;  %v7564_v56 = vadd.f32 %v4499_v40, %v4498_v54  ;;  %v4501_v0 = vpop.f32.mrb[58].mxu0 }
 0x2a8   :  { %v1492_v43 = vmul.f32 1.6732632, %v4313_v32  ;;  %v4502_v16 = vpop.f32.mrb[59].mxu0  ;;  %4781 = vmatpush3.bf16.msra.mxu0 %v5044_v41 }
 0x2a9   :  { %v1747_v58 = vsel %vm1619_vm14, %v7514_v8, %v1491_v2  ;;  %v7566_v8 = vadd.f32 %v4502_v16, %v4501_v0 }
 0x2aa   :  { %v1875_v35 = vmul.f32 1.050701, %v1747_v58  ;;  %v1748_v62 = vsel %vm1620_vm15, %v7522_v60, %v1492_v43  ;;  %2510 = vmatmul.mubr.bf16.gmra.mrb[136].mxu1 %v1935_v9 }
 0x2ab   :  { %v1876_v51 = vmul.f32 1.050701, %v1748_v62 }
 0x2ac   :  { %v1939_v13 = vpack.c.bf16 %v1875_v35, %v1871_v45 }
 0x2ad   :  { %v1940_v49 = vpack.c.bf16 %v1876_v51, %v1872_v63 }
 0x2af   :  { %2517 = vmatprep.mubr.bf16.mxu1 %v1940_v49 }
 0x2b2   :  { %2518 = vmatmul.mubr.bf16.gmra.mrb[140].mxu1 %v1939_v13 }
 0x2b3   :  { %v4504_v12 = vpop.f32.mrb[60].mxu0 }
 0x2b4   :  { %v4505_v60 = vpop.f32.mrb[61].mxu0 }
 0x2b5   :  { %v7568_v22 = vadd.f32 %v4505_v60, %v4504_v12  ;;  %v4507_v55 = vpop.f32.mrb[62].mxu0 }
 0x2b6   :  { %v4508_v5 = vpop.f32.mrb[63].mxu0 }
 0x2b7   :  { %v7570_v23 = vadd.f32 %v4508_v5, %v4507_v55 }
 0x2ca   :  { %v4510_v52 = vpop.f32.mrb[64].mxu0 }
 0x2cb   :  { %v4511_v10 = vpop.f32.mrb[65].mxu0 }
 0x2cc   :  { %v7579_v34 = vadd.f32 %v4511_v10, %v4510_v52  ;;  %v4513_v21 = vpop.f32.mrb[66].mxu0 }
 0x2cd   :  { %v4598_v50 = vpop.f32.mrb[80].mxu1  ;;  %v4514_v3 = vpop.f32.mrb[67].mxu0 }
 0x2ce   :  { %v4599_v37 = vpop.f32.mrb[81].mxu1  ;;  %v7583_v19 = vadd.f32 %v4514_v3, %v4513_v21  ;;  %v2258_v21 = vadd.f32 %v7566_v8, %v7575_v30 }
 0x2cf   :  { %v4600_v27 = vadd.f32 %v4599_v37, %v4598_v50  ;;  %v4601_v33 = vpop.f32.mrb[82].mxu1  ;;  %v2255_v37 = vadd.f32 %v7564_v56, %v7575_v30 }
 0x2d0   :  { %v4602_v29 = vpop.f32.mrb[83].mxu1 }
 0x2d1   :  { %v2400_v46 = vadd.f32 %v4600_v27, %v2239_v6  ;;  %v4603_v57 = vadd.f32 %v4602_v29, %v4601_v33 }
 0x2d3   :  { %v2526_v1 = vmin.f32 %v2400_v46, 0.0  ;;  %v2403_v18 = vadd.f32 %v4603_v57, %v2242_v48  ;;  %vm2686_vm0 = vcmp.gt.f32.partialorder %v2400_v46, 0.0 }
 0x2d5   :  { %v2558_v39 = vmul.f32 1.442695, %v2526_v1  ;;  %v2527_v36 = vmin.f32 %v2403_v18, 0.0  ;;  %vm2687_vm1 = vcmp.gt.f32.partialorder %v2403_v18, 0.0 }
 0x2d7   :  { %5317 = vpow2.f32 %v2558_v39  ;;  %v2560_v59 = vmul.f32 1.442695, %v2527_v36 }
 0x2d9   :  { %5319 = vpow2.f32 %v2560_v59 }
 0x2db   :  { %v4516_v7 = vpop.f32.mrb[68].mxu0 }
 0x2dc   :  { %v4604_v20 = vpop.f32.mrb[84].mxu1  ;;  %v4517_v17 = vpop.f32.mrb[69].mxu0 }
 0x2dd   :  { %v4605_v26 = vpop.f32.mrb[85].mxu1  ;;  %v7585_v11 = vadd.f32 %v4517_v17, %v4516_v7  ;;  %v4519_v9 = vpop.f32.mrb[70].mxu0 }
 0x2de   :  { %v4606_v4 = vadd.f32 %v4605_v26, %v4604_v20  ;;  %v4607_v15 = vpop.f32.mrb[86].mxu1  ;;  %v4520_v28 = vpop.f32.mrb[71].mxu0 }
 0x2df   :  { %v4608_v25 = vpop.f32.mrb[87].mxu1  ;;  %v7589_v31 = vadd.f32 %v4520_v28, %v4519_v9 }
 0x2e0   :  { %v2408_v42 = vadd.f32 %v4606_v4, %v2247_v38  ;;  %v4609_v32 = vadd.f32 %v4608_v25, %v4607_v15 }
 0x2e1   :  { %v5318_v53 = vpop.eup %5317 }
 0x2e2   :  { %v4347_v44 = vadd.f32 -1.0, %v5318_v53  ;;  %v2528_v24 = vmin.f32 %v2408_v42, 0.0  ;;  %v2411_v43 = vadd.f32 %v4609_v32, %v2250_v14  ;;  %vm2688_vm2 = vcmp.gt.f32.partialorder %v2408_v42, 0.0 }
 0x2e3   :  { %v5320_v2 = vpop.eup %5319  ;;  %v2263_v53 = vadd.f32 %v7568_v22, %v7575_v30 }
 0x2e4   :  { %v4348_v58 = vadd.f32 -1.0, %v5320_v2  ;;  %v2654_v45 = vmul.f32 1.6732632, %v4347_v44  ;;  %v2562_v47 = vmul.f32 1.442695, %v2528_v24  ;;  %v2529_v35 = vmin.f32 %v2411_v43, 0.0 }
 0x2e5   :  { %vm2689_vm3 = vcmp.gt.f32.partialorder %v2411_v43, 0.0 }
 0x2e6   :  { %v2655_v62 = vmul.f32 1.6732632, %v4348_v58  ;;  %v2718_v63 = vsel %vm2686_vm0, %v2400_v46, %v2654_v45  ;;  %5321 = vpow2.f32 %v2562_v47  ;;  %v2564_v51 = vmul.f32 1.442695, %v2529_v35 }
 0x2e7   :  { %v2750_v49 = vmul.f32 1.050701, %v2718_v63  ;;  %v2266_v58 = vadd.f32 %v7570_v23, %v7575_v30 }
 0x2e8   :  { %v2719_v13 = vsel %vm2687_vm1, %v2403_v18, %v2655_v62  ;;  %5323 = vpow2.f32 %v2564_v51 }
 0x2e9   :  { %v2751_v61 = vmul.f32 1.050701, %v2719_v13 }
 0x2eb   :  { %v2782_v54 = vpack.c.bf16 %v2751_v61, %v2750_v49 }
 0x2ed   :  { %4782 = vmatprep.mubr.bf16.mxu0 %v2782_v54 }
 0x2ef   :  { %v4522_v40 = vpop.f32.mrb[72].mxu0 }
 0x2f0   :  { %v5322_v0 = vpop.eup %5321  ;;  %v4523_v16 = vpop.f32.mrb[73].mxu0 }
 0x2f1   :  { %v4349_v41 = vadd.f32 -1.0, %v5322_v0  ;;  %v7593_v60 = vadd.f32 %v4523_v16, %v4522_v40  ;;  %v4525_v55 = vpop.f32.mrb[74].mxu0 }
 0x2f2   :  { %v4610_v12 = vpop.f32.mrb[88].mxu1  ;;  %v5324_v5 = vpop.eup %5323 }
 0x2f3   :  { %v4611_v50 = vpop.f32.mrb[89].mxu1  ;;  %v4526_v52 = vpop.f32.mrb[75].mxu0  ;;  %v2656_v10 = vmul.f32 1.6732632, %v4349_v41  ;;  %v4350_v6 = vadd.f32 -1.0, %v5324_v5 }
 0x2f4   :  { %v4612_v27 = vadd.f32 %v4611_v50, %v4610_v12  ;;  %v4613_v33 = vpop.f32.mrb[90].mxu1  ;;  %v7599_v3 = vadd.f32 %v4526_v52, %v4525_v55 }
 0x2f5   :  { %v4614_v29 = vpop.f32.mrb[91].mxu1  ;;  %v2720_v48 = vsel %vm2688_vm2, %v2408_v42, %v2656_v10  ;;  %v2657_v46 = vmul.f32 1.6732632, %v4350_v6  ;;  %v2271_v6 = vadd.f32 %v7579_v34, %v7575_v30 }
 0x2f6   :  { %v2416_v57 = vadd.f32 %v4612_v27, %v2255_v37  ;;  %v4615_v1 = vadd.f32 %v4614_v29, %v4613_v33  ;;  %v2752_v56 = vmul.f32 1.050701, %v2720_v48 }
 0x2f7   :  { %v2721_v18 = vsel %vm2689_vm3, %v2411_v43, %v2657_v46 }
 0x2f8   :  { %v2530_v39 = vmin.f32 %v2416_v57, 0.0  ;;  %v2419_v36 = vadd.f32 %v4615_v1, %v2258_v21  ;;  %v2753_v59 = vmul.f32 1.050701, %v2721_v18  ;;  %vm2690_vm4 = vcmp.gt.f32.partialorder %v2416_v57, 0.0 }
 0x2fa   :  { %v2566_v7 = vmul.f32 1.442695, %v2530_v39  ;;  %v2531_v20 = vmin.f32 %v2419_v36, 0.0  ;;  %v2783_v17 = vpack.c.bf16 %v2753_v59, %v2752_v56  ;;  %vm2691_vm5 = vcmp.gt.f32.partialorder %v2419_v36, 0.0 }
 0x2fc   :  { %5325 = vpow2.f32 %v2566_v7  ;;  %v2568_v26 = vmul.f32 1.442695, %v2531_v20  ;;  %4783 = vmatmul.mubr.bf16.vlgmr.msra.gmra.mrb[112].mxu0 %v2783_v17  ;;  %v5045_v20 = vld [vmem:[#allocation10] sm:$0xff]   ;;  %v5046_v17 = vld [vmem:[#allocation10 + $0x8] sm:$0xff]  }
 0x2fd   :  { %4814 = vmatprep.subr.bf16.mxu1 %v5045_v20 }
 0x2fe   :  { %5327 = vpow2.f32 %v2568_v26  ;;  %4815 = vmatpush3.bf16.msra.mxu1 %v5045_v20 }
 0x2ff   :  { %4816 = vmatprep.subr.bf16.mxu1 %v5046_v17 }
 0x302   :  { %4817 = vmatpush3.bf16.msra.mxu1 %v5046_v17 }
 0x304   :  { %v4528_v8 = vpop.f32.mrb[76].mxu0 }
 0x305   :  { %v4529_v38 = vpop.f32.mrb[77].mxu0 }
 0x306   :  { %v4616_v9 = vpop.f32.mrb[92].mxu1  ;;  %v7601_v15 = vadd.f32 %v4529_v38, %v4528_v8  ;;  %v4531_v28 = vpop.f32.mrb[78].mxu0 }
 0x307   :  { %v4617_v4 = vpop.f32.mrb[93].mxu1  ;;  %v5326_v25 = vpop.eup %5325 }
 0x308   :  { %v4618_v14 = vadd.f32 %v4617_v4, %v4616_v9  ;;  %v4619_v42 = vpop.f32.mrb[94].mxu1  ;;  %v4532_v32 = vpop.f32.mrb[79].mxu0  ;;  %v4351_v44 = vadd.f32 -1.0, %v5326_v25 }
 0x309   :  { %v4620_v2 = vpop.f32.mrb[95].mxu1  ;;  %v7605_v24 = vadd.f32 %v4532_v32, %v4531_v28  ;;  %v5328_v43 = vpop.eup %5327 }
 0x30a   :  { %v2424_v45 = vadd.f32 %v4618_v14, %v2263_v53  ;;  %v4621_v47 = vadd.f32 %v4620_v2, %v4619_v42  ;;  %v4352_v35 = vadd.f32 -1.0, %v5328_v43  ;;  %v2658_v62 = vmul.f32 1.6732632, %v4351_v44  ;;  %v5047_v53 = vld [vmem:[#allocation10 + $0x10] sm:$0xff]  }
 0x30b   :  { %v2279_v43 = vadd.f32 %v7585_v11, %v7575_v30  ;;  %4818 = vmatprep.subr.bf16.mxu1 %v5047_v53 }
 0x30c   :  { %v2532_v63 = vmin.f32 %v2424_v45, 0.0  ;;  %v2427_v51 = vadd.f32 %v4621_v47, %v2266_v58  ;;  %v2659_v13 = vmul.f32 1.6732632, %v4352_v35  ;;  %v2722_v22 = vsel %vm2690_vm4, %v2416_v57, %v2658_v62  ;;  %4819 = vmatpush3.bf16.msra.mxu1 %v5047_v53 }
 0x30d   :  { %v2754_v0 = vmul.f32 1.050701, %v2722_v22  ;;  %v2274_v57 = vadd.f32 %v7583_v19, %v7575_v30  ;;  %vm2692_vm6 = vcmp.gt.f32.partialorder %v2424_v45, 0.0 }
 0x30e   :  { %v2570_v49 = vmul.f32 1.442695, %v2532_v63  ;;  %v2533_v61 = vmin.f32 %v2427_v51, 0.0  ;;  %v2723_v54 = vsel %vm2691_vm5, %v2419_v36, %v2659_v13  ;;  %vm2693_vm7 = vcmp.gt.f32.partialorder %v2427_v51, 0.0 }
 0x30f   :  { %v2755_v16 = vmul.f32 1.050701, %v2723_v54  ;;  %v2282_v63 = vadd.f32 %v7589_v31, %v7575_v30 }
 0x310   :  { %5329 = vpow2.f32 %v2570_v49  ;;  %v2572_v40 = vmul.f32 1.442695, %v2533_v61 }
 0x311   :  { %v2784_v41 = vpack.c.bf16 %v2755_v16, %v2754_v0 }
 0x312   :  { %5331 = vpow2.f32 %v2572_v40 }
 0x313   :  { %4786 = vmatprep.mubr.bf16.mxu0 %v2784_v41 }
 0x318   :  { %v4534_v23 = vpop.f32.mrb[80].mxu0 }
 0x319   :  { %v4535_v12 = vpop.f32.mrb[81].mxu0 }
 0x31a   :  { %v4622_v55 = vpop.f32.mrb[96].mxu1  ;;  %v7609_v5 = vadd.f32 %v4535_v12, %v4534_v23  ;;  %v4537_v50 = vpop.f32.mrb[82].mxu0 }
 0x31b   :  { %v5330_v52 = vpop.eup %5329  ;;  %v4623_v37 = vpop.f32.mrb[97].mxu1 }
 0x31c   :  { %v4538_v10 = vpop.f32.mrb[83].mxu0  ;;  %v4353_v27 = vadd.f32 -1.0, %v5330_v52  ;;  %v4624_v33 = vadd.f32 %v4623_v37, %v4622_v55  ;;  %v4625_v21 = vpop.f32.mrb[98].mxu1 }
 0x31d   :  { %v7613_v29 = vadd.f32 %v4538_v10, %v4537_v50  ;;  %v5332_v48 = vpop.eup %5331  ;;  %v4626_v46 = vpop.f32.mrb[99].mxu1  ;;  %v2287_v10 = vadd.f32 %v7593_v60, %v7575_v30 }
 0x31e   :  { %v4354_v1 = vadd.f32 -1.0, %v5332_v48  ;;  %v7617_v18 = vadd.f32 %v4624_v33, %v2271_v6  ;;  %v4627_v39 = vadd.f32 %v4626_v46, %v4625_v21  ;;  %v2660_v36 = vmul.f32 1.6732632, %v4353_v27 }
 0x320   :  { %v2534_v56 = vmin.f32 %v7617_v18, 0.0  ;;  %v7620_v59 = vadd.f32 %v4627_v39, %v2274_v57  ;;  %v2661_v34 = vmul.f32 1.6732632, %v4354_v1  ;;  %v2724_v7 = vsel %vm2692_vm6, %v2424_v45, %v2660_v36 }
 0x321   :  { %v2756_v19 = vmul.f32 1.050701, %v2724_v7  ;;  %vm2694_vm8 = vcmp.gt.f32.partialorder %v7617_v18, 0.0  ;;  %v2290_v1 = vadd.f32 %v7599_v3, %v7575_v30 }
 0x322   :  { %v2574_v26 = vmul.f32 1.442695, %v2534_v56  ;;  %v2535_v8 = vmin.f32 %v7620_v59, 0.0  ;;  %v2725_v9 = vsel %vm2693_vm7, %v2427_v51, %v2661_v34  ;;  %vm2695_vm9 = vcmp.gt.f32.partialorder %v7620_v59, 0.0 }
 0x323   :  { %v2757_v38 = vmul.f32 1.050701, %v2725_v9 }
 0x324   :  { %5333 = vpow2.f32 %v2574_v26  ;;  %v2576_v4 = vmul.f32 1.442695, %v2535_v8 }
 0x325   :  { %v4540_v28 = vpop.f32.mrb[84].mxu0  ;;  %v2785_v25 = vpack.c.bf16 %v2757_v38, %v2756_v19 }
 0x326   :  { %5335 = vpow2.f32 %v2576_v4  ;;  %v4628_v14 = vpop.f32.mrb[100].mxu1  ;;  %v4541_v42 = vpop.f32.mrb[85].mxu0 }
 0x327   :  { %v4629_v32 = vpop.f32.mrb[101].mxu1  ;;  %v7623_v44 = vadd.f32 %v4541_v42, %v4540_v28  ;;  %v4543_v2 = vpop.f32.mrb[86].mxu0  ;;  %4787 = vmatmul.mubr.bf16.gmra.mrb[116].mxu0 %v2785_v25 }
 0x328   :  { %v4630_v58 = vadd.f32 %v4629_v32, %v4628_v14  ;;  %v4631_v45 = vpop.f32.mrb[102].mxu1  ;;  %v4544_v47 = vpop.f32.mrb[87].mxu0 }
 0x329   :  { %v4632_v35 = vpop.f32.mrb[103].mxu1  ;;  %v7627_v62 = vadd.f32 %v4544_v47, %v4543_v2 }
 0x32a   :  { %v7631_v51 = vadd.f32 %v4630_v58, %v2279_v43  ;;  %v4633_v13 = vadd.f32 %v4632_v35, %v4631_v45  ;;  %v2298_v45 = vadd.f32 %v7605_v24, %v7575_v30 }
 0x32c   :  { %v2536_v22 = vmin.f32 %v7631_v51, 0.0  ;;  %v7634_v49 = vadd.f32 %v4633_v13, %v2282_v63  ;;  %vm2696_vm10 = vcmp.gt.f32.partialorder %v7631_v51, 0.0 }
 0x32e   :  { %v5334_v11 = vpop.eup %5333  ;;  %v2578_v61 = vmul.f32 1.442695, %v2536_v22  ;;  %v2537_v54 = vmin.f32 %v7634_v49, 0.0  ;;  %vm2697_vm11 = vcmp.gt.f32.partialorder %v7634_v49, 0.0 }
 0x32f   :  { %v4355_v40 = vadd.f32 -1.0, %v5334_v11 }
 0x330   :  { %v4546_v0 = vpop.f32.mrb[88].mxu0  ;;  %v5336_v16 = vpop.eup %5335  ;;  %5337 = vpow2.f32 %v2578_v61  ;;  %v2580_v41 = vmul.f32 1.442695, %v2537_v54 }
 0x331   :  { %v4634_v23 = vpop.f32.mrb[104].mxu1  ;;  %v4547_v12 = vpop.f32.mrb[89].mxu0  ;;  %v4356_v31 = vadd.f32 -1.0, %v5336_v16  ;;  %v2662_v37 = vmul.f32 1.6732632, %v4355_v40 }
 0x332   :  { %v4635_v55 = vpop.f32.mrb[105].mxu1  ;;  %v7637_v50 = vadd.f32 %v4547_v12, %v4546_v0  ;;  %v4549_v52 = vpop.f32.mrb[90].mxu0  ;;  %5339 = vpow2.f32 %v2580_v41 }
 0x333   :  { %v4636_v6 = vadd.f32 %v4635_v55, %v4634_v23  ;;  %v4637_v27 = vpop.f32.mrb[106].mxu1  ;;  %v4550_v33 = vpop.f32.mrb[91].mxu0  ;;  %v2663_v46 = vmul.f32 1.6732632, %v4356_v31  ;;  %v2726_v57 = vsel %vm2694_vm8, %v7617_v18, %v2662_v37 }
 0x334   :  { %v4638_v21 = vpop.f32.mrb[107].mxu1  ;;  %v7642_v48 = vadd.f32 %v4550_v33, %v4549_v52  ;;  %v2758_v7 = vmul.f32 1.050701, %v2726_v57 }
 0x335   :  { %v7648_v39 = vadd.f32 %v4636_v6, %v2287_v10  ;;  %v4639_v60 = vadd.f32 %v4638_v21, %v4637_v27  ;;  %v2727_v36 = vsel %vm2695_vm9, %v7620_v59, %v2663_v46  ;;  %v2295_v59 = vadd.f32 %v7601_v15, %v7575_v30 }
 0x336   :  { %v2759_v20 = vmul.f32 1.050701, %v2727_v36 }
 0x337   :  { %v2538_v56 = vmin.f32 %v7648_v39, 0.0  ;;  %v7652_v34 = vadd.f32 %v4639_v60, %v2290_v1  ;;  %v2306_v60 = vadd.f32 %v7613_v29, %v7575_v30  ;;  %vm2698_vm12 = vcmp.gt.f32.partialorder %v7648_v39, 0.0 }
 0x338   :  { %v4552_v17 = vpop.f32.mrb[92].mxu0  ;;  %v2786_v3 = vpack.c.bf16 %v2759_v20, %v2758_v7 }
 0x339   :  { %v2582_v26 = vmul.f32 1.442695, %v2538_v56  ;;  %v2539_v18 = vmin.f32 %v7652_v34, 0.0  ;;  %v4640_v8 = vpop.f32.mrb[108].mxu1  ;;  %v4553_v9 = vpop.f32.mrb[93].mxu0  ;;  %vm2699_vm13 = vcmp.gt.f32.partialorder %v7652_v34, 0.0 }
 0x33a   :  { %v4641_v19 = vpop.f32.mrb[109].mxu1  ;;  %v7655_v38 = vadd.f32 %v4553_v9, %v4552_v17  ;;  %v4555_v4 = vpop.f32.mrb[94].mxu0  ;;  %4790 = vmatprep.mubr.bf16.mxu0 %v2786_v3 }
 0x33b   :  { %v5338_v28 = vpop.eup %5337  ;;  %5341 = vpow2.f32 %v2582_v26  ;;  %v2584_v25 = vmul.f32 1.442695, %v2539_v18  ;;  %v4642_v53 = vadd.f32 %v4641_v19, %v4640_v8  ;;  %v4643_v14 = vpop.f32.mrb[110].mxu1 }
 0x33c   :  { %v4556_v42 = vpop.f32.mrb[95].mxu0  ;;  %v4357_v32 = vadd.f32 -1.0, %v5338_v28  ;;  %v4644_v2 = vpop.f32.mrb[111].mxu1 }
 0x33d   :  { %v7659_v43 = vadd.f32 %v4556_v42, %v4555_v4  ;;  %v5340_v58 = vpop.eup %5339  ;;  %5343 = vpow2.f32 %v2584_v25  ;;  %v7663_v47 = vadd.f32 %v4642_v53, %v2295_v59  ;;  %v4645_v35 = vadd.f32 %v4644_v2, %v4643_v14 }
 0x33e   :  { %v4358_v63 = vadd.f32 -1.0, %v5340_v58  ;;  %v2664_v15 = vmul.f32 1.6732632, %v4357_v32  ;;  %v2311_v53 = vadd.f32 %v7623_v44, %v7575_v30 }
 0x33f   :  { %v2540_v13 = vmin.f32 %v7663_v47, 0.0  ;;  %v7667_v22 = vadd.f32 %v4645_v35, %v2298_v45  ;;  %vm2700_vm14 = vcmp.gt.f32.partialorder %v7663_v47, 0.0 }
 0x340   :  { %v2665_v11 = vmul.f32 1.6732632, %v4358_v63  ;;  %v2728_v61 = vsel %vm2696_vm10, %v7631_v51, %v2664_v15  ;;  %v2303_v51 = vadd.f32 %v7609_v5, %v7575_v30  ;;  %v2314_v63 = vadd.f32 %v7627_v62, %v7575_v30 }
 0x341   :  { %v2586_v54 = vmul.f32 1.442695, %v2540_v13  ;;  %v2541_v24 = vmin.f32 %v7667_v22, 0.0  ;;  %v2760_v16 = vmul.f32 1.050701, %v2728_v61  ;;  %vm2701_vm15 = vcmp.gt.f32.partialorder %v7667_v22, 0.0 }
 0x342   :  { %v2729_v0 = vsel %vm2697_vm11, %v7634_v49, %v2665_v11 }
 0x343   :  { %v4558_v40 = vpop.f32.mrb[96].mxu0  ;;  %5345 = vpow2.f32 %v2586_v54  ;;  %v2588_v41 = vmul.f32 1.442695, %v2541_v24  ;;  %v4646_v23 = vpop.f32.mrb[112].mxu1  ;;  %v2761_v31 = vmul.f32 1.050701, %v2729_v0 }
 0x344   :  { %v4559_v12 = vpop.f32.mrb[97].mxu0  ;;  %v4647_v52 = vpop.f32.mrb[113].mxu1 }
 0x345   :  { %v7673_v55 = vadd.f32 %v4559_v12, %v4558_v40  ;;  %v4561_v37 = vpop.f32.mrb[98].mxu0  ;;  %v5342_v10 = vpop.eup %5341  ;;  %5347 = vpow2.f32 %v2588_v41  ;;  %v4648_v6 = vadd.f32 %v4647_v52, %v4646_v23  ;;  %v2787_v21 = vpack.c.bf16 %v2761_v31, %v2760_v16 }
 0x346   :  { %v4649_v27 = vpop.f32.mrb[114].mxu1  ;;  %v4562_v33 = vpop.f32.mrb[99].mxu0  ;;  %v4359_v49 = vadd.f32 -1.0, %v5342_v10 }
 0x347   :  { %v7677_v46 = vadd.f32 %v4562_v33, %v4561_v37  ;;  %v4650_v57 = vpop.f32.mrb[115].mxu1  ;;  %v5344_v1 = vpop.eup %5343  ;;  %v7681_v36 = vadd.f32 %v4648_v6, %v2303_v51  ;;  %4791 = vmatmul.mubr.bf16.gmra.mrb[120].mxu0 %v2787_v21 }
 0x348   :  { %v4651_v56 = vadd.f32 %v4650_v57, %v4649_v27  ;;  %v4360_v7 = vadd.f32 -1.0, %v5344_v1  ;;  %v2666_v20 = vmul.f32 1.6732632, %v4359_v49 }
 0x349   :  { %v2542_v5 = vmin.f32 %v7681_v36, 0.0  ;;  %vm2702_vm0 = vcmp.gt.f32.partialorder %v7681_v36, 0.0 }
 0x34a   :  { %v7685_v17 = vadd.f32 %v4651_v56, %v2306_v60  ;;  %v2667_v26 = vmul.f32 1.6732632, %v4360_v7  ;;  %v2730_v18 = vsel %vm2698_vm12, %v7648_v39, %v2666_v20 }
 0x34b   :  { %v2590_v8 = vmul.f32 1.442695, %v2542_v5  ;;  %v2762_v3 = vmul.f32 1.050701, %v2730_v18 }
 0x34c   :  { %v2543_v29 = vmin.f32 %v7685_v17, 0.0  ;;  %v2731_v9 = vsel %vm2699_vm13, %v7652_v34, %v2667_v26  ;;  %v2322_v26 = vadd.f32 %v7642_v48, %v7575_v30  ;;  %vm2703_vm1 = vcmp.gt.f32.partialorder %v7685_v17, 0.0 }
 0x34d   :  { %v5346_v19 = vpop.eup %5345  ;;  %5349 = vpow2.f32 %v2590_v8  ;;  %v2763_v25 = vmul.f32 1.050701, %v2731_v9 }
 0x34e   :  { %v2592_v4 = vmul.f32 1.442695, %v2543_v29  ;;  %v4564_v28 = vpop.f32.mrb[100].mxu0  ;;  %v4361_v14 = vadd.f32 -1.0, %v5346_v19 }
 0x34f   :  { %v4652_v59 = vpop.f32.mrb[116].mxu1  ;;  %v4565_v42 = vpop.f32.mrb[101].mxu0  ;;  %v2788_v35 = vpack.c.bf16 %v2763_v25, %v2762_v3 }
 0x350   :  { %v4653_v39 = vpop.f32.mrb[117].mxu1  ;;  %v5348_v32 = vpop.eup %5347  ;;  %5351 = vpow2.f32 %v2592_v4  ;;  %v7693_v2 = vadd.f32 %v4565_v42, %v4564_v28  ;;  %v2668_v61 = vmul.f32 1.6732632, %v4361_v14 }
 0x351   :  { %v4654_v58 = vadd.f32 %v4653_v39, %v4652_v59  ;;  %v4567_v45 = vpop.f32.mrb[102].mxu0  ;;  %v4655_v34 = vpop.f32.mrb[118].mxu1  ;;  %v4362_v15 = vadd.f32 -1.0, %v5348_v32  ;;  %4794 = vmatprep.mubr.bf16.mxu0 %v2788_v35 }
 0x352   :  { %v4568_v13 = vpop.f32.mrb[103].mxu0  ;;  %v4656_v11 = vpop.f32.mrb[119].mxu1  ;;  %v2732_v0 = vsel %vm2700_vm14, %v7663_v47, %v2668_v61  ;;  %v2330_v61 = vadd.f32 %v7659_v43, %v7575_v30 }
 0x353   :  { %v7698_v44 = vadd.f32 %v4654_v58, %v2311_v53  ;;  %v7700_v54 = vadd.f32 %v4568_v13, %v4567_v45  ;;  %v4657_v24 = vadd.f32 %v4656_v11, %v4655_v34  ;;  %v2669_v40 = vmul.f32 1.6732632, %v4362_v15 }
 0x354   :  { %v2764_v23 = vmul.f32 1.050701, %v2732_v0 }
 0x355   :  { %v2544_v16 = vmin.f32 %v7698_v44, 0.0  ;;  %v7705_v62 = vadd.f32 %v4657_v24, %v2314_v63  ;;  %v2733_v41 = vsel %vm2701_vm15, %v7667_v22, %v2669_v40  ;;  %v2319_v22 = vadd.f32 %v7637_v50, %v7575_v30 }
 0x356   :  { %v2765_v52 = vmul.f32 1.050701, %v2733_v41  ;;  %v2327_v63 = vadd.f32 %v7655_v38, %v7575_v30  ;;  %vm2704_vm2 = vcmp.gt.f32.partialorder %v7698_v44, 0.0 }
 0x357   :  { %v2594_v12 = vmul.f32 1.442695, %v2544_v16  ;;  %v2545_v31 = vmin.f32 %v7705_v62, 0.0  ;;  %v5350_v37 = vpop.eup %5349  ;;  %vm2705_vm3 = vcmp.gt.f32.partialorder %v7705_v62, 0.0 }
 0x358   :  { %v2789_v6 = vpack.c.bf16 %v2765_v52, %v2764_v23  ;;  %v4363_v27 = vadd.f32 -1.0, %v5350_v37 }
 0x359   :  { %5353 = vpow2.f32 %v2594_v12  ;;  %v2596_v10 = vmul.f32 1.442695, %v2545_v31 }
 0x35a   :  { %v4570_v51 = vpop.f32.mrb[104].mxu0  ;;  %v4658_v47 = vpop.f32.mrb[120].mxu1  ;;  %4795 = vmatmul.mubr.bf16.gmra.mrb[124].mxu0 %v2789_v6  ;;  %v2670_v5 = vmul.f32 1.6732632, %v4363_v27 }
 0x35b   :  { %v4571_v33 = vpop.f32.mrb[105].mxu0  ;;  %v5352_v21 = vpop.eup %5351  ;;  %5355 = vpow2.f32 %v2596_v10 }
 0x35c   :  { %v7709_v49 = vadd.f32 %v4571_v33, %v4570_v51  ;;  %v4659_v57 = vpop.f32.mrb[121].mxu1  ;;  %v4573_v1 = vpop.f32.mrb[106].mxu0  ;;  %v4364_v60 = vadd.f32 -1.0, %v5352_v21  ;;  %v2734_v19 = vsel %vm2702_vm0, %v7681_v36, %v2670_v5 }
 0x35d   :  { %v4660_v56 = vadd.f32 %v4659_v57, %v4658_v47  ;;  %v4661_v7 = vpop.f32.mrb[122].mxu1  ;;  %v4574_v20 = vpop.f32.mrb[107].mxu0  ;;  %v2766_v48 = vmul.f32 1.050701, %v2734_v19  ;;  %v5049_v19 = vld [vmem:[#allocation10 + $0x20] sm:$0xff]  }
 0x35e   :  { %v7716_v18 = vadd.f32 %v4574_v20, %v4573_v1  ;;  %v4662_v8 = vpop.f32.mrb[123].mxu1  ;;  %v2671_v3 = vmul.f32 1.6732632, %v4364_v60  ;;  %v2338_v20 = vadd.f32 %v7677_v46, %v7575_v30 }
 0x35f   :  { %v7718_v29 = vadd.f32 %v4660_v56, %v2319_v22  ;;  %v4663_v9 = vadd.f32 %v4662_v8, %v4661_v7 }
 0x360   :  { %v2735_v28 = vsel %vm2703_vm1, %v7685_v17, %v2671_v3  ;;  %v5048_v3 = vld [vmem:[#allocation10 + $0x18] sm:$0xff]  }
 0x361   :  { %v2546_v50 = vmin.f32 %v7718_v29, 0.0  ;;  %v7723_v4 = vadd.f32 %v4663_v9, %v2322_v26  ;;  %v2767_v59 = vmul.f32 1.050701, %v2735_v28  ;;  %vm2706_vm4 = vcmp.gt.f32.partialorder %v7718_v29, 0.0  ;;  %4820 = vmatprep.subr.bf16.mxu1 %v5048_v3 }
 0x362   :  { %4821 = vmatpush3.bf16.msra.mxu1 %v5048_v3 }
 0x363   :  { %v2598_v25 = vmul.f32 1.442695, %v2546_v50  ;;  %v2547_v53 = vmin.f32 %v7723_v4, 0.0  ;;  %v5354_v14 = vpop.eup %5353  ;;  %v2790_v32 = vpack.c.bf16 %v2767_v59, %v2766_v48  ;;  %vm2707_vm5 = vcmp.gt.f32.partialorder %v7723_v4, 0.0  ;;  %4822 = vmatprep.subr.bf16.mxu1 %v5049_v19 }
 0x364   :  { %v4576_v42 = vpop.f32.mrb[108].mxu0  ;;  %v4664_v39 = vpop.f32.mrb[124].mxu1  ;;  %v4365_v58 = vadd.f32 -1.0, %v5354_v14 }
 0x365   :  { %5357 = vpow2.f32 %v2598_v25  ;;  %v2600_v36 = vmul.f32 1.442695, %v2547_v53  ;;  %v4577_v45 = vpop.f32.mrb[109].mxu0  ;;  %v4665_v34 = vpop.f32.mrb[125].mxu1  ;;  %4798 = vmatprep.mubr.bf16.mxu0 %v2790_v32  ;;  %v2343_v53 = vadd.f32 %v7693_v2, %v7575_v30 }
 0x366   :  { %v5356_v35 = vpop.eup %5355  ;;  %v7729_v15 = vadd.f32 %v4577_v45, %v4576_v42  ;;  %v4666_v17 = vadd.f32 %v4665_v34, %v4664_v39  ;;  %v4579_v13 = vpop.f32.mrb[110].mxu0  ;;  %v2672_v16 = vmul.f32 1.6732632, %v4365_v58  ;;  %v2346_v34 = vadd.f32 %v7700_v54, %v7575_v30  ;;  %4823 = vmatpush3.bf16.msra.mxu1 %v5049_v19 }
 0x367   :  { %v4667_v11 = vpop.f32.mrb[126].mxu1  ;;  %v4366_v24 = vadd.f32 -1.0, %v5356_v35  ;;  %5359 = vpow2.f32 %v2600_v36  ;;  %v4580_v40 = vpop.f32.mrb[111].mxu0 }
 0x368   :  { %v4668_v0 = vpop.f32.mrb[127].mxu1  ;;  %v7734_v41 = vadd.f32 %v4666_v17, %v2327_v63  ;;  %v7736_v23 = vadd.f32 %v4580_v40, %v4579_v13  ;;  %v2736_v31 = vsel %vm2704_vm2, %v7698_v44, %v2672_v16  ;;  %v2335_v44 = vadd.f32 %v7673_v55, %v7575_v30 }
 0x369   :  { %v4669_v38 = vadd.f32 %v4668_v0, %v4667_v11  ;;  %v2673_v12 = vmul.f32 1.6732632, %v4366_v24  ;;  %v2768_v10 = vmul.f32 1.050701, %v2736_v31 }
 0x36a   :  { %v2548_v52 = vmin.f32 %v7734_v41, 0.0  ;;  %vm2708_vm6 = vcmp.gt.f32.partialorder %v7734_v41, 0.0 }
 0x36b   :  { %v7741_v43 = vadd.f32 %v4669_v38, %v2330_v61  ;;  %v2737_v37 = vsel %vm2705_vm3, %v7705_v62, %v2673_v12  ;;  %v2351_v38 = vadd.f32 %v7709_v49, %v7575_v30 }
 0x36c   :  { %v2602_v51 = vmul.f32 1.442695, %v2548_v52  ;;  %v2769_v27 = vmul.f32 1.050701, %v2737_v37 }
 0x36d   :  { %v2549_v6 = vmin.f32 %v7741_v43, 0.0  ;;  %v4670_v47 = vpop.f32.mrb[128].mxu1  ;;  %vm2709_vm7 = vcmp.gt.f32.partialorder %v7741_v43, 0.0 }
 0x36e   :  { %5361 = vpow2.f32 %v2602_v51  ;;  %v4671_v21 = vpop.f32.mrb[129].mxu1  ;;  %v2791_v57 = vpack.c.bf16 %v2769_v27, %v2768_v10 }
 0x36f   :  { %v2604_v33 = vmul.f32 1.442695, %v2549_v6  ;;  %v5358_v1 = vpop.eup %5357  ;;  %v4672_v22 = vadd.f32 %v4671_v21, %v4670_v47  ;;  %v4673_v60 = vpop.f32.mrb[130].mxu1  ;;  %v2354_v6 = vadd.f32 %v7716_v18, %v7575_v30 }
 0x370   :  { %v4367_v56 = vadd.f32 -1.0, %v5358_v1  ;;  %v4674_v7 = vpop.f32.mrb[131].mxu1  ;;  %4799 = vmatmul.mubr.bf16.gmra.mrb[128].mxu0 %v2791_v57 }
 0x371   :  { %5363 = vpow2.f32 %v2604_v33  ;;  %v5360_v62 = vpop.eup %5359  ;;  %v7749_v5 = vadd.f32 %v4672_v22, %v2335_v44  ;;  %v4675_v26 = vadd.f32 %v4674_v7, %v4673_v60 }
 0x372   :  { %v4368_v8 = vadd.f32 -1.0, %v5360_v62  ;;  %v2674_v9 = vmul.f32 1.6732632, %v4367_v56 }
 0x373   :  { %v2550_v50 = vmin.f32 %v7749_v5, 0.0  ;;  %v7752_v55 = vadd.f32 %v4675_v26, %v2338_v20  ;;  %vm2710_vm8 = vcmp.gt.f32.partialorder %v7749_v5, 0.0  ;;  %v2359_v26 = vadd.f32 %v7729_v15, %v7575_v30 }
 0x374   :  { %v2675_v28 = vmul.f32 1.6732632, %v4368_v8  ;;  %v2738_v25 = vsel %vm2706_vm4, %v7718_v29, %v2674_v9 }
 0x375   :  { %v2606_v48 = vmul.f32 1.442695, %v2550_v50  ;;  %v2551_v46 = vmin.f32 %v7752_v55, 0.0  ;;  %v4676_v59 = vpop.f32.mrb[132].mxu1  ;;  %v2770_v63 = vmul.f32 1.050701, %v2738_v25 }
 0x376   :  { %v4677_v14 = vpop.f32.mrb[133].mxu1  ;;  %v2739_v42 = vsel %vm2707_vm5, %v7723_v4, %v2675_v28  ;;  %vm2711_vm9 = vcmp.gt.f32.partialorder %v7752_v55, 0.0 }
 0x377   :  { %5365 = vpow2.f32 %v2606_v48  ;;  %v2608_v39 = vmul.f32 1.442695, %v2551_v46  ;;  %v4678_v32 = vadd.f32 %v4677_v14, %v4676_v59  ;;  %v4679_v58 = vpop.f32.mrb[134].mxu1  ;;  %v2771_v36 = vmul.f32 1.050701, %v2739_v42 }
 0x378   :  { %v5362_v45 = vpop.eup %5361  ;;  %v4680_v35 = vpop.f32.mrb[135].mxu1  ;;  %v2362_v48 = vadd.f32 %v7736_v23, %v7575_v30 }
 0x379   :  { %v4369_v29 = vadd.f32 -1.0, %v5362_v45  ;;  %5367 = vpow2.f32 %v2608_v39  ;;  %v7763_v17 = vadd.f32 %v4678_v32, %v2343_v53  ;;  %v4681_v2 = vadd.f32 %v4680_v35, %v4679_v58 }
 0x37a   :  { %v2792_v4 = vpack.c.bf16 %v2771_v36, %v2770_v63 }
 0x37b   :  { %v5364_v13 = vpop.eup %5363  ;;  %v2552_v61 = vmin.f32 %v7763_v17, 0.0  ;;  %v7766_v24 = vadd.f32 %v4681_v2, %v2346_v34  ;;  %v2676_v40 = vmul.f32 1.6732632, %v4369_v29  ;;  %vm2712_vm10 = vcmp.gt.f32.partialorder %v7763_v17, 0.0 }
 0x37c   :  { %v4370_v11 = vadd.f32 -1.0, %v5364_v13  ;;  %4802 = vmatprep.mubr.bf16.mxu0 %v2792_v4 }
 0x37d   :  { %v2610_v54 = vmul.f32 1.442695, %v2552_v61  ;;  %v2553_v0 = vmin.f32 %v7766_v24, 0.0  ;;  %v4682_v16 = vpop.f32.mrb[136].mxu1  ;;  %v2740_v52 = vsel %vm2708_vm6, %v7734_v41, %v2676_v40  ;;  %vm2713_vm11 = vcmp.gt.f32.partialorder %v7766_v24, 0.0 }
 0x37e   :  { %v4683_v12 = vpop.f32.mrb[137].mxu1  ;;  %v2677_v31 = vmul.f32 1.6732632, %v4370_v11  ;;  %v2772_v33 = vmul.f32 1.050701, %v2740_v52 }
 0x37f   :  { %5369 = vpow2.f32 %v2610_v54  ;;  %v2612_v37 = vmul.f32 1.442695, %v2553_v0  ;;  %v4684_v10 = vadd.f32 %v4683_v12, %v4682_v16  ;;  %v4685_v51 = vpop.f32.mrb[138].mxu1  ;;  %v5050_v12 = vld [vmem:[#allocation10 + $0x28] sm:$0xff]  }
 0x380   :  { %v4686_v27 = vpop.f32.mrb[139].mxu1  ;;  %v2741_v47 = vsel %vm2709_vm7, %v7741_v43, %v2677_v31  ;;  %v5051_v31 = vld [vmem:[#allocation10 + $0x30] sm:$0xff]   ;;  %4824 = vmatprep.subr.bf16.mxu1 %v5050_v12 }
 0x381   :  { %v5366_v21 = vpop.eup %5365  ;;  %5371 = vpow2.f32 %v2612_v37  ;;  %v7777_v49 = vadd.f32 %v4684_v10, %v2351_v38  ;;  %v4687_v57 = vadd.f32 %v4686_v27, %v4685_v51  ;;  %v2773_v1 = vmul.f32 1.050701, %v2741_v47  ;;  %4825 = vmatpush3.bf16.msra.mxu1 %v5050_v12 }
 0x382   :  { %v4371_v41 = vadd.f32 -1.0, %v5366_v21  ;;  %4826 = vmatprep.subr.bf16.mxu1 %v5051_v31 }
 0x383   :  { %v5368_v44 = vpop.eup %5367  ;;  %v2554_v22 = vmin.f32 %v7777_v49, 0.0  ;;  %v2515_v60 = vadd.f32 %v4687_v57, %v2354_v6  ;;  %v2793_v56 = vpack.c.bf16 %v2773_v1, %v2772_v33  ;;  %vm2714_vm12 = vcmp.gt.f32.partialorder %v7777_v49, 0.0  ;;  %v5052_v33 = vld [vmem:[#allocation10 + $0x38] sm:$0xff]  }
 0x384   :  { %v4372_v7 = vadd.f32 -1.0, %v5368_v44  ;;  %v2678_v62 = vmul.f32 1.6732632, %v4371_v41 }
 0x385   :  { %v2614_v18 = vmul.f32 1.442695, %v2554_v22  ;;  %v2555_v20 = vmin.f32 %v2515_v60, 0.0  ;;  %v4688_v43 = vpop.f32.mrb[140].mxu1  ;;  %4803 = vmatmul.mubr.bf16.gmra.mrb[132].mxu0 %v2793_v56  ;;  %vm2715_vm13 = vcmp.gt.f32.partialorder %v2515_v60, 0.0  ;;  %4827 = vmatpush3.bf16.msra.mxu1 %v5051_v31 }
 0x386   :  { %v4689_v8 = vpop.f32.mrb[141].mxu1  ;;  %v2679_v9 = vmul.f32 1.6732632, %v4372_v7  ;;  %v2742_v3 = vsel %vm2710_vm8, %v7749_v5, %v2678_v62  ;;  %4828 = vmatprep.subr.bf16.mxu1 %v5052_v33  ;;  %v7797_v22 = vld [vmem:[%s8026_s6] ss:$0 sm:$0xff] }
 0x387   :  { %5373 = vpow2.f32 %v2614_v18  ;;  %v2616_v19 = vmul.f32 1.442695, %v2555_v20  ;;  %v4690_v50 = vadd.f32 %v4689_v8, %v4688_v43  ;;  %v4691_v28 = vpop.f32.mrb[142].mxu1  ;;  %v2774_v25 = vmul.f32 1.050701, %v2742_v3 }
 0x388   :  { %v4692_v46 = vpop.f32.mrb[143].mxu1  ;;  %v2743_v59 = vsel %vm2711_vm9, %v7752_v55, %v2679_v9 }
 0x389   :  { %v5370_v53 = vpop.eup %5369  ;;  %5375 = vpow2.f32 %v2616_v19  ;;  %v2520_v15 = vadd.f32 %v4690_v50, %v2359_v26  ;;  %v4693_v14 = vadd.f32 %v4692_v46, %v4691_v28  ;;  %v2775_v42 = vmul.f32 1.050701, %v2743_v59  ;;  %4829 = vmatpush3.bf16.msra.mxu1 %v5052_v33 }
 0x38a   :  { %v4373_v39 = vadd.f32 -1.0, %v5370_v53 }
 0x38b   :  { %v5372_v5 = vpop.eup %5371  ;;  %v2556_v32 = vmin.f32 %v2520_v15, 0.0  ;;  %v2523_v58 = vadd.f32 %v4693_v14, %v2362_v48  ;;  %v2794_v36 = vpack.c.bf16 %v2775_v42, %v2774_v25  ;;  %vm2716_vm14 = vcmp.gt.f32.partialorder %v2520_v15, 0.0 }
 0x38c   :  { %v4374_v45 = vadd.f32 -1.0, %v5372_v5  ;;  %v2680_v34 = vmul.f32 1.6732632, %v4373_v39 }
 0x38d   :  { %v2618_v35 = vmul.f32 1.442695, %v2556_v32  ;;  %v2557_v30 = vmin.f32 %v2523_v58, 0.0  ;;  %4806 = vmatprep.mubr.bf16.mxu0 %v2794_v36  ;;  %vm2717_vm15 = vcmp.gt.f32.partialorder %v2523_v58, 0.0 }
 0x38e   :  { %v2681_v23 = vmul.f32 1.6732632, %v4374_v45  ;;  %v2744_v55 = vsel %vm2712_vm10, %v7763_v17, %v2680_v34 }
 0x38f   :  { %5377 = vpow2.f32 %v2618_v35  ;;  %v2620_v63 = vmul.f32 1.442695, %v2557_v30  ;;  %v2776_v13 = vmul.f32 1.050701, %v2744_v55 }
 0x390   :  { %v2745_v29 = vsel %vm2713_vm11, %v7766_v24, %v2681_v23 }
 0x391   :  { %v5374_v2 = vpop.eup %5373  ;;  %5379 = vpow2.f32 %v2620_v63  ;;  %v2777_v4 = vmul.f32 1.050701, %v2745_v29 }
 0x392   :  { %v4375_v11 = vadd.f32 -1.0, %v5374_v2 }
 0x393   :  { %v5376_v61 = vpop.eup %5375  ;;  %v2795_v40 = vpack.c.bf16 %v2777_v4, %v2776_v13 }
 0x394   :  { %v4376_v54 = vadd.f32 -1.0, %v5376_v61  ;;  %v2682_v0 = vmul.f32 1.6732632, %v4375_v11 }
 0x395   :  { %4807 = vmatmul.mubr.bf16.gmra.mrb[136].mxu0 %v2795_v40 }
 0x396   :  { %v2683_v16 = vmul.f32 1.6732632, %v4376_v54  ;;  %v2746_v17 = vsel %vm2714_vm12, %v7777_v49, %v2682_v0 }
 0x397   :  { %v2778_v52 = vmul.f32 1.050701, %v2746_v17 }
 0x398   :  { %v2747_v38 = vsel %vm2715_vm13, %v2515_v60, %v2683_v16 }
 0x399   :  { %v5378_v24 = vpop.eup %5377  ;;  %v2779_v37 = vmul.f32 1.050701, %v2747_v38 }
 0x39a   :  { %v4377_v10 = vadd.f32 -1.0, %v5378_v24 }
 0x39b   :  { %v5380_v51 = vpop.eup %5379  ;;  %v2796_v6 = vpack.c.bf16 %v2779_v37, %v2778_v52 }
 0x39c   :  { %v4378_v27 = vadd.f32 -1.0, %v5380_v51  ;;  %v2684_v47 = vmul.f32 1.6732632, %v4377_v10 }
 0x39d   :  { %4810 = vmatprep.mubr.bf16.mxu0 %v2796_v6 }
 0x39e   :  { %v2685_v21 = vmul.f32 1.6732632, %v4378_v27  ;;  %v2748_v49 = vsel %vm2716_vm14, %v2520_v15, %v2684_v47 }
 0x39f   :  { %v2780_v1 = vmul.f32 1.050701, %v2748_v49 }
 0x3a0   :  { %v2749_v57 = vsel %vm2717_vm15, %v2523_v58, %v2685_v21 }
 0x3a1   :  { %v2781_v41 = vmul.f32 1.050701, %v2749_v57 }
 0x3a3   :  { %v2797_v44 = vpack.c.bf16 %v2781_v41, %v2780_v1 }
 0x3a5   :  { %4811 = vmatmul.mubr.bf16.gmra.mrb[140].mxu0 %v2797_v44 }
 0x3cf   :  { %v4784_v60 = vpop.f32.mrb[112].mxu0 }
 0x3d0   :  { %v2912_v56 = vadd.f32 %v4784_v60, %v7797_v22  ;;  %v2903_v7 = vpop.f32.mrb[113].mxu0 }
 0x3d1   :  { %v2904_v62 = vadd.f32 %v7797_v22, %v2903_v7  ;;  %v4785_v18 = vpop.f32.mrb[114].mxu0 }
 0x3d2   :  { %v3032_v20 = vmin.f32 %v2912_v56, 0.0  ;;  %v2915_v43 = vadd.f32 %v4785_v18, %v7797_v22  ;;  %v2906_v26 = vpop.f32.mrb[115].mxu0  ;;  %vm3192_vm0 = vcmp.gt.f32.partialorder %v2912_v56, 0.0 }
 0x3d3   :  { %v3030_v8 = vmin.f32 %v2904_v62, 0.0  ;;  %v2907_v9 = vadd.f32 %v7797_v22, %v2906_v26  ;;  %vm3190_vm1 = vcmp.gt.f32.partialorder %v2904_v62, 0.0 }
 0x3d4   :  { %v3066_v3 = vmul.f32 1.442695, %v3032_v20  ;;  %v3033_v19 = vmin.f32 %v2915_v43, 0.0  ;;  %vm3193_vm2 = vcmp.gt.f32.partialorder %v2915_v43, 0.0 }
 0x3d5   :  { %v3062_v50 = vmul.f32 1.442695, %v3030_v8  ;;  %v3031_v28 = vmin.f32 %v2907_v9, 0.0  ;;  %vm3191_vm3 = vcmp.gt.f32.partialorder %v2907_v9, 0.0 }
 0x3d6   :  { %5381 = vpow2.f32 %v3066_v3  ;;  %v3068_v48 = vmul.f32 1.442695, %v3033_v19  ;;  %v5053_v19 = vld [vmem:[#allocation11] sm:$0xff]  }
 0x3d7   :  { %5383 = vpow2.f32 %v3062_v50  ;;  %v3064_v46 = vmul.f32 1.442695, %v3031_v28  ;;  %4862 = vmatprep.subr.bf16.mxu0 %v5053_v19 }
 0x3d8   :  { %5385 = vpow2.f32 %v3068_v48  ;;  %4863 = vmatpush3.bf16.msra.mxu0 %v5053_v19 }
 0x3d9   :  { %5387 = vpow2.f32 %v3064_v46 }
 0x3e0   :  { %v5382_v59 = vpop.eup %5381 }
 0x3e1   :  { %v5384_v25 = vpop.eup %5383  ;;  %v4390_v53 = vadd.f32 -1.0, %v5382_v59 }
 0x3e2   :  { %v5386_v15 = vpop.eup %5385  ;;  %v4388_v14 = vadd.f32 -1.0, %v5384_v25 }
 0x3e3   :  { %v5388_v42 = vpop.eup %5387  ;;  %v3160_v39 = vmul.f32 1.6732632, %v4390_v53  ;;  %v4391_v5 = vadd.f32 -1.0, %v5386_v15 }
 0x3e4   :  { %v3158_v32 = vmul.f32 1.6732632, %v4388_v14  ;;  %v4389_v58 = vadd.f32 -1.0, %v5388_v42 }
 0x3e5   :  { %v3224_v36 = vsel %vm3192_vm0, %v2912_v56, %v3160_v39  ;;  %v3161_v45 = vmul.f32 1.6732632, %v4391_v5 }
 0x3e6   :  { %v3222_v34 = vsel %vm3190_vm1, %v2904_v62, %v3158_v32  ;;  %v3159_v35 = vmul.f32 1.6732632, %v4389_v58  ;;  %v3256_v23 = vmul.f32 1.050701, %v3224_v36 }
 0x3e7   :  { %v3225_v30 = vsel %vm3193_vm2, %v2915_v43, %v3161_v45  ;;  %v3254_v29 = vmul.f32 1.050701, %v3222_v34 }
 0x3e8   :  { %v3257_v55 = vmul.f32 1.050701, %v3225_v30  ;;  %v3223_v63 = vsel %vm3191_vm3, %v2907_v9, %v3159_v35 }
 0x3e9   :  { %v3255_v2 = vmul.f32 1.050701, %v3223_v63 }
 0x3ea   :  { %v3287_v13 = vpack.c.bf16 %v3257_v55, %v3256_v23 }
 0x3eb   :  { %v3286_v4 = vpack.c.bf16 %v3255_v2, %v3254_v29 }
 0x3ed   :  { %4830 = vmatprep.mubr.bf16.mxu1 %v3286_v4 }
 0x3ee   :  { %4831 = vmatmul.mubr.bf16.vlgmr.msra.gmra.mrb[144].mxu1 %v3287_v13 }
 0x3fa   :  { %v4788_v11 = vpop.f32.mrb[116].mxu0 }
 0x3fb   :  { %v2928_v61 = vadd.f32 %v4788_v11, %v7797_v22  ;;  %v2919_v40 = vpop.f32.mrb[117].mxu0 }
 0x3fc   :  { %v2920_v54 = vadd.f32 %v7797_v22, %v2919_v40  ;;  %v4789_v0 = vpop.f32.mrb[118].mxu0 }
 0x3fd   :  { %v3036_v16 = vmin.f32 %v2928_v61, 0.0  ;;  %v2931_v17 = vadd.f32 %v4789_v0, %v7797_v22  ;;  %v2922_v38 = vpop.f32.mrb[119].mxu0  ;;  %vm3196_vm4 = vcmp.gt.f32.partialorder %v2928_v61, 0.0 }
 0x3fe   :  { %v3034_v12 = vmin.f32 %v2920_v54, 0.0  ;;  %v2923_v31 = vadd.f32 %v7797_v22, %v2922_v38  ;;  %vm3194_vm5 = vcmp.gt.f32.partialorder %v2920_v54, 0.0 }
 0x3ff   :  { %v3074_v24 = vmul.f32 1.442695, %v3036_v16  ;;  %v3037_v52 = vmin.f32 %v2931_v17, 0.0  ;;  %vm3197_vm6 = vcmp.gt.f32.partialorder %v2931_v17, 0.0 }
 0x400   :  { %v3070_v37 = vmul.f32 1.442695, %v3034_v12  ;;  %v3035_v10 = vmin.f32 %v2923_v31, 0.0  ;;  %vm3195_vm7 = vcmp.gt.f32.partialorder %v2923_v31, 0.0 }
 0x401   :  { %5389 = vpow2.f32 %v3074_v24  ;;  %v3076_v51 = vmul.f32 1.442695, %v3037_v52 }
 0x402   :  { %5391 = vpow2.f32 %v3070_v37  ;;  %v3072_v6 = vmul.f32 1.442695, %v3035_v10 }
 0x403   :  { %5393 = vpow2.f32 %v3076_v51 }
 0x404   :  { %5395 = vpow2.f32 %v3072_v6 }
 0x40b   :  { %v5390_v27 = vpop.eup %5389 }
 0x40c   :  { %v5392_v47 = vpop.eup %5391  ;;  %v4394_v33 = vadd.f32 -1.0, %v5390_v27 }
 0x40d   :  { %v5394_v21 = vpop.eup %5393  ;;  %v4392_v49 = vadd.f32 -1.0, %v5392_v47 }
 0x40e   :  { %v5396_v57 = vpop.eup %5395  ;;  %v3164_v1 = vmul.f32 1.6732632, %v4394_v33  ;;  %v4395_v41 = vadd.f32 -1.0, %v5394_v21 }
 0x40f   :  { %v3162_v44 = vmul.f32 1.6732632, %v4392_v49  ;;  %v4393_v60 = vadd.f32 -1.0, %v5396_v57 }
 0x410   :  { %v3228_v56 = vsel %vm3196_vm4, %v2928_v61, %v3164_v1  ;;  %v3165_v7 = vmul.f32 1.6732632, %v4395_v41 }
 0x411   :  { %v3226_v62 = vsel %vm3194_vm5, %v2920_v54, %v3162_v44  ;;  %v3163_v18 = vmul.f32 1.6732632, %v4393_v60  ;;  %v3260_v43 = vmul.f32 1.050701, %v3228_v56 }
 0x412   :  { %v3229_v20 = vsel %vm3197_vm6, %v2931_v17, %v3165_v7  ;;  %v3258_v9 = vmul.f32 1.050701, %v3226_v62 }
 0x413   :  { %v3261_v26 = vmul.f32 1.050701, %v3229_v20  ;;  %v3227_v8 = vsel %vm3195_vm7, %v2923_v31, %v3163_v18 }
 0x414   :  { %v3259_v3 = vmul.f32 1.050701, %v3227_v8 }
 0x415   :  { %v3289_v50 = vpack.c.bf16 %v3261_v26, %v3260_v43 }
 0x416   :  { %v3288_v28 = vpack.c.bf16 %v3259_v3, %v3258_v9 }
 0x418   :  { %4834 = vmatprep.mubr.bf16.mxu1 %v3288_v28 }
 0x419   :  { %4835 = vmatmul.mubr.bf16.gmra.mrb[148].mxu1 %v3289_v50 }
 0x41a   :  { %v4792_v48 = vpop.f32.mrb[120].mxu0 }
 0x41b   :  { %v2944_v46 = vadd.f32 %v4792_v48, %v7797_v22  ;;  %v2935_v59 = vpop.f32.mrb[121].mxu0 }
 0x41c   :  { %v2936_v25 = vadd.f32 %v7797_v22, %v2935_v59  ;;  %v4793_v53 = vpop.f32.mrb[122].mxu0 }
 0x41d   :  { %v3040_v15 = vmin.f32 %v2944_v46, 0.0  ;;  %v2947_v14 = vadd.f32 %v4793_v53, %v7797_v22  ;;  %v2938_v42 = vpop.f32.mrb[123].mxu0  ;;  %vm3200_vm8 = vcmp.gt.f32.partialorder %v2944_v46, 0.0 }
 0x41e   :  { %v3038_v39 = vmin.f32 %v2936_v25, 0.0  ;;  %v2939_v5 = vadd.f32 %v7797_v22, %v2938_v42  ;;  %vm3198_vm9 = vcmp.gt.f32.partialorder %v2936_v25, 0.0 }
 0x41f   :  { %v3082_v32 = vmul.f32 1.442695, %v3040_v15  ;;  %v3041_v58 = vmin.f32 %v2947_v14, 0.0  ;;  %vm3201_vm10 = vcmp.gt.f32.partialorder %v2947_v14, 0.0 }
 0x420   :  { %v3078_v36 = vmul.f32 1.442695, %v3038_v39  ;;  %v3039_v45 = vmin.f32 %v2939_v5, 0.0  ;;  %vm3199_vm11 = vcmp.gt.f32.partialorder %v2939_v5, 0.0 }
 0x421   :  { %5397 = vpow2.f32 %v3082_v32  ;;  %v3084_v34 = vmul.f32 1.442695, %v3041_v58 }
 0x422   :  { %5399 = vpow2.f32 %v3078_v36  ;;  %v3080_v35 = vmul.f32 1.442695, %v3039_v45 }
 0x423   :  { %5401 = vpow2.f32 %v3084_v34 }
 0x424   :  { %5403 = vpow2.f32 %v3080_v35 }
 0x42b   :  { %v5398_v30 = vpop.eup %5397 }
 0x42c   :  { %v5400_v23 = vpop.eup %5399  ;;  %v4398_v55 = vadd.f32 -1.0, %v5398_v30 }
 0x42d   :  { %v4796_v63 = vpop.f32.mrb[124].mxu0  ;;  %v5402_v29 = vpop.eup %5401  ;;  %v4396_v2 = vadd.f32 -1.0, %v5400_v23 }
 0x42e   :  { %v2960_v13 = vadd.f32 %v4796_v63, %v7797_v22  ;;  %v2951_v4 = vpop.f32.mrb[125].mxu0  ;;  %v5404_v11 = vpop.eup %5403  ;;  %v3168_v61 = vmul.f32 1.6732632, %v4398_v55  ;;  %v4399_v40 = vadd.f32 -1.0, %v5402_v29 }
 0x42f   :  { %v7813_v54 = vadd.f32 %v7797_v22, %v2951_v4  ;;  %v4797_v0 = vpop.f32.mrb[126].mxu0  ;;  %v3166_v16 = vmul.f32 1.6732632, %v4396_v2  ;;  %v4397_v17 = vadd.f32 -1.0, %v5404_v11 }
 0x430   :  { %v3044_v38 = vmin.f32 %v2960_v13, 0.0  ;;  %v2954_v12 = vpop.f32.mrb[127].mxu0  ;;  %v3232_v31 = vsel %vm3200_vm8, %v2944_v46, %v3168_v61  ;;  %v3169_v24 = vmul.f32 1.6732632, %v4399_v40  ;;  %v2963_v33 = vadd.f32 %v4797_v0, %v7797_v22 }
 0x431   :  { %v3042_v52 = vmin.f32 %v7813_v54, 0.0  ;;  %v3230_v37 = vsel %vm3198_vm9, %v2936_v25, %v3166_v16  ;;  %v3167_v10 = vmul.f32 1.6732632, %v4397_v17  ;;  %v3264_v6 = vmul.f32 1.050701, %v3232_v31 }
 0x432   :  { %v3090_v51 = vmul.f32 1.442695, %v3044_v38  ;;  %v3233_v27 = vsel %vm3201_vm10, %v2947_v14, %v3169_v24  ;;  %v2955_v57 = vadd.f32 %v7797_v22, %v2954_v12  ;;  %v3262_v1 = vmul.f32 1.050701, %v3230_v37 }
 0x433   :  { %v3086_v47 = vmul.f32 1.442695, %v3042_v52  ;;  %v3265_v21 = vmul.f32 1.050701, %v3233_v27  ;;  %v3231_v49 = vsel %vm3199_vm11, %v2939_v5, %v3167_v10  ;;  %v3045_v44 = vmin.f32 %v2963_v33, 0.0 }
 0x434   :  { %5405 = vpow2.f32 %v3090_v51  ;;  %v3263_v41 = vmul.f32 1.050701, %v3231_v49  ;;  %v3043_v60 = vmin.f32 %v2955_v57, 0.0  ;;  %vm3204_vm12 = vcmp.gt.f32.partialorder %v2960_v13, 0.0 }
 0x435   :  { %5407 = vpow2.f32 %v3086_v47  ;;  %v3291_v56 = vpack.c.bf16 %v3265_v21, %v3264_v6  ;;  %v3092_v7 = vmul.f32 1.442695, %v3045_v44  ;;  %vm3202_vm13 = vcmp.gt.f32.partialorder %v7813_v54, 0.0 }
 0x436   :  { %v3290_v62 = vpack.c.bf16 %v3263_v41, %v3262_v1  ;;  %v3088_v18 = vmul.f32 1.442695, %v3043_v60  ;;  %vm3205_vm14 = vcmp.gt.f32.partialorder %v2963_v33, 0.0  ;;  %vm3203_vm15 = vcmp.gt.f32.partialorder %v2955_v57, 0.0 }
 0x437   :  { %5409 = vpow2.f32 %v3092_v7 }
 0x438   :  { %4838 = vmatprep.mubr.bf16.mxu1 %v3290_v62  ;;  %5411 = vpow2.f32 %v3088_v18 }
 0x439   :  { %4839 = vmatmul.mubr.bf16.gmra.mrb[152].mxu1 %v3291_v56 }
 0x43e   :  { %v5406_v20 = vpop.eup %5405 }
 0x43f   :  { %v5408_v43 = vpop.eup %5407  ;;  %v4402_v26 = vadd.f32 -1.0, %v5406_v20 }
 0x440   :  { %v4400_v8 = vadd.f32 -1.0, %v5408_v43 }
 0x441   :  { %v3172_v9 = vmul.f32 1.6732632, %v4402_v26  ;;  %v5410_v28 = vpop.eup %5409 }
 0x442   :  { %v3170_v48 = vmul.f32 1.6732632, %v4400_v8  ;;  %v5412_v25 = vpop.eup %5411  ;;  %v4403_v53 = vadd.f32 -1.0, %v5410_v28 }
 0x443   :  { %v4800_v3 = vpop.f32.mrb[128].mxu0  ;;  %v3236_v42 = vsel %vm3204_vm12, %v2960_v13, %v3172_v9  ;;  %v4401_v39 = vadd.f32 -1.0, %v5412_v25 }
 0x444   :  { %v2976_v19 = vadd.f32 %v4800_v3, %v7797_v22  ;;  %v2967_v50 = vpop.f32.mrb[129].mxu0  ;;  %v3173_v32 = vmul.f32 1.6732632, %v4403_v53  ;;  %v3234_v45 = vsel %vm3202_vm13, %v7813_v54, %v3170_v48  ;;  %v3268_v23 = vmul.f32 1.050701, %v3236_v42  ;;  %v5054_v53 = vld [vmem:[#allocation11 + $0x8] sm:$0xff]  }
 0x445   :  { %v2968_v46 = vadd.f32 %v7797_v22, %v2967_v50  ;;  %v4801_v59 = vpop.f32.mrb[130].mxu0  ;;  %v3171_v34 = vmul.f32 1.6732632, %v4401_v39  ;;  %v3266_v4 = vmul.f32 1.050701, %v3234_v45  ;;  %4864 = vmatprep.subr.bf16.mxu0 %v5054_v53 }
 0x446   :  { %v3048_v15 = vmin.f32 %v2976_v19, 0.0  ;;  %v2970_v14 = vpop.f32.mrb[131].mxu0  ;;  %v2979_v36 = vadd.f32 %v4801_v59, %v7797_v22  ;;  %v3237_v55 = vsel %vm3205_vm14, %v2963_v33, %v3173_v32  ;;  %vm3208_vm0 = vcmp.gt.f32.partialorder %v2976_v19, 0.0  ;;  %4865 = vmatpush3.bf16.msra.mxu0 %v5054_v53  ;;  %v5056_v32 = vld [vmem:[#allocation11 + $0x18] sm:$0xff]  }
 0x447   :  { %v3046_v5 = vmin.f32 %v2968_v46, 0.0  ;;  %v2971_v30 = vadd.f32 %v7797_v22, %v2970_v14  ;;  %v3269_v29 = vmul.f32 1.050701, %v3237_v55  ;;  %v3235_v2 = vsel %vm3203_vm15, %v2955_v57, %v3171_v34 }
 0x448   :  { %v3098_v58 = vmul.f32 1.442695, %v3048_v15  ;;  %v3049_v63 = vmin.f32 %v2979_v36, 0.0  ;;  %v3267_v11 = vmul.f32 1.050701, %v3235_v2  ;;  %vm3206_vm1 = vcmp.gt.f32.partialorder %v2968_v46, 0.0 }
 0x449   :  { %v3094_v35 = vmul.f32 1.442695, %v3046_v5  ;;  %v3047_v13 = vmin.f32 %v2971_v30, 0.0  ;;  %v3293_v0 = vpack.c.bf16 %v3269_v29, %v3268_v23  ;;  %vm3209_vm2 = vcmp.gt.f32.partialorder %v2979_v36, 0.0  ;;  %v5055_v15 = vld [vmem:[#allocation11 + $0x10] sm:$0xff]  }
 0x44a   :  { %5413 = vpow2.f32 %v3098_v58  ;;  %v3100_v61 = vmul.f32 1.442695, %v3049_v63  ;;  %v3292_v16 = vpack.c.bf16 %v3267_v11, %v3266_v4  ;;  %vm3207_vm3 = vcmp.gt.f32.partialorder %v2971_v30, 0.0  ;;  %4866 = vmatprep.subr.bf16.mxu0 %v5055_v15  ;;  %v5057_v4 = vld [vmem:[#allocation11 + $0x20] sm:$0xff]  }
 0x44b   :  { %5415 = vpow2.f32 %v3094_v35  ;;  %v3096_v40 = vmul.f32 1.442695, %v3047_v13  ;;  %4867 = vmatpush3.bf16.msra.mxu0 %v5055_v15 }
 0x44c   :  { %5417 = vpow2.f32 %v3100_v61  ;;  %4842 = vmatprep.mubr.bf16.mxu1 %v3292_v16  ;;  %4868 = vmatprep.subr.bf16.mxu0 %v5056_v32 }
 0x44d   :  { %5419 = vpow2.f32 %v3096_v40  ;;  %4843 = vmatmul.mubr.bf16.gmra.mrb[156].mxu1 %v3293_v0 }
 0x44f   :  { %4869 = vmatpush3.bf16.msra.mxu0 %v5056_v32 }
 0x450   :  { %4870 = vmatprep.subr.bf16.mxu0 %v5057_v4 }
 0x453   :  { %4871 = vmatpush3.bf16.msra.mxu0 %v5057_v4 }
 0x454   :  { %v5414_v54 = vpop.eup %5413 }
 0x455   :  { %v5416_v17 = vpop.eup %5415  ;;  %v4406_v38 = vadd.f32 -1.0, %v5414_v54 }
 0x456   :  { %v4404_v12 = vadd.f32 -1.0, %v5416_v17  ;;  %v5418_v24 = vpop.eup %5417 }
 0x457   :  { %v3176_v31 = vmul.f32 1.6732632, %v4406_v38  ;;  %v5420_v10 = vpop.eup %5419  ;;  %v4407_v51 = vadd.f32 -1.0, %v5418_v24 }
 0x458   :  { %v3174_v52 = vmul.f32 1.6732632, %v4404_v12  ;;  %v4804_v37 = vpop.f32.mrb[132].mxu0  ;;  %v4405_v33 = vadd.f32 -1.0, %v5420_v10 }
 0x459   :  { %v7825_v6 = vadd.f32 %v4804_v37, %v7797_v22  ;;  %v2983_v27 = vpop.f32.mrb[133].mxu0  ;;  %v3240_v47 = vsel %vm3208_vm0, %v2976_v19, %v3176_v31  ;;  %v3177_v57 = vmul.f32 1.6732632, %v4407_v51 }
 0x45a   :  { %v7828_v21 = vadd.f32 %v7797_v22, %v2983_v27  ;;  %v4805_v49 = vpop.f32.mrb[134].mxu0  ;;  %v3238_v41 = vsel %vm3206_vm1, %v2968_v46, %v3174_v52  ;;  %v3175_v44 = vmul.f32 1.6732632, %v4405_v33  ;;  %v3272_v62 = vmul.f32 1.050701, %v3240_v47 }
 0x45b   :  { %v3052_v1 = vmin.f32 %v7825_v6, 0.0  ;;  %v7833_v56 = vadd.f32 %v4805_v49, %v7797_v22  ;;  %v2986_v7 = vpop.f32.mrb[135].mxu0  ;;  %v3241_v18 = vsel %vm3209_vm2, %v2979_v36, %v3177_v57  ;;  %v3270_v19 = vmul.f32 1.050701, %v3238_v41 }
 0x45c   :  { %v3050_v60 = vmin.f32 %v7828_v21, 0.0  ;;  %v7836_v43 = vadd.f32 %v7797_v22, %v2986_v7  ;;  %v3273_v26 = vmul.f32 1.050701, %v3241_v18  ;;  %v3239_v8 = vsel %vm3207_vm3, %v2971_v30, %v3175_v44 }
 0x45d   :  { %v3106_v20 = vmul.f32 1.442695, %v3052_v1  ;;  %v3053_v3 = vmin.f32 %v7833_v56, 0.0  ;;  %v3271_v50 = vmul.f32 1.050701, %v3239_v8  ;;  %vm3212_vm4 = vcmp.gt.f32.partialorder %v7825_v6, 0.0 }
 0x45e   :  { %v3102_v9 = vmul.f32 1.442695, %v3050_v60  ;;  %v3051_v28 = vmin.f32 %v7836_v43, 0.0  ;;  %v3295_v46 = vpack.c.bf16 %v3273_v26, %v3272_v62  ;;  %vm3210_vm5 = vcmp.gt.f32.partialorder %v7828_v21, 0.0 }
 0x45f   :  { %5421 = vpow2.f32 %v3106_v20  ;;  %v3108_v48 = vmul.f32 1.442695, %v3053_v3  ;;  %v3294_v25 = vpack.c.bf16 %v3271_v50, %v3270_v19  ;;  %vm3213_vm6 = vcmp.gt.f32.partialorder %v7833_v56, 0.0 }
 0x460   :  { %5423 = vpow2.f32 %v3102_v9  ;;  %v3104_v59 = vmul.f32 1.442695, %v3051_v28  ;;  %vm3211_vm7 = vcmp.gt.f32.partialorder %v7836_v43, 0.0 }
 0x461   :  { %5425 = vpow2.f32 %v3108_v48  ;;  %4846 = vmatprep.mubr.bf16.mxu1 %v3294_v25 }
 0x462   :  { %5427 = vpow2.f32 %v3104_v59  ;;  %4847 = vmatmul.mubr.bf16.gmra.mrb[160].mxu1 %v3295_v46 }
 0x468   :  { %v4808_v14 = vpop.f32.mrb[136].mxu0 }
 0x469   :  { %v5422_v42 = vpop.eup %5421  ;;  %v7841_v39 = vadd.f32 %v4808_v14, %v7797_v22  ;;  %v2999_v5 = vpop.f32.mrb[137].mxu0 }
 0x46a   :  { %v5424_v58 = vpop.eup %5423  ;;  %v4410_v36 = vadd.f32 -1.0, %v5422_v42  ;;  %v7844_v45 = vadd.f32 %v7797_v22, %v2999_v5  ;;  %v4809_v34 = vpop.f32.mrb[138].mxu0 }
 0x46b   :  { %v4408_v35 = vadd.f32 -1.0, %v5424_v58  ;;  %v3056_v30 = vmin.f32 %v7841_v39, 0.0  ;;  %v7848_v23 = vadd.f32 %v4809_v34, %v7797_v22  ;;  %v3002_v55 = vpop.f32.mrb[139].mxu0  ;;  %v5426_v63 = vpop.eup %5425  ;;  %vm3216_vm8 = vcmp.gt.f32.partialorder %v7841_v39, 0.0 }
 0x46c   :  { %v3180_v29 = vmul.f32 1.6732632, %v4410_v36  ;;  %v3054_v2 = vmin.f32 %v7844_v45, 0.0  ;;  %v7852_v13 = vadd.f32 %v7797_v22, %v3002_v55  ;;  %v5428_v11 = vpop.eup %5427  ;;  %v4411_v40 = vadd.f32 -1.0, %v5426_v63 }
 0x46d   :  { %v3178_v61 = vmul.f32 1.6732632, %v4408_v35  ;;  %v3114_v0 = vmul.f32 1.442695, %v3056_v30  ;;  %v3057_v16 = vmin.f32 %v7848_v23, 0.0  ;;  %v4409_v54 = vadd.f32 -1.0, %v5428_v11 }
 0x46e   :  { %v3110_v17 = vmul.f32 1.442695, %v3054_v2  ;;  %v3244_v38 = vsel %vm3212_vm4, %v7825_v6, %v3180_v29  ;;  %v3181_v12 = vmul.f32 1.6732632, %v4411_v40  ;;  %v3055_v10 = vmin.f32 %v7852_v13, 0.0 }
 0x46f   :  { %5429 = vpow2.f32 %v3114_v0  ;;  %v3242_v31 = vsel %vm3210_vm5, %v7828_v21, %v3178_v61  ;;  %v3179_v24 = vmul.f32 1.6732632, %v4409_v54  ;;  %v3116_v52 = vmul.f32 1.442695, %v3057_v16  ;;  %v5058_v0 = vld [vmem:[#allocation11 + $0x28] sm:$0xff]   ;;  %v5059_v16 = vld [vmem:[#allocation11 + $0x30] sm:$0xff]  }
 0x470   :  { %5431 = vpow2.f32 %v3110_v17  ;;  %v3245_v37 = vsel %vm3213_vm6, %v7833_v56, %v3181_v12  ;;  %v3276_v51 = vmul.f32 1.050701, %v3244_v38  ;;  %v3274_v47 = vmul.f32 1.050701, %v3242_v31  ;;  %4872 = vmatprep.subr.bf16.mxu0 %v5058_v0 }
 0x471   :  { %v3277_v27 = vmul.f32 1.050701, %v3245_v37  ;;  %v3243_v6 = vsel %vm3211_vm7, %v7836_v43, %v3179_v24  ;;  %5433 = vpow2.f32 %v3116_v52  ;;  %v3112_v49 = vmul.f32 1.442695, %v3055_v10  ;;  %4873 = vmatpush3.bf16.msra.mxu0 %v5058_v0  ;;  %v5060_v37 = vld [vmem:[#allocation11 + $0x38] sm:$0xff]  }
 0x472   :  { %v3275_v33 = vmul.f32 1.050701, %v3243_v6  ;;  %vm3217_vm9 = vcmp.gt.f32.partialorder %v7848_v23, 0.0  ;;  %vm3214_vm10 = vcmp.gt.f32.partialorder %v7844_v45, 0.0  ;;  %vm3215_vm11 = vcmp.gt.f32.partialorder %v7852_v13, 0.0  ;;  %4874 = vmatprep.subr.bf16.mxu0 %v5059_v16 }
 0x473   :  { %v3297_v21 = vpack.c.bf16 %v3277_v27, %v3276_v51  ;;  %5435 = vpow2.f32 %v3112_v49 }
 0x474   :  { %v3296_v57 = vpack.c.bf16 %v3275_v33, %v3274_v47 }
 0x475   :  { %4875 = vmatpush3.bf16.msra.mxu0 %v5059_v16 }
 0x476   :  { %4850 = vmatprep.mubr.bf16.mxu1 %v3296_v57  ;;  %4876 = vmatprep.subr.bf16.mxu0 %v5060_v37  ;;  %v7879_v57 = vld [vmem:[%s8028_s8] ss:$0 sm:$0xff] }
 0x477   :  { %4851 = vmatmul.mubr.bf16.gmra.mrb[164].mxu1 %v3297_v21 }
 0x478   :  { %v4812_v1 = vpop.f32.mrb[140].mxu0 }
 0x479   :  { %v5430_v41 = vpop.eup %5429  ;;  %v3024_v44 = vadd.f32 %v4812_v1, %v7797_v22  ;;  %v3015_v60 = vpop.f32.mrb[141].mxu0  ;;  %4877 = vmatpush3.bf16.msra.mxu0 %v5060_v37 }
 0x47a   :  { %v5432_v56 = vpop.eup %5431  ;;  %v4414_v7 = vadd.f32 -1.0, %v5430_v41  ;;  %v3016_v62 = vadd.f32 %v7797_v22, %v3015_v60  ;;  %v4813_v18 = vpop.f32.mrb[142].mxu0 }
 0x47b   :  { %v4412_v20 = vadd.f32 -1.0, %v5432_v56  ;;  %v3060_v43 = vmin.f32 %v3024_v44, 0.0  ;;  %v3027_v26 = vadd.f32 %v4813_v18, %v7797_v22  ;;  %v3018_v8 = vpop.f32.mrb[143].mxu0  ;;  %v5434_v9 = vpop.eup %5433  ;;  %vm3220_vm12 = vcmp.gt.f32.partialorder %v3024_v44, 0.0 }
 0x47c   :  { %v3184_v3 = vmul.f32 1.6732632, %v4414_v7  ;;  %v3058_v19 = vmin.f32 %v3016_v62, 0.0  ;;  %v3019_v50 = vadd.f32 %v7797_v22, %v3018_v8  ;;  %v4415_v28 = vadd.f32 -1.0, %v5434_v9 }
 0x47d   :  { %v3122_v48 = vmul.f32 1.442695, %v3060_v43  ;;  %v3061_v46 = vmin.f32 %v3027_v26, 0.0  ;;  %v3182_v25 = vmul.f32 1.6732632, %v4412_v20  ;;  %v5436_v14 = vpop.eup %5435  ;;  %vm3218_vm13 = vcmp.gt.f32.partialorder %v3016_v62, 0.0 }
 0x47e   :  { %v3248_v59 = vsel %vm3216_vm8, %v7841_v39, %v3184_v3  ;;  %v3118_v53 = vmul.f32 1.442695, %v3058_v19  ;;  %v3059_v15 = vmin.f32 %v3019_v50, 0.0  ;;  %v3185_v42 = vmul.f32 1.6732632, %v4415_v28 }
 0x47f   :  { %5437 = vpow2.f32 %v3122_v48  ;;  %v4413_v5 = vadd.f32 -1.0, %v5436_v14  ;;  %v3124_v32 = vmul.f32 1.442695, %v3061_v46  ;;  %v3280_v58 = vmul.f32 1.050701, %v3248_v59 }
 0x480   :  { %5439 = vpow2.f32 %v3118_v53  ;;  %v3249_v22 = vsel %vm3217_vm9, %v7848_v23, %v3185_v42  ;;  %v3120_v36 = vmul.f32 1.442695, %v3059_v15  ;;  %v3246_v34 = vsel %vm3214_vm10, %v7844_v45, %v3182_v25 }
 0x481   :  { %v3281_v39 = vmul.f32 1.050701, %v3249_v22  ;;  %v3183_v35 = vmul.f32 1.6732632, %v4413_v5  ;;  %5441 = vpow2.f32 %v3124_v32  ;;  %v3278_v63 = vmul.f32 1.050701, %v3246_v34 }
 0x482   :  { %5443 = vpow2.f32 %v3120_v36  ;;  %vm3221_vm14 = vcmp.gt.f32.partialorder %v3027_v26, 0.0  ;;  %vm3219_vm15 = vcmp.gt.f32.partialorder %v3019_v50, 0.0 }
 0x483   :  { %v3247_v30 = vsel %vm3215_vm11, %v7852_v13, %v3183_v35  ;;  %v3299_v55 = vpack.c.bf16 %v3281_v39, %v3280_v58 }
 0x484   :  { %v3279_v29 = vmul.f32 1.050701, %v3247_v30 }
 0x486   :  { %v3298_v2 = vpack.c.bf16 %v3279_v29, %v3278_v63 }
 0x488   :  { %4854 = vmatprep.mubr.bf16.mxu1 %v3298_v2 }
 0x489   :  { %v5438_v4 = vpop.eup %5437  ;;  %4855 = vmatmul.mubr.bf16.gmra.mrb[168].mxu1 %v3299_v55 }
 0x48a   :  { %v5440_v11 = vpop.eup %5439  ;;  %v4418_v61 = vadd.f32 -1.0, %v5438_v4 }
 0x48b   :  { %v4416_v23 = vadd.f32 -1.0, %v5440_v11  ;;  %v5442_v40 = vpop.eup %5441 }
 0x48c   :  { %v3188_v45 = vmul.f32 1.6732632, %v4418_v61  ;;  %v5444_v54 = vpop.eup %5443  ;;  %v4419_v38 = vadd.f32 -1.0, %v5442_v40 }
 0x48d   :  { %v3186_v17 = vmul.f32 1.6732632, %v4416_v23  ;;  %v4417_v12 = vadd.f32 -1.0, %v5444_v54 }
 0x48e   :  { %v3252_v13 = vsel %vm3220_vm12, %v3024_v44, %v3188_v45  ;;  %v3189_v31 = vmul.f32 1.6732632, %v4419_v38 }
 0x48f   :  { %v3250_v24 = vsel %vm3218_vm13, %v3016_v62, %v3186_v17  ;;  %v3187_v52 = vmul.f32 1.6732632, %v4417_v12  ;;  %v3284_v51 = vmul.f32 1.050701, %v3252_v13 }
 0x490   :  { %v3253_v10 = vsel %vm3221_vm14, %v3027_v26, %v3189_v31  ;;  %v3282_v47 = vmul.f32 1.050701, %v3250_v24 }
 0x491   :  { %v3285_v27 = vmul.f32 1.050701, %v3253_v10  ;;  %v3251_v6 = vsel %vm3219_vm15, %v3019_v50, %v3187_v52 }
 0x492   :  { %v3283_v33 = vmul.f32 1.050701, %v3251_v6 }
 0x493   :  { %v3301_v49 = vpack.c.bf16 %v3285_v27, %v3284_v51 }
 0x494   :  { %v3300_v21 = vpack.c.bf16 %v3283_v33, %v3282_v47 }
 0x496   :  { %4858 = vmatprep.mubr.bf16.mxu1 %v3300_v21 }
 0x497   :  { %4859 = vmatmul.mubr.bf16.gmra.mrb[172].mxu1 %v3301_v49 }
 0x4c1   :  { %v4832_v1 = vpop.f32.mrb[144].mxu1 }
 0x4c2   :  { %v3416_v41 = vadd.f32 %v4832_v1, %v7879_v57  ;;  %v3407_v44 = vpop.f32.mrb[145].mxu1 }
 0x4c3   :  { %v3408_v60 = vadd.f32 %v7879_v57, %v3407_v44  ;;  %v4833_v56 = vpop.f32.mrb[146].mxu1 }
 0x4c4   :  { %v3536_v7 = vmin.f32 %v3416_v41, 0.0  ;;  %v3419_v62 = vadd.f32 %v4833_v56, %v7879_v57  ;;  %v3410_v18 = vpop.f32.mrb[147].mxu1  ;;  %vm3696_vm0 = vcmp.gt.f32.partialorder %v3416_v41, 0.0 }
 0x4c5   :  { %v3534_v20 = vmin.f32 %v3408_v60, 0.0  ;;  %v3411_v43 = vadd.f32 %v7879_v57, %v3410_v18  ;;  %vm3694_vm1 = vcmp.gt.f32.partialorder %v3408_v60, 0.0 }
 0x4c6   :  { %v3570_v26 = vmul.f32 1.442695, %v3536_v7  ;;  %v3537_v8 = vmin.f32 %v3419_v62, 0.0  ;;  %vm3697_vm2 = vcmp.gt.f32.partialorder %v3419_v62, 0.0 }
 0x4c7   :  { %v3566_v9 = vmul.f32 1.442695, %v3534_v20  ;;  %v3535_v3 = vmin.f32 %v3411_v43, 0.0  ;;  %vm3695_vm3 = vcmp.gt.f32.partialorder %v3411_v43, 0.0 }
 0x4c8   :  { %5445 = vpow2.f32 %v3570_v26  ;;  %v3572_v19 = vmul.f32 1.442695, %v3537_v8 }
 0x4c9   :  { %5447 = vpow2.f32 %v3566_v9  ;;  %v3568_v50 = vmul.f32 1.442695, %v3535_v3 }
 0x4ca   :  { %5449 = vpow2.f32 %v3572_v19 }
 0x4cb   :  { %5451 = vpow2.f32 %v3568_v50 }
 0x4d2   :  { %v5446_v28 = vpop.eup %5445 }
 0x4d3   :  { %v5448_v48 = vpop.eup %5447  ;;  %v4431_v46 = vadd.f32 -1.0, %v5446_v28 }
 0x4d4   :  { %v5450_v59 = vpop.eup %5449  ;;  %v4429_v25 = vadd.f32 -1.0, %v5448_v48 }
 0x4d5   :  { %v5452_v53 = vpop.eup %5451  ;;  %v3664_v15 = vmul.f32 1.6732632, %v4431_v46  ;;  %v4432_v14 = vadd.f32 -1.0, %v5450_v59 }
 0x4d6   :  { %v3662_v42 = vmul.f32 1.6732632, %v4429_v25  ;;  %v4430_v5 = vadd.f32 -1.0, %v5452_v53 }
 0x4d7   :  { %v3728_v32 = vsel %vm3696_vm0, %v3416_v41, %v3664_v15  ;;  %v3665_v58 = vmul.f32 1.6732632, %v4432_v14 }
 0x4d8   :  { %v3760_v22 = vmul.f32 1.050701, %v3728_v32  ;;  %v3726_v36 = vsel %vm3694_vm1, %v3408_v60, %v3662_v42  ;;  %v3663_v34 = vmul.f32 1.6732632, %v4430_v5 }
 0x4d9   :  { %v3758_v39 = vmul.f32 1.050701, %v3726_v36  ;;  %v3729_v35 = vsel %vm3697_vm2, %v3419_v62, %v3665_v58 }
 0x4da   :  { %3792 = vst [vmem:[#allocation13 + $0x10] sm:$0xff] %v3760_v22  ;;  %v3761_v30 = vmul.f32 1.050701, %v3729_v35  ;;  %v3727_v55 = vsel %vm3695_vm3, %v3411_v43, %v3663_v34 }
 0x4db   :  { %3790 = vst [vmem:[#allocation13] sm:$0xff] %v3758_v39  ;;  %v3759_v63 = vmul.f32 1.050701, %v3727_v55 }
 0x4dc   :  { %3793 = vst [vmem:[#allocation13 + $0x18] sm:$0xff] %v3761_v30  ;;  %v3823_v29 = vpack.c.bf16 %v3761_v30, %v3760_v22 }
 0x4dd   :  { %3791 = vst [vmem:[#allocation13 + $0x8] sm:$0xff] %v3759_v63  ;;  %v3822_v2 = vpack.c.bf16 %v3759_v63, %v3758_v39 }
 0x4df   :  { %4878 = vmatprep.mubr.bf16.mxu0 %v3822_v2 }
 0x4e0   :  { %4879 = vmatmul.mubr.bf16.vlgmr.msra.gmra.mrb[144].mxu0 %v3823_v29 }
 0x4ec   :  { %v4836_v4 = vpop.f32.mrb[148].mxu1 }
 0x4ed   :  { %v3432_v11 = vadd.f32 %v4836_v4, %v7879_v57  ;;  %v3423_v61 = vpop.f32.mrb[149].mxu1 }
 0x4ee   :  { %v3424_v23 = vadd.f32 %v7879_v57, %v3423_v61  ;;  %v4837_v40 = vpop.f32.mrb[150].mxu1 }
 0x4ef   :  { %v3540_v45 = vmin.f32 %v3432_v11, 0.0  ;;  %v3435_v0 = vadd.f32 %v4837_v40, %v7879_v57  ;;  %v3426_v16 = vpop.f32.mrb[151].mxu1  ;;  %vm3700_vm4 = vcmp.gt.f32.partialorder %v3432_v11, 0.0 }
 0x4f0   :  { %v3538_v54 = vmin.f32 %v3424_v23, 0.0  ;;  %v3427_v17 = vadd.f32 %v7879_v57, %v3426_v16  ;;  %vm3698_vm5 = vcmp.gt.f32.partialorder %v3424_v23, 0.0 }
 0x4f1   :  { %v3578_v38 = vmul.f32 1.442695, %v3540_v45  ;;  %v3541_v12 = vmin.f32 %v3435_v0, 0.0  ;;  %vm3701_vm6 = vcmp.gt.f32.partialorder %v3435_v0, 0.0 }
 0x4f2   :  { %v3574_v13 = vmul.f32 1.442695, %v3538_v54  ;;  %v3539_v31 = vmin.f32 %v3427_v17, 0.0  ;;  %vm3699_vm7 = vcmp.gt.f32.partialorder %v3427_v17, 0.0 }
 0x4f3   :  { %5453 = vpow2.f32 %v3578_v38  ;;  %v3580_v24 = vmul.f32 1.442695, %v3541_v12 }
 0x4f4   :  { %5455 = vpow2.f32 %v3574_v13  ;;  %v3576_v52 = vmul.f32 1.442695, %v3539_v31 }
 0x4f5   :  { %5457 = vpow2.f32 %v3580_v24 }
 0x4f6   :  { %5459 = vpow2.f32 %v3576_v52 }
 0x4fd   :  { %v5454_v37 = vpop.eup %5453 }
 0x4fe   :  { %v5456_v10 = vpop.eup %5455  ;;  %v4435_v51 = vadd.f32 -1.0, %v5454_v37 }
 0x4ff   :  { %v5458_v27 = vpop.eup %5457  ;;  %v4433_v6 = vadd.f32 -1.0, %v5456_v10 }
 0x500   :  { %v5460_v47 = vpop.eup %5459  ;;  %v3668_v33 = vmul.f32 1.6732632, %v4435_v51  ;;  %v4436_v49 = vadd.f32 -1.0, %v5458_v27 }
 0x501   :  { %v3666_v21 = vmul.f32 1.6732632, %v4433_v6  ;;  %v4434_v1 = vadd.f32 -1.0, %v5460_v47 }
 0x502   :  { %v3732_v41 = vsel %vm3700_vm4, %v3432_v11, %v3668_v33  ;;  %v3669_v44 = vmul.f32 1.6732632, %v4436_v49 }
 0x503   :  { %v3764_v60 = vmul.f32 1.050701, %v3732_v41  ;;  %v3730_v56 = vsel %vm3698_vm5, %v3424_v23, %v3666_v21  ;;  %v3667_v7 = vmul.f32 1.6732632, %v4434_v1 }
 0x504   :  { %v3762_v62 = vmul.f32 1.050701, %v3730_v56  ;;  %v3733_v18 = vsel %vm3701_vm6, %v3435_v0, %v3669_v44 }
 0x505   :  { %3796 = vst [vmem:[#allocation13 + $0x30] sm:$0xff] %v3764_v60  ;;  %v3765_v20 = vmul.f32 1.050701, %v3733_v18  ;;  %v3731_v43 = vsel %vm3699_vm7, %v3427_v17, %v3667_v7 }
 0x506   :  { %3794 = vst [vmem:[#allocation13 + $0x20] sm:$0xff] %v3762_v62  ;;  %v3763_v26 = vmul.f32 1.050701, %v3731_v43 }
 0x507   :  { %3797 = vst [vmem:[#allocation13 + $0x38] sm:$0xff] %v3765_v20  ;;  %v3825_v8 = vpack.c.bf16 %v3765_v20, %v3764_v60 }
 0x508   :  { %3795 = vst [vmem:[#allocation13 + $0x28] sm:$0xff] %v3763_v26  ;;  %v3824_v9 = vpack.c.bf16 %v3763_v26, %v3762_v62 }
 0x50a   :  { %4882 = vmatprep.mubr.bf16.mxu0 %v3824_v9 }
 0x50b   :  { %4883 = vmatmul.mubr.bf16.gmra.mrb[148].mxu0 %v3825_v8 }
 0x50c   :  { %v4840_v3 = vpop.f32.mrb[152].mxu1 }
 0x50d   :  { %v3448_v19 = vadd.f32 %v4840_v3, %v7879_v57  ;;  %v3439_v50 = vpop.f32.mrb[153].mxu1 }
 0x50e   :  { %v3440_v28 = vadd.f32 %v7879_v57, %v3439_v50  ;;  %v4841_v48 = vpop.f32.mrb[154].mxu1 }
 0x50f   :  { %v3544_v46 = vmin.f32 %v3448_v19, 0.0  ;;  %v3451_v59 = vadd.f32 %v4841_v48, %v7879_v57  ;;  %v3442_v25 = vpop.f32.mrb[155].mxu1  ;;  %vm3704_vm8 = vcmp.gt.f32.partialorder %v3448_v19, 0.0 }
 0x510   :  { %v3542_v53 = vmin.f32 %v3440_v28, 0.0  ;;  %v3443_v15 = vadd.f32 %v7879_v57, %v3442_v25  ;;  %vm3702_vm9 = vcmp.gt.f32.partialorder %v3440_v28, 0.0 }
 0x511   :  { %v3586_v14 = vmul.f32 1.442695, %v3544_v46  ;;  %v3545_v42 = vmin.f32 %v3451_v59, 0.0  ;;  %vm3705_vm10 = vcmp.gt.f32.partialorder %v3451_v59, 0.0 }
 0x512   :  { %v3582_v5 = vmul.f32 1.442695, %v3542_v53  ;;  %v3543_v32 = vmin.f32 %v3443_v15, 0.0  ;;  %vm3703_vm11 = vcmp.gt.f32.partialorder %v3443_v15, 0.0 }
 0x513   :  { %5461 = vpow2.f32 %v3586_v14  ;;  %v3588_v58 = vmul.f32 1.442695, %v3545_v42 }
 0x514   :  { %5463 = vpow2.f32 %v3582_v5  ;;  %v3584_v22 = vmul.f32 1.442695, %v3543_v32 }
 0x515   :  { %5465 = vpow2.f32 %v3588_v58 }
 0x516   :  { %5467 = vpow2.f32 %v3584_v22 }
 0x51d   :  { %v5462_v36 = vpop.eup %5461 }
 0x51e   :  { %v5464_v34 = vpop.eup %5463  ;;  %v4439_v39 = vadd.f32 -1.0, %v5462_v36 }
 0x51f   :  { %v5466_v35 = vpop.eup %5465  ;;  %v4437_v30 = vadd.f32 -1.0, %v5464_v34 }
 0x520   :  { %v5468_v55 = vpop.eup %5467  ;;  %v3672_v63 = vmul.f32 1.6732632, %v4439_v39  ;;  %v4440_v29 = vadd.f32 -1.0, %v5466_v35  ;;  %v4844_v11 = vpop.f32.mrb[156].mxu1 }
 0x521   :  { %v3670_v2 = vmul.f32 1.6732632, %v4437_v30  ;;  %v4438_v4 = vadd.f32 -1.0, %v5468_v55  ;;  %v3464_v40 = vadd.f32 %v4844_v11, %v7879_v57  ;;  %v3455_v45 = vpop.f32.mrb[157].mxu1 }
 0x522   :  { %v3736_v61 = vsel %vm3704_vm8, %v3448_v19, %v3672_v63  ;;  %v3673_v23 = vmul.f32 1.6732632, %v4440_v29  ;;  %v3456_v17 = vadd.f32 %v7879_v57, %v3455_v45  ;;  %v4845_v38 = vpop.f32.mrb[158].mxu1 }
 0x523   :  { %v3768_v0 = vmul.f32 1.050701, %v3736_v61  ;;  %v3734_v16 = vsel %vm3702_vm9, %v3440_v28, %v3670_v2  ;;  %v3671_v54 = vmul.f32 1.6732632, %v4438_v4  ;;  %v3548_v31 = vmin.f32 %v3464_v40, 0.0  ;;  %v3458_v24 = vpop.f32.mrb[159].mxu1 }
 0x524   :  { %v3766_v12 = vmul.f32 1.050701, %v3734_v16  ;;  %v3737_v13 = vsel %vm3705_vm10, %v3451_v59, %v3673_v23  ;;  %v3546_v10 = vmin.f32 %v3456_v17, 0.0  ;;  %v3467_v6 = vadd.f32 %v4845_v38, %v7879_v57 }
 0x525   :  { %3800 = vst [vmem:[#allocation13 + $0x50] sm:$0xff] %v3768_v0  ;;  %v3769_v52 = vmul.f32 1.050701, %v3737_v13  ;;  %v3735_v37 = vsel %vm3703_vm11, %v3443_v15, %v3671_v54  ;;  %v3594_v27 = vmul.f32 1.442695, %v3548_v31  ;;  %v3459_v47 = vadd.f32 %v7879_v57, %v3458_v24 }
 0x526   :  { %3798 = vst [vmem:[#allocation13 + $0x40] sm:$0xff] %v3766_v12  ;;  %v3767_v51 = vmul.f32 1.050701, %v3735_v37  ;;  %v3590_v33 = vmul.f32 1.442695, %v3546_v10  ;;  %v3549_v21 = vmin.f32 %v3467_v6, 0.0 }
 0x527   :  { %3801 = vst [vmem:[#allocation13 + $0x58] sm:$0xff] %v3769_v52  ;;  %v3827_v49 = vpack.c.bf16 %v3769_v52, %v3768_v0  ;;  %5469 = vpow2.f32 %v3594_v27  ;;  %v3547_v1 = vmin.f32 %v3459_v47, 0.0  ;;  %vm3708_vm12 = vcmp.gt.f32.partialorder %v3464_v40, 0.0 }
 0x528   :  { %3799 = vst [vmem:[#allocation13 + $0x48] sm:$0xff] %v3767_v51  ;;  %5471 = vpow2.f32 %v3590_v33  ;;  %v3826_v41 = vpack.c.bf16 %v3767_v51, %v3766_v12  ;;  %v3596_v44 = vmul.f32 1.442695, %v3549_v21  ;;  %vm3706_vm13 = vcmp.gt.f32.partialorder %v3456_v17, 0.0 }
 0x529   :  { %v3592_v60 = vmul.f32 1.442695, %v3547_v1  ;;  %vm3709_vm14 = vcmp.gt.f32.partialorder %v3467_v6, 0.0  ;;  %vm3707_vm15 = vcmp.gt.f32.partialorder %v3459_v47, 0.0 }
 0x52a   :  { %4886 = vmatprep.mubr.bf16.mxu0 %v3826_v41  ;;  %5473 = vpow2.f32 %v3596_v44 }
 0x52b   :  { %4887 = vmatmul.mubr.bf16.gmra.mrb[152].mxu0 %v3827_v49  ;;  %5475 = vpow2.f32 %v3592_v60 }
 0x531   :  { %v5470_v56 = vpop.eup %5469 }
 0x532   :  { %v5472_v7 = vpop.eup %5471  ;;  %v4443_v62 = vadd.f32 -1.0, %v5470_v56 }
 0x533   :  { %v4441_v18 = vadd.f32 -1.0, %v5472_v7 }
 0x534   :  { %v3676_v43 = vmul.f32 1.6732632, %v4443_v62  ;;  %v5474_v9 = vpop.eup %5473 }
 0x535   :  { %v4848_v20 = vpop.f32.mrb[160].mxu1  ;;  %v3674_v3 = vmul.f32 1.6732632, %v4441_v18  ;;  %v5476_v28 = vpop.eup %5475  ;;  %v4444_v46 = vadd.f32 -1.0, %v5474_v9 }
 0x536   :  { %v3480_v26 = vadd.f32 %v4848_v20, %v7879_v57  ;;  %v3471_v8 = vpop.f32.mrb[161].mxu1  ;;  %v3740_v48 = vsel %vm3708_vm12, %v3464_v40, %v3676_v43  ;;  %v4442_v14 = vadd.f32 -1.0, %v5476_v28 }
 0x537   :  { %v3472_v19 = vadd.f32 %v7879_v57, %v3471_v8  ;;  %v4849_v50 = vpop.f32.mrb[162].mxu1  ;;  %v3772_v53 = vmul.f32 1.050701, %v3740_v48  ;;  %v3738_v15 = vsel %vm3706_vm13, %v3456_v17, %v3674_v3  ;;  %v3677_v32 = vmul.f32 1.6732632, %v4444_v46 }
 0x538   :  { %v3552_v59 = vmin.f32 %v3480_v26, 0.0  ;;  %v3474_v25 = vpop.f32.mrb[163].mxu1  ;;  %v3770_v5 = vmul.f32 1.050701, %v3738_v15  ;;  %v3483_v22 = vadd.f32 %v4849_v50, %v7879_v57  ;;  %v3675_v36 = vmul.f32 1.6732632, %v4442_v14 }
 0x539   :  { %v3550_v42 = vmin.f32 %v3472_v19, 0.0  ;;  %3804 = vst [vmem:[#allocation13 + $0x70] sm:$0xff] %v3772_v53  ;;  %v3475_v39 = vadd.f32 %v7879_v57, %v3474_v25  ;;  %v3741_v35 = vsel %vm3709_vm14, %v3467_v6, %v3677_v32  ;;  %vm3712_vm0 = vcmp.gt.f32.partialorder %v3480_v26, 0.0 }
 0x53a   :  { %v3602_v58 = vmul.f32 1.442695, %v3552_v59  ;;  %3802 = vst [vmem:[#allocation13 + $0x60] sm:$0xff] %v3770_v5  ;;  %v3553_v30 = vmin.f32 %v3483_v22, 0.0  ;;  %v3773_v55 = vmul.f32 1.050701, %v3741_v35  ;;  %v3739_v63 = vsel %vm3707_vm15, %v3459_v47, %v3675_v36 }
 0x53b   :  { %v3598_v34 = vmul.f32 1.442695, %v3550_v42  ;;  %v3551_v29 = vmin.f32 %v3475_v39, 0.0  ;;  %v3771_v2 = vmul.f32 1.050701, %v3739_v63  ;;  %vm3710_vm1 = vcmp.gt.f32.partialorder %v3472_v19, 0.0 }
 0x53c   :  { %5477 = vpow2.f32 %v3602_v58  ;;  %v3604_v4 = vmul.f32 1.442695, %v3553_v30  ;;  %3805 = vst [vmem:[#allocation13 + $0x78] sm:$0xff] %v3773_v55  ;;  %v3829_v61 = vpack.c.bf16 %v3773_v55, %v3772_v53  ;;  %vm3713_vm2 = vcmp.gt.f32.partialorder %v3483_v22, 0.0 }
 0x53d   :  { %5479 = vpow2.f32 %v3598_v34  ;;  %v3600_v11 = vmul.f32 1.442695, %v3551_v29  ;;  %3803 = vst [vmem:[#allocation13 + $0x68] sm:$0xff] %v3771_v2  ;;  %v3828_v23 = vpack.c.bf16 %v3771_v2, %v3770_v5  ;;  %vm3711_vm3 = vcmp.gt.f32.partialorder %v3475_v39, 0.0 }
 0x53e   :  { %5481 = vpow2.f32 %v3604_v4 }
 0x53f   :  { %5483 = vpow2.f32 %v3600_v11  ;;  %4890 = vmatprep.mubr.bf16.mxu0 %v3828_v23 }
 0x540   :  { %4891 = vmatmul.mubr.bf16.gmra.mrb[156].mxu0 %v3829_v61 }
 0x546   :  { %v5478_v40 = vpop.eup %5477 }
 0x547   :  { %v5480_v45 = vpop.eup %5479  ;;  %v4447_v0 = vadd.f32 -1.0, %v5478_v40 }
 0x548   :  { %v4445_v16 = vadd.f32 -1.0, %v5480_v45  ;;  %v5482_v38 = vpop.eup %5481 }
 0x549   :  { %v3680_v54 = vmul.f32 1.6732632, %v4447_v0  ;;  %v5484_v24 = vpop.eup %5483  ;;  %v4448_v37 = vadd.f32 -1.0, %v5482_v38 }
 0x54a   :  { %v4852_v17 = vpop.f32.mrb[164].mxu1  ;;  %v3678_v12 = vmul.f32 1.6732632, %v4445_v16  ;;  %v4446_v47 = vadd.f32 -1.0, %v5484_v24 }
 0x54b   :  { %v3496_v13 = vadd.f32 %v4852_v17, %v7879_v57  ;;  %v3487_v31 = vpop.f32.mrb[165].mxu1  ;;  %v3744_v52 = vsel %vm3712_vm0, %v3480_v26, %v3680_v54  ;;  %v3681_v1 = vmul.f32 1.6732632, %v4448_v37 }
 0x54c   :  { %v3488_v10 = vadd.f32 %v7879_v57, %v3487_v31  ;;  %v4853_v51 = vpop.f32.mrb[166].mxu1  ;;  %v3776_v27 = vmul.f32 1.050701, %v3744_v52  ;;  %v3742_v6 = vsel %vm3710_vm1, %v3472_v19, %v3678_v12  ;;  %v3679_v44 = vmul.f32 1.6732632, %v4446_v47 }
 0x54d   :  { %v3556_v33 = vmin.f32 %v3496_v13, 0.0  ;;  %v3490_v49 = vpop.f32.mrb[167].mxu1  ;;  %v3774_v21 = vmul.f32 1.050701, %v3742_v6  ;;  %v3499_v56 = vadd.f32 %v4853_v51, %v7879_v57  ;;  %v3745_v7 = vsel %vm3713_vm2, %v3483_v22, %v3681_v1 }
 0x54e   :  { %v3554_v41 = vmin.f32 %v3488_v10, 0.0  ;;  %3808 = vst [vmem:[#allocation13 + $0x90] sm:$0xff] %v3776_v27  ;;  %v3491_v18 = vadd.f32 %v7879_v57, %v3490_v49  ;;  %v3777_v20 = vmul.f32 1.050701, %v3745_v7  ;;  %v3743_v43 = vsel %vm3711_vm3, %v3475_v39, %v3679_v44 }
 0x54f   :  { %v3610_v60 = vmul.f32 1.442695, %v3556_v33  ;;  %3806 = vst [vmem:[#allocation13 + $0x80] sm:$0xff] %v3774_v21  ;;  %v3557_v26 = vmin.f32 %v3499_v56, 0.0  ;;  %v3775_v8 = vmul.f32 1.050701, %v3743_v43 }
 0x550   :  { %v3606_v62 = vmul.f32 1.442695, %v3554_v41  ;;  %v3555_v9 = vmin.f32 %v3491_v18, 0.0  ;;  %3809 = vst [vmem:[#allocation13 + $0x98] sm:$0xff] %v3777_v20  ;;  %v3831_v19 = vpack.c.bf16 %v3777_v20, %v3776_v27  ;;  %vm3716_vm4 = vcmp.gt.f32.partialorder %v3496_v13, 0.0 }
 0x551   :  { %5485 = vpow2.f32 %v3610_v60  ;;  %v3612_v3 = vmul.f32 1.442695, %v3557_v26  ;;  %3807 = vst [vmem:[#allocation13 + $0x88] sm:$0xff] %v3775_v8  ;;  %v3830_v28 = vpack.c.bf16 %v3775_v8, %v3774_v21  ;;  %vm3714_vm5 = vcmp.gt.f32.partialorder %v3488_v10, 0.0 }
 0x552   :  { %5487 = vpow2.f32 %v3606_v62  ;;  %v3608_v50 = vmul.f32 1.442695, %v3555_v9  ;;  %vm3717_vm6 = vcmp.gt.f32.partialorder %v3499_v56, 0.0  ;;  %vm3715_vm7 = vcmp.gt.f32.partialorder %v3491_v18, 0.0 }
 0x553   :  { %5489 = vpow2.f32 %v3612_v3  ;;  %4894 = vmatprep.mubr.bf16.mxu0 %v3830_v28 }
 0x554   :  { %5491 = vpow2.f32 %v3608_v50  ;;  %4895 = vmatmul.mubr.bf16.gmra.mrb[160].mxu0 %v3831_v19 }
 0x55b   :  { %v5486_v48 = vpop.eup %5485 }
 0x55c   :  { %v5488_v46 = vpop.eup %5487  ;;  %v4451_v59 = vadd.f32 -1.0, %v5486_v48  ;;  %v4856_v25 = vpop.f32.mrb[168].mxu1 }
 0x55d   :  { %v4449_v53 = vadd.f32 -1.0, %v5488_v46  ;;  %v7906_v15 = vadd.f32 %v4856_v25, %v7879_v57  ;;  %v3503_v14 = vpop.f32.mrb[169].mxu1  ;;  %v5490_v58 = vpop.eup %5489 }
 0x55e   :  { %v3684_v42 = vmul.f32 1.6732632, %v4451_v59  ;;  %v7909_v5 = vadd.f32 %v7879_v57, %v3503_v14  ;;  %v4857_v32 = vpop.f32.mrb[170].mxu1  ;;  %v5492_v35 = vpop.eup %5491  ;;  %v4452_v55 = vadd.f32 -1.0, %v5490_v58 }
 0x55f   :  { %v3682_v22 = vmul.f32 1.6732632, %v4449_v53  ;;  %v3560_v36 = vmin.f32 %v7906_v15, 0.0  ;;  %v7913_v34 = vadd.f32 %v4857_v32, %v7879_v57  ;;  %v3506_v39 = vpop.f32.mrb[171].mxu1  ;;  %v4450_v4 = vadd.f32 -1.0, %v5492_v35 }
 0x560   :  { %v3748_v30 = vsel %vm3716_vm4, %v3496_v13, %v3684_v42  ;;  %v3558_v63 = vmin.f32 %v7909_v5, 0.0  ;;  %v3685_v23 = vmul.f32 1.6732632, %v4452_v55  ;;  %v7917_v45 = vadd.f32 %v7879_v57, %v3506_v39 }
 0x561   :  { %v3780_v29 = vmul.f32 1.050701, %v3748_v30  ;;  %v3746_v2 = vsel %vm3714_vm5, %v3488_v10, %v3682_v22  ;;  %v3618_v11 = vmul.f32 1.442695, %v3560_v36  ;;  %v3683_v0 = vmul.f32 1.6732632, %v4450_v4 }
 0x562   :  { %v3778_v61 = vmul.f32 1.050701, %v3746_v2  ;;  %v3614_v40 = vmul.f32 1.442695, %v3558_v63  ;;  %v3561_v16 = vmin.f32 %v7913_v34, 0.0  ;;  %v3749_v54 = vsel %vm3717_vm6, %v3499_v56, %v3685_v23 }
 0x563   :  { %3812 = vst [vmem:[#allocation13 + $0xb0] sm:$0xff] %v3780_v29  ;;  %5493 = vpow2.f32 %v3618_v11  ;;  %v3559_v17 = vmin.f32 %v7917_v45, 0.0  ;;  %v3781_v38 = vmul.f32 1.050701, %v3749_v54  ;;  %v3747_v12 = vsel %vm3715_vm7, %v3491_v18, %v3683_v0 }
 0x564   :  { %3810 = vst [vmem:[#allocation13 + $0xa0] sm:$0xff] %v3778_v61  ;;  %5495 = vpow2.f32 %v3614_v40  ;;  %v3620_v13 = vmul.f32 1.442695, %v3561_v16  ;;  %v3779_v31 = vmul.f32 1.050701, %v3747_v12  ;;  %vm3720_vm8 = vcmp.gt.f32.partialorder %v7906_v15, 0.0 }
 0x565   :  { %v3616_v24 = vmul.f32 1.442695, %v3559_v17  ;;  %3813 = vst [vmem:[#allocation13 + $0xb8] sm:$0xff] %v3781_v38  ;;  %v3833_v52 = vpack.c.bf16 %v3781_v38, %v3780_v29  ;;  %vm3718_vm9 = vcmp.gt.f32.partialorder %v7909_v5, 0.0  ;;  %vm3721_vm10 = vcmp.gt.f32.partialorder %v7913_v34, 0.0 }
 0x566   :  { %5497 = vpow2.f32 %v3620_v13  ;;  %3811 = vst [vmem:[#allocation13 + $0xa8] sm:$0xff] %v3779_v31  ;;  %v3832_v37 = vpack.c.bf16 %v3779_v31, %v3778_v61  ;;  %vm3719_vm11 = vcmp.gt.f32.partialorder %v7917_v45, 0.0  ;;  %v7956_v31 = vld [vmem:[%s8030_s10] ss:$0 sm:$0xff]  ;;  %s5708_s10 = smov [#allocation13]  }
 0x567   :  { %5499 = vpow2.f32 %v3616_v24  ;;  %s4107_s18 = sshll.u32 %s5708_s10, 4  ;;  %s4108_s18 = int_to_ptr.vmem [resolvable:$true] %s4107_s18 }
 0x568   :  { %4898 = vmatprep.mubr.bf16.mxu0 %v3832_v37  ;;  %s5641_s25 = scalar_lea.vmem %s4108_s18, 4096  ;;  %p5646_p7 = scmp.lt.s32.totalorder %s4108_s18, %s4108_s18 }
 0x569   :  { %4899 = vmatmul.mubr.bf16.gmra.mrb[164].mxu0 %v3833_v52  ;;  %p5642_p6 = scmp.ne.s32.totalorder %s4108_s18, %s5641_s25  ;;  %p5647_p8 = scmp.lt.s32.totalorder %s5641_s25, %s5641_s25 }
 0x56a   :  { %v4860_v10 = vpop.f32.mrb[172].mxu1 }
 0x56b   :  { %v7922_v51 = vadd.f32 %v4860_v10, %v7879_v57  ;;  %v3519_v27 = vpop.f32.mrb[173].mxu1  ;;  %p5648_p9 = por %p5647_p8, %p5646_p7 }
 0x56c   :  { %v7925_v6 = vadd.f32 %v7879_v57, %v3519_v27  ;;  %v4861_v47 = vpop.f32.mrb[174].mxu1 }
 0x56d   :  { %v5494_v33 = vpop.eup %5493  ;;  %v3564_v49 = vmin.f32 %v7922_v51, 0.0  ;;  %v7929_v21 = vadd.f32 %v4861_v47, %v7879_v57  ;;  %v3522_v1 = vpop.f32.mrb[175].mxu1  ;;  %vm3724_vm12 = vcmp.gt.f32.partialorder %v7922_v51, 0.0  ;;  %p5649_p10 = pnand %p5648_p9, %p5642_p6 }
 0x56e   :  { %v5496_v41 = vpop.eup %5495  ;;  %v4455_v44 = vadd.f32 -1.0, %v5494_v33  ;;  %v3562_v60 = vmin.f32 %v7925_v6, 0.0  ;;  %v7933_v56 = vadd.f32 %v7879_v57, %v3522_v1  ;;  %vm3722_vm13 = vcmp.gt.f32.partialorder %v7925_v6, 0.0 }
 0x56f   :  { %v4453_v7 = vadd.f32 -1.0, %v5496_v41  ;;  %v3626_v62 = vmul.f32 1.442695, %v3564_v49  ;;  %v3565_v18 = vmin.f32 %v7929_v21, 0.0  ;;  %vm3725_vm14 = vcmp.gt.f32.partialorder %v7929_v21, 0.0 }
 0x570   :  { %v3688_v20 = vmul.f32 1.6732632, %v4455_v44  ;;  %v3622_v43 = vmul.f32 1.442695, %v3562_v60  ;;  %v3563_v26 = vmin.f32 %v7933_v56, 0.0  ;;  %v5498_v8 = vpop.eup %5497  ;;  %vm3723_vm15 = vcmp.gt.f32.partialorder %v7933_v56, 0.0 }
 0x571   :  { %v3686_v9 = vmul.f32 1.6732632, %v4453_v7  ;;  %5501 = vpow2.f32 %v3626_v62  ;;  %v3628_v3 = vmul.f32 1.442695, %v3565_v18  ;;  %v5500_v19 = vpop.eup %5499  ;;  %v4456_v50 = vadd.f32 -1.0, %v5498_v8 }
 0x572   :  { %v3752_v57 = vsel %vm3720_vm8, %v7906_v15, %v3688_v20  ;;  %5503 = vpow2.f32 %v3622_v43  ;;  %v3624_v28 = vmul.f32 1.442695, %v3563_v26  ;;  %v4454_v59 = vadd.f32 -1.0, %v5500_v19 }
 0x573   :  { %v3784_v48 = vmul.f32 1.050701, %v3752_v57  ;;  %v3750_v46 = vsel %vm3718_vm9, %v7909_v5, %v3686_v9  ;;  %5505 = vpow2.f32 %v3628_v3  ;;  %v3689_v53 = vmul.f32 1.6732632, %v4456_v50 }
 0x574   :  { %v3782_v25 = vmul.f32 1.050701, %v3750_v46  ;;  %5507 = vpow2.f32 %v3624_v28  ;;  %v3687_v14 = vmul.f32 1.6732632, %v4454_v59 }
 0x575   :  { %3816 = vst [vmem:[#allocation13 + $0xd0] sm:$0xff] %v3784_v48  ;;  %v3753_v42 = vsel %vm3721_vm10, %v7913_v34, %v3689_v53 }
 0x576   :  { %3814 = vst [vmem:[#allocation13 + $0xc0] sm:$0xff] %v3782_v25  ;;  %v3785_v15 = vmul.f32 1.050701, %v3753_v42  ;;  %v3751_v32 = vsel %vm3719_vm11, %v7917_v45, %v3687_v14 }
 0x577   :  { %v3783_v58 = vmul.f32 1.050701, %v3751_v32 }
 0x578   :  { %3817 = vst [vmem:[#allocation13 + $0xd8] sm:$0xff] %v3785_v15  ;;  %v3835_v5 = vpack.c.bf16 %v3785_v15, %v3784_v48 }
 0x579   :  { %3815 = vst [vmem:[#allocation13 + $0xc8] sm:$0xff] %v3783_v58  ;;  %v3834_v22 = vpack.c.bf16 %v3783_v58, %v3782_v25 }
 0x57b   :  { %v5502_v36 = vpop.eup %5501  ;;  %4902 = vmatprep.mubr.bf16.mxu0 %v3834_v22 }
 0x57c   :  { %v5504_v39 = vpop.eup %5503  ;;  %v4459_v35 = vadd.f32 -1.0, %v5502_v36  ;;  %4903 = vmatmul.mubr.bf16.gmra.mrb[168].mxu0 %v3835_v5 }
 0x57d   :  { %v5506_v30 = vpop.eup %5505  ;;  %v4457_v55 = vadd.f32 -1.0, %v5504_v39 }
 0x57e   :  { %v5508_v63 = vpop.eup %5507  ;;  %v3692_v29 = vmul.f32 1.6732632, %v4459_v35  ;;  %v4460_v34 = vadd.f32 -1.0, %v5506_v30 }
 0x57f   :  { %v3690_v2 = vmul.f32 1.6732632, %v4457_v55  ;;  %v4458_v4 = vadd.f32 -1.0, %v5508_v63 }
 0x580   :  { %v3756_v11 = vsel %vm3724_vm12, %v7922_v51, %v3692_v29  ;;  %v3693_v61 = vmul.f32 1.6732632, %v4460_v34 }
 0x581   :  { %v3788_v23 = vmul.f32 1.050701, %v3756_v11  ;;  %v3754_v40 = vsel %vm3722_vm13, %v7925_v6, %v3690_v2  ;;  %v3691_v45 = vmul.f32 1.6732632, %v4458_v4 }
 0x582   :  { %v3786_v0 = vmul.f32 1.050701, %v3754_v40  ;;  %v3757_v16 = vsel %vm3725_vm14, %v7929_v21, %v3693_v61 }
 0x583   :  { %3820 = vst [vmem:[#allocation13 + $0xf0] sm:$0xff] %v3788_v23  ;;  %v3789_v54 = vmul.f32 1.050701, %v3757_v16  ;;  %v3755_v17 = vsel %vm3723_vm15, %v7933_v56, %v3691_v45 }
 0x584   :  { %3818 = vst [vmem:[#allocation13 + $0xe0] sm:$0xff] %v3786_v0  ;;  %v3787_v38 = vmul.f32 1.050701, %v3755_v17 }
 0x585   :  { %3821 = vst [vmem:[#allocation13 + $0xf8] sm:$0xff] %v3789_v54  ;;  %v3837_v12 = vpack.c.bf16 %v3789_v54, %v3788_v23 }
 0x586   :  { %3819 = vst [vmem:[#allocation13 + $0xe8] sm:$0xff] %v3787_v38  ;;  %v3836_v13 = vpack.c.bf16 %v3787_v38, %v3786_v0 }
 0x588   :  { %4906 = vmatprep.mubr.bf16.mxu0 %v3836_v13 }
 0x589   :  { %4907 = vmatmul.mubr.bf16.gmra.mrb[172].mxu0 %v3837_v12 }
 0x5b3   :  { %v4880_v24 = vpop.f32.mrb[144].mxu0 }
 0x5b4   :  { %v3952_v52 = vadd.f32 %v4880_v24, %v7956_v31  ;;  %v3943_v37 = vpop.f32.mrb[145].mxu0 }
 0x5b5   :  { %v3944_v10 = vadd.f32 %v7956_v31, %v3943_v37  ;;  %v4881_v51 = vpop.f32.mrb[146].mxu0 }
 0x5b6   :  { %4072 = vst [vmem:[#allocation14 + $0x10] sm:$0xff] %v3952_v52  ;;  %v3955_v27 = vadd.f32 %v4881_v51, %v7956_v31  ;;  %v3946_v6 = vpop.f32.mrb[147].mxu0 }
 0x5b7   :  { %4070 = vst [vmem:[#allocation14] sm:$0xff] %v3944_v10  ;;  %v3947_v47 = vadd.f32 %v7956_v31, %v3946_v6 }
 0x5b8   :  { %4073 = vst [vmem:[#allocation14 + $0x18] sm:$0xff] %v3955_v27 }
 0x5b9   :  { %4071 = vst [vmem:[#allocation14 + $0x8] sm:$0xff] %v3947_v47 }
 0x5de   :  { %v4884_v33 = vpop.f32.mrb[148].mxu0 }
 0x5df   :  { %v3968_v49 = vadd.f32 %v4884_v33, %v7956_v31  ;;  %v3959_v21 = vpop.f32.mrb[149].mxu0 }
 0x5e0   :  { %v3960_v1 = vadd.f32 %v7956_v31, %v3959_v21  ;;  %v4885_v41 = vpop.f32.mrb[150].mxu0 }
 0x5e1   :  { %4076 = vst [vmem:[#allocation14 + $0x30] sm:$0xff] %v3968_v49  ;;  %v3971_v44 = vadd.f32 %v4885_v41, %v7956_v31  ;;  %v3962_v60 = vpop.f32.mrb[151].mxu0 }
 0x5e2   :  { %4074 = vst [vmem:[#allocation14 + $0x20] sm:$0xff] %v3960_v1  ;;  %v3963_v56 = vadd.f32 %v7956_v31, %v3962_v60 }
 0x5e3   :  { %5652 = shalt.err (!%p5649_p10)
}
 0x5e4   :  { %s5653_s3 = scalar_lea.hbm %s8031_s11, 4096 }
 0x5e5   :  { %p5654_p11 = scmp.ne.s32.totalorder %s8031_s11, %s5653_s3  ;;  %p5657_p12 = scmp.lt.u32.totalorder %s5653_s3, %s8031_s11 }
 0x5e7   :  { %p5659_p13 = pnand %p5657_p12, %p5654_p11 }
 0x5e9   :  { %5662 = shalt.err (!%p5659_p13)
}
 0x5ea   :  { %s5709_s15 = smov 128   ;;  %s5710_s16 = smov 8   ;;  %4077 = vst [vmem:[#allocation14 + $0x38] sm:$0xff] %v3971_v44  ;;  %4075 = vst [vmem:[#allocation14 + $0x28] sm:$0xff] %v3963_v56 }
 0x5eb   :  { %4113 = dma.vmem_to_hbm [thread:$0]  %s4108_s18, 4096, %s8031_s11, [#allocation4], %s5709_s15, %s5709_s15, %s5710_s16  }
 0x5ec   :  { %s5711_s11 = smov [#allocation14]  }
 0x5ed   :  { %s4119_s20 = sshll.u32 %s5711_s11, 4  ;;  %s4120_s20 = int_to_ptr.vmem [resolvable:$true] %s4119_s20 }
 0x5ee   :  { %s5663_s19 = scalar_lea.vmem %s4120_s20, 4096  ;;  %p5668_p1 = scmp.lt.s32.totalorder %s4120_s20, %s4120_s20 }
 0x5ef   :  { %p5664_p0 = scmp.ne.s32.totalorder %s4120_s20, %s5663_s19  ;;  %p5669_p2 = scmp.lt.s32.totalorder %s5663_s19, %s5663_s19 }
 0x5f1   :  { %p5670_p3 = por %p5669_p2, %p5668_p1 }
 0x5f3   :  { %p5671_p4 = pnand %p5670_p3, %p5664_p0 }
 0x5fe   :  { %v4888_v7 = vpop.f32.mrb[152].mxu0 }
 0x5ff   :  { %v3984_v62 = vadd.f32 %v4888_v7, %v7956_v31  ;;  %v3975_v18 = vpop.f32.mrb[153].mxu0 }
 0x600   :  { %v3976_v20 = vadd.f32 %v7956_v31, %v3975_v18  ;;  %v4889_v43 = vpop.f32.mrb[154].mxu0 }
 0x601   :  { %4080 = vst [vmem:[#allocation14 + $0x50] sm:$0xff] %v3984_v62  ;;  %v3987_v26 = vadd.f32 %v4889_v43, %v7956_v31  ;;  %v3978_v8 = vpop.f32.mrb[155].mxu0 }
 0x602   :  { %4078 = vst [vmem:[#allocation14 + $0x40] sm:$0xff] %v3976_v20  ;;  %v3979_v9 = vadd.f32 %v7956_v31, %v3978_v8 }
 0x603   :  { %4081 = vst [vmem:[#allocation14 + $0x58] sm:$0xff] %v3987_v26 }
 0x604   :  { %4079 = vst [vmem:[#allocation14 + $0x48] sm:$0xff] %v3979_v9 }
 0x613   :  { %v4892_v3 = vpop.f32.mrb[156].mxu0 }
 0x614   :  { %v4000_v19 = vadd.f32 %v4892_v3, %v7956_v31  ;;  %v3991_v57 = vpop.f32.mrb[157].mxu0 }
 0x615   :  { %v3992_v50 = vadd.f32 %v7956_v31, %v3991_v57  ;;  %v4893_v28 = vpop.f32.mrb[158].mxu0 }
 0x616   :  { %4084 = vst [vmem:[#allocation14 + $0x70] sm:$0xff] %v4000_v19  ;;  %v4003_v48 = vadd.f32 %v4893_v28, %v7956_v31  ;;  %v3994_v46 = vpop.f32.mrb[159].mxu0 }
 0x617   :  { %4082 = vst [vmem:[#allocation14 + $0x60] sm:$0xff] %v3992_v50  ;;  %v3995_v59 = vadd.f32 %v7956_v31, %v3994_v46 }
 0x618   :  { %4085 = vst [vmem:[#allocation14 + $0x78] sm:$0xff] %v4003_v48 }
 0x619   :  { %4083 = vst [vmem:[#allocation14 + $0x68] sm:$0xff] %v3995_v59 }
 0x627   :  { %v4896_v25 = vpop.f32.mrb[160].mxu0 }
 0x628   :  { %v4016_v53 = vadd.f32 %v4896_v25, %v7956_v31  ;;  %v4007_v14 = vpop.f32.mrb[161].mxu0 }
 0x629   :  { %v4008_v42 = vadd.f32 %v7956_v31, %v4007_v14  ;;  %v4897_v15 = vpop.f32.mrb[162].mxu0 }
 0x62a   :  { %4088 = vst [vmem:[#allocation14 + $0x90] sm:$0xff] %v4016_v53  ;;  %v4019_v32 = vadd.f32 %v4897_v15, %v7956_v31  ;;  %v4010_v58 = vpop.f32.mrb[163].mxu0 }
 0x62b   :  { %4086 = vst [vmem:[#allocation14 + $0x80] sm:$0xff] %v4008_v42  ;;  %v4011_v5 = vadd.f32 %v7956_v31, %v4010_v58 }
 0x62c   :  { %4089 = vst [vmem:[#allocation14 + $0x98] sm:$0xff] %v4019_v32 }
 0x62d   :  { %4087 = vst [vmem:[#allocation14 + $0x88] sm:$0xff] %v4011_v5 }
 0x63c   :  { %v4900_v22 = vpop.f32.mrb[164].mxu0 }
 0x63d   :  { %v4032_v36 = vadd.f32 %v4900_v22, %v7956_v31  ;;  %v4023_v39 = vpop.f32.mrb[165].mxu0 }
 0x63e   :  { %v4024_v35 = vadd.f32 %v7956_v31, %v4023_v39  ;;  %v4901_v30 = vpop.f32.mrb[166].mxu0 }
 0x63f   :  { %4092 = vst [vmem:[#allocation14 + $0xb0] sm:$0xff] %v4032_v36  ;;  %v4035_v55 = vadd.f32 %v4901_v30, %v7956_v31  ;;  %v4026_v63 = vpop.f32.mrb[167].mxu0 }
 0x640   :  { %4090 = vst [vmem:[#allocation14 + $0xa0] sm:$0xff] %v4024_v35  ;;  %v4027_v29 = vadd.f32 %v7956_v31, %v4026_v63 }
 0x641   :  { %4093 = vst [vmem:[#allocation14 + $0xb8] sm:$0xff] %v4035_v55 }
 0x642   :  { %4091 = vst [vmem:[#allocation14 + $0xa8] sm:$0xff] %v4027_v29 }
 0x64f   :  { %v4904_v34 = vpop.f32.mrb[168].mxu0 }
 0x650   :  { %v4048_v2 = vadd.f32 %v4904_v34, %v7956_v31  ;;  %v4039_v4 = vpop.f32.mrb[169].mxu0 }
 0x651   :  { %v4040_v11 = vadd.f32 %v7956_v31, %v4039_v4  ;;  %v4905_v61 = vpop.f32.mrb[170].mxu0 }
 0x652   :  { %4096 = vst [vmem:[#allocation14 + $0xd0] sm:$0xff] %v4048_v2  ;;  %v4051_v23 = vadd.f32 %v4905_v61, %v7956_v31  ;;  %v4042_v40 = vpop.f32.mrb[171].mxu0 }
 0x653   :  { %4094 = vst [vmem:[#allocation14 + $0xc0] sm:$0xff] %v4040_v11  ;;  %v4043_v45 = vadd.f32 %v7956_v31, %v4042_v40 }
 0x654   :  { %4097 = vst [vmem:[#allocation14 + $0xd8] sm:$0xff] %v4051_v23 }
 0x655   :  { %4095 = vst [vmem:[#allocation14 + $0xc8] sm:$0xff] %v4043_v45 }
 0x65c   :  { %v4908_v0 = vpop.f32.mrb[172].mxu0 }
 0x65d   :  { %v4064_v16 = vadd.f32 %v4908_v0, %v7956_v31  ;;  %v4055_v54 = vpop.f32.mrb[173].mxu0 }
 0x65e   :  { %v4056_v17 = vadd.f32 %v7956_v31, %v4055_v54  ;;  %v4909_v38 = vpop.f32.mrb[174].mxu0 }
 0x65f   :  { %4100 = vst [vmem:[#allocation14 + $0xf0] sm:$0xff] %v4064_v16  ;;  %v4067_v12 = vadd.f32 %v4909_v38, %v7956_v31  ;;  %v4058_v13 = vpop.f32.mrb[175].mxu0 }
 0x660   :  { %4098 = vst [vmem:[#allocation14 + $0xe0] sm:$0xff] %v4056_v17  ;;  %v4059_v24 = vadd.f32 %v7956_v31, %v4058_v13 }
 0x661   :  { %4101 = vst [vmem:[#allocation14 + $0xf8] sm:$0xff] %v4067_v12 }
 0x662   :  { %4099 = vst [vmem:[#allocation14 + $0xe8] sm:$0xff] %v4059_v24 }
 0x663   :  { %5674 = shalt.err (!%p5671_p4)
}
 0x664   :  { %s5675_s28 = scalar_lea.hbm %s8032_s12, 4096 }
 0x665   :  { %p5676_p5 = scmp.ne.s32.totalorder %s8032_s12, %s5675_s28  ;;  %p5679_p6 = scmp.lt.u32.totalorder %s5675_s28, %s8032_s12 }
 0x667   :  { %p5681_p7 = pnand %p5679_p6, %p5676_p5 }
 0x669   :  { %5684 = shalt.err (!%p5681_p7)
}
 0x66a   :  { %4125 = dma.vmem_to_hbm [thread:$0]  %s4120_s20, 4096, %s8032_s12, [#allocation15], %s5709_s15, %s5709_s15, %s5710_s16  }
 0x66b   :  { %5693 = dma.done.wait [#allocation4], 4096  }
 0x66c   :  { %5694 = vsyncadd [#allocation4], 4294963200 }
 0x66d   :  { %5695 = dma.done.wait [#allocation15], 4096  }
 0x66e   :  { %5696 = vsyncadd [#allocation15], 4294963200 }
 0x66f   :  { %4132 = vsyncpa [#allocation3], 1 }
 0x670   :  { %4133 = vsyncpa [#allocation6], 1 }
 0x671   :  { %4134 = vsyncpa [#allocation9], 1 }
 0x672   :  { %4135 = vsyncpa [#allocation12], 1 }
 0x673   :  { %4136 = vsyncpa [#allocation4], 1 }
 0x674   :  { %4137 = vsyncpa [#allocation15], 1 }

</bundles_post_ra>
